<compile_context>
chip_gen: v7x
topology: tpu7x:2x2x1
jax: 0.10.0
libtpu: 0.0.40
codegen_flags: <defaults>
</compile_context>

<pallas_src>
import functools

import jax
import jax.numpy as jnp
from jax import lax
from jax.experimental import pallas as pl
from jax.experimental.pallas import tpu as pltpu


# ------------------------- Pallas kernels -------------------------

def _matmul_kernel(a_ref, w_ref, o_ref):
    # Single K step (K <= 64), no accumulator scratch / pl.when needed.
    o_ref[...] = jnp.dot(a_ref[...], w_ref[...],
                         preferred_element_type=jnp.float32)


def pallas_matmul(a, w):
    """a: (M, K) bf16, w: (K, N) bf16 -> (M, N) f32. Single K step, tiled over M."""
    M, K = a.shape
    K2, N = w.shape
    assert K == K2

    if M <= 1024:
        tm = M
    else:
        tm = 1024
        while tm > 1 and M % tm != 0:
            tm //= 2
    assert M % tm == 0

    return pl.pallas_call(
        _matmul_kernel,
        out_shape=jax.ShapeDtypeStruct((M, N), jnp.float32),
        grid_spec=pltpu.PrefetchScalarGridSpec(
            num_scalar_prefetch=0,
            grid=(M // tm,),
            in_specs=[
                pl.BlockSpec((tm, K), lambda i: (i, 0)),
                pl.BlockSpec((K, N), lambda i: (0, 0)),
            ],
            out_specs=pl.BlockSpec((tm, N), lambda i: (i, 0)),
        ),
        compiler_params=pltpu.CompilerParams(
            dimension_semantics=("parallel",)),
    )(a, w)


def _bn_relu_kernel(x_ref, g_ref, b_ref, f_ref, o_ref, *, inv_count, eps):
    """Fused BatchNorm (batch stats) + affine + ReLU on a lane-dense view.

    x_ref: (rows, 128) f32 where lane l holds channel (l % Co).
    g_ref/b_ref: (1, 128) gamma/beta tiled per lane.
    f_ref: (128, 128) fold matrix, F[i, j] = 1 iff i % Co == j % Co.
    """
    x = x_ref[...]
    s1 = jnp.sum(x, axis=0, keepdims=True)          # (1, 128) per-lane sum
    s2 = jnp.sum(x * x, axis=0, keepdims=True)      # (1, 128) per-lane sum of squares
    s = jnp.concatenate([s1, s2], axis=0)           # (2, 128)
    # Combine lanes belonging to the same channel (tiny MXU matmul).
    s = jnp.dot(s, f_ref[...], preferred_element_type=jnp.float32)
    mean = s[0:1, :] * inv_count
    ex2 = s[1:2, :] * inv_count
    var = ex2 - mean * mean                          # biased variance (PyTorch fwd)
    scale = g_ref[...] * lax.rsqrt(var + eps)
    bias = b_ref[...] - mean * scale
    o_ref[...] = jnp.maximum(x * scale + bias, 0.0).astype(o_ref.dtype)


def pallas_bn_relu(y, gamma128, beta128, fold128, co, eps=1e-5):
    """y: (N, Ho, Wo, Co) f32 NHWC -> bf16 (rows, 128) lane-dense activated output."""
    total = y.size
    assert total % 128 == 0 and 128 % co == 0
    rows = total // 128
    count = total // co                              # N * Ho * Wo elements per channel
    x_flat = y.reshape(rows, 128)

    return pl.pallas_call(
        functools.partial(_bn_relu_kernel, inv_count=1.0 / count, eps=eps),
        out_shape=jax.ShapeDtypeStruct((rows, 128), jnp.bfloat16),
        grid_spec=pltpu.PrefetchScalarGridSpec(
            num_scalar_prefetch=0,
            grid=(1,),
            in_specs=[
                pl.BlockSpec((rows, 128), lambda i: (0, 0)),
                pl.BlockSpec((1, 128), lambda i: (0, 0)),
                pl.BlockSpec((1, 128), lambda i: (0, 0)),
                pl.BlockSpec((128, 128), lambda i: (0, 0)),
            ],
            out_specs=pl.BlockSpec((rows, 128), lambda i: (0, 0)),
        ),
    )(x_flat, gamma128, beta128, fold128)


def _tanh_kernel(x_ref, o_ref):
    o_ref[...] = jnp.tanh(x_ref[...])


def pallas_tanh(y):
    """Elementwise tanh on a lane-dense view of y (any shape, size % 128 == 0)."""
    total = y.size
    assert total % 128 == 0
    rows = total // 128
    x_flat = y.reshape(rows, 128)
    out = pl.pallas_call(
        _tanh_kernel,
        out_shape=jax.ShapeDtypeStruct((rows, 128), jnp.float32),
        grid_spec=pltpu.PrefetchScalarGridSpec(
            num_scalar_prefetch=0,
            grid=(1,),
            in_specs=[pl.BlockSpec((rows, 128), lambda i: (0, 0))],
            out_specs=pl.BlockSpec((rows, 128), lambda i: (0, 0)),
        ),
    )(x_flat)
    return out.reshape(y.shape)


# ------------------------- glue (plain JAX) -------------------------

def col2im_add(out2d, N, H, W, co, k, stride, padding):
    """Overlap-add of per-input-pixel patches -> ConvTranspose2d output (NHWC).

    out2d: (N*H*W, k*k*co) f32 from the input-stationary matmul
    (tap-major, channel-last -> each per-tap slice is a contiguous slab).
    """
    contrib = out2d.reshape(N, H, W, k, k, co)
    Hp = (H - 1) * stride + k
    Wp = (W - 1) * stride + k
    full = jnp.zeros((N, Hp, Wp, co), jnp.float32)
    for ky in range(k):
        for kx in range(k):
            full = full.at[:, ky:ky + stride * H:stride,
                              kx:kx + stride * W:stride, :].add(
                contrib[:, :, :, ky, kx, :])
    Ho = Hp - 2 * padding
    Wo = Wp - 2 * padding
    y = full[:, padding:padding + Ho, padding:padding + Wo, :]
    return y, Ho, Wo


# ------------------------- Generator -------------------------

def init_generator_params(key, z_dim=16, im_chan=1, hidden_dim=8):
    cfg = [
        # (Ci, Co, k, stride, padding, has_bn)
        (z_dim,          hidden_dim * 8, 4, 1, 0, True),
        (hidden_dim * 8, hidden_dim * 4, 4, 2, 1, True),
        (hidden_dim * 4, hidden_dim * 2, 4, 2, 1, True),
        (hidden_dim * 2, hidden_dim,     4, 2, 1, True),
        (hidden_dim,     im_chan,        4, 2, 1, False),
    ]
    lane = jnp.arange(128)
    layers = []
    for (ci, co, k, s, p, has_bn) in cfg:
        key, kw, kg, kb = jax.random.split(key, 4)
        w = 0.02 * jax.random.normal(kw, (ci, co, k, k), dtype=jnp.float32)
        layer = {
            "ci": ci, "co": co, "k": k, "stride": s, "pad": p, "has_bn": has_bn,
            # Layer-1 (1x1 input, s=1, p=0): matmul output is the NHWC activation.
            "direct": (s == 1 and p == 0),
            # Hoisted weight transform: (Ci, k*k*Co), channel-last per tap, bf16.
            "w2d": w.transpose(0, 2, 3, 1).reshape(ci, k * k * co
                                                   ).astype(jnp.bfloat16),
        }
        if has_bn:
            assert 128 % co == 0
            gamma = 1.0 + 0.01 * jax.random.normal(kg, (co,), dtype=jnp.float32)
            beta = 0.01 * jax.random.normal(kb, (co,), dtype=jnp.float32)
            reps = 128 // co
            layer["gamma128"] = jnp.tile(gamma, reps).reshape(1, 128)
            layer["beta128"] = jnp.tile(beta, reps).reshape(1, 128)
            layer["fold128"] = (lane[:, None] % co == lane[None, :] % co
                                ).astype(jnp.float32)
        layers.append(layer)
    return {"z_dim": z_dim, "layers": layers}


def generator_forward(noise, params):
    # noise: (N, z_dim) -> NCHW view (N, z_dim, 1, 1) == NHWC (N, 1, 1, z_dim).
    N = noise.shape[0]
    z_dim = params["z_dim"]
    a = noise.reshape(N, z_dim).astype(jnp.bfloat16)   # A matrix (M=N*1*1, Ci)
    H = W = 1
    final = None
    for lp in params["layers"]:
        co, k, s, p = lp["co"], lp["k"], lp["stride"], lp["pad"]
        out2d = pallas_matmul(a, lp["w2d"])              # (N*H*W, k*k*co) f32
        if lp["direct"] and H == 1 and W == 1:
            y = out2d.reshape(N, k, k, co)               # no overlap-add needed
            Ho = Wo = k
        else:
            y, Ho, Wo = col2im_add(out2d, N, H, W, co, k, s, p)  # (N,Ho,Wo,co) f32
        if lp["has_bn"]:
            act = pallas_bn_relu(y, lp["gamma128"], lp["beta128"],
                                 lp["fold128"], co)      # (rows, 128) bf16
            a = act.reshape(N * Ho * Wo, co)             # next layer's A (NHWC flat)
        else:  # final layer: Tanh, no BN
            final = pallas_tanh(y)                       # (N, Ho, Wo, co) f32
        H, W = Ho, Wo
    return final.transpose(0, 3, 1, 2)                   # single NHWC -> NCHW


# ------------------------- main -------------------------

if __name__ == "__main__":
    key = jax.random.PRNGKey(0)
    kp, kn = jax.random.split(key)

    z_dim, im_chan, hidden_dim, batch = 16, 1, 8, 2
    params = init_generator_params(kp, z_dim=z_dim, im_chan=im_chan,
                                   hidden_dim=hidden_dim)
    noise = jax.random.normal(kn, (batch, z_dim), dtype=jnp.float32)

    fwd = jax.jit(lambda n: generator_forward(n, params))
    out = jax.block_until_ready(fwd(noise))

    assert out.shape == (batch, im_chan, 64, 64), out.shape
    assert bool(jnp.all(jnp.isfinite(out)))
    assert bool(jnp.all(jnp.abs(out) <= 1.0 + 1e-6))  # tanh range
    print("KERNEL_OK")
</pallas_src>

<mosaic_0001>
module attributes {stable_mosaic.version = 11 : i64} {
  func.func @_matmul_kernel(%arg0: i32, %arg1: memref<2x16xbf16, #tpu.memory_space<vmem>>, %arg2: memref<16x1024xbf16, #tpu.memory_space<vmem>>, %arg3: memref<2x1024xf32, #tpu.memory_space<vmem>>) attributes {dimension_semantics = [#tpu.dimension_semantics<parallel>], iteration_bounds = array<i64: 1>, scalar_prefetch = 0 : i64, scratch_operands = 0 : i64, tpu.core_type = #tpu.core_type<tc>, window_params = [{transform_indices = @transform_0, window_bounds = array<i64: 2, 16>}, {pipeline_mode = #tpu.pipeline_mode<synchronous>, transform_indices = @transform_1, window_bounds = array<i64: 16, 1024>}, {transform_indices = @transform_2, window_bounds = array<i64: 2, 1024>}]} {
    %c0 = arith.constant 0 : index
    %c0_0 = arith.constant 0 : index
    %0 = vector.load %arg1[%c0, %c0_0] : memref<2x16xbf16, #tpu.memory_space<vmem>>, vector<2x16xbf16>
    %c0_1 = arith.constant 0 : index
    %c0_2 = arith.constant 0 : index
    %1 = vector.load %arg2[%c0_1, %c0_2] : memref<16x1024xbf16, #tpu.memory_space<vmem>>, vector<16x1024xbf16>
    %cst = arith.constant dense<0.000000e+00> : vector<2x1024xf32>
    %2 = tpu.matmul %0, %1, %cst {dimension_numbers = #tpu.dot_dimension_numbers<[1], [0], [0], [1], [0, 0, 1, 1], [], []>} : vector<2x16xbf16>, vector<16x1024xbf16>, vector<2x1024xf32> -> vector<2x1024xf32>
    %c0_3 = arith.constant 0 : index
    %c0_4 = arith.constant 0 : index
    %3 = vector.load %arg3[%c0_3, %c0_4] : memref<2x1024xf32, #tpu.memory_space<vmem>>, vector<2x1024xf32>
    tpu.vector_store %arg3[%c0_3, %c0_4], %2 {strides = array<i32>} : memref<2x1024xf32, #tpu.memory_space<vmem>>, vector<2x1024xf32>,
    return
  }
  func.func @transform_0(%arg0: i32) -> (i32, i32) {
    %c0_i32 = arith.constant 0 : i32
    %c0_i32_0 = arith.constant 0 : i32
    return %arg0, %c0_i32 : i32, i32
  }
  func.func @transform_1(%arg0: i32) -> (i32, i32) {
    %c0_i32 = arith.constant 0 : i32
    %c0_i32_0 = arith.constant 0 : i32
    %c0_i32_1 = arith.constant 0 : i32
    return %c0_i32, %c0_i32_0 : i32, i32
  }
  func.func @transform_2(%arg0: i32) -> (i32, i32) {
    %c0_i32 = arith.constant 0 : i32
    %c0_i32_0 = arith.constant 0 : i32
    return %arg0, %c0_i32 : i32, i32
  }
}

module attributes {stable_mosaic.version = 11 : i64} {
  func.func @_bn_relu_kernel(%arg0: i32, %arg1: memref<16x128xf32, #tpu.memory_space<vmem>>, %arg2: memref<1x128xf32, #tpu.memory_space<vmem>>, %arg3: memref<1x128xf32, #tpu.memory_space<vmem>>, %arg4: memref<128x128xf32, #tpu.memory_space<vmem>>, %arg5: memref<16x128xbf16, #tpu.memory_space<vmem>>) attributes {dimension_semantics = [#tpu.dimension_semantics<arbitrary>], iteration_bounds = array<i64: 1>, scalar_prefetch = 0 : i64, scratch_operands = 0 : i64, tpu.core_type = #tpu.core_type<tc>, window_params = [{pipeline_mode = #tpu.pipeline_mode<synchronous>, transform_indices = @transform_0, window_bounds = array<i64: 16, 128>}, {pipeline_mode = #tpu.pipeline_mode<synchronous>, transform_indices = @transform_1, window_bounds = array<i64: 1, 128>}, {pipeline_mode = #tpu.pipeline_mode<synchronous>, transform_indices = @transform_2, window_bounds = array<i64: 1, 128>}, {pipeline_mode = #tpu.pipeline_mode<synchronous>, transform_indices = @transform_3, window_bounds = array<i64: 128, 128>}, {pipeline_mode = #tpu.pipeline_mode<synchronous>, transform_indices = @transform_4, window_bounds = array<i64: 16, 128>}]} {
    %c0 = arith.constant 0 : index
    %c0_0 = arith.constant 0 : index
    %0 = vector.load %arg1[%c0, %c0_0] : memref<16x128xf32, #tpu.memory_space<vmem>>, vector<16x128xf32>
    %cst = arith.constant dense<0.000000e+00> : vector<128xf32>
    %1 = vector.multi_reduction <add>, %0, %cst [0] : vector<16x128xf32> to vector<128xf32>
    %2 = vector.shape_cast %1 : vector<128xf32> to vector<1x128xf32>
    %3 = arith.mulf %0, %0 : vector<16x128xf32>
    %cst_1 = arith.constant dense<0.000000e+00> : vector<128xf32>
    %4 = vector.multi_reduction <add>, %3, %cst_1 [0] : vector<16x128xf32> to vector<128xf32>
    %5 = vector.shape_cast %4 : vector<128xf32> to vector<1x128xf32>
    %6 = tpu.concatenate %2, %5 in 0 : vector<1x128xf32>, vector<1x128xf32> -> vector<2x128xf32>
    %c0_2 = arith.constant 0 : index
    %c0_3 = arith.constant 0 : index
    %7 = vector.load %arg4[%c0_2, %c0_3] : memref<128x128xf32, #tpu.memory_space<vmem>>, vector<128x128xf32>
    %cst_4 = arith.constant dense<0.000000e+00> : vector<2x128xf32>
    %8 = tpu.matmul %6, %7, %cst_4 {dimension_numbers = #tpu.dot_dimension_numbers<[1], [0], [0], [1], [0, 0, 1, 1], [], []>} : vector<2x128xf32>, vector<128x128xf32>, vector<2x128xf32> -> vector<2x128xf32>
    %9 = vector.extract_strided_slice %8 {offsets = [0, 0], sizes = [1, 128], strides = [1, 1]} : vector<2x128xf32> to vector<1x128xf32>
    %cst_5 = arith.constant 3.125000e-02 : f32
    %10 = vector.broadcast %cst_5 : f32 to vector<1x128xf32>
    %11 = arith.mulf %9, %10 : vector<1x128xf32>
    %12 = vector.extract_strided_slice %8 {offsets = [1, 0], sizes = [1, 128], strides = [1, 1]} : vector<2x128xf32> to vector<1x128xf32>
    %cst_6 = arith.constant 3.125000e-02 : f32
    %13 = vector.broadcast %cst_6 : f32 to vector<1x128xf32>
    %14 = arith.mulf %12, %13 : vector<1x128xf32>
    %15 = arith.mulf %11, %11 : vector<1x128xf32>
    %16 = arith.subf %14, %15 : vector<1x128xf32>
    %c0_7 = arith.constant 0 : index
    %c0_8 = arith.constant 0 : index
    %17 = vector.load %arg2[%c0_7, %c0_8] : memref<1x128xf32, #tpu.memory_space<vmem>>, vector<1x128xf32>
    %cst_9 = arith.constant 9.99999974E-6 : f32
    %18 = vector.broadcast %cst_9 : f32 to vector<1x128xf32>
    %19 = arith.addf %16, %18 : vector<1x128xf32>
    %20 = math.rsqrt %19 : vector<1x128xf32>
    %21 = arith.mulf %17, %20 : vector<1x128xf32>
    %c0_10 = arith.constant 0 : index
    %c0_11 = arith.constant 0 : index
    %22 = vector.load %arg3[%c0_10, %c0_11] : memref<1x128xf32, #tpu.memory_space<vmem>>, vector<1x128xf32>
    %23 = arith.mulf %11, %21 : vector<1x128xf32>
    %24 = arith.subf %22, %23 : vector<1x128xf32>
    %25 = vector.broadcast %21 : vector<1x128xf32> to vector<16x128xf32>
    %26 = arith.mulf %0, %25 : vector<16x128xf32>
    %27 = vector.broadcast %24 : vector<1x128xf32> to vector<16x128xf32>
    %28 = arith.addf %26, %27 : vector<16x128xf32>
    %cst_12 = arith.constant 0.000000e+00 : f32
    %29 = vector.broadcast %cst_12 : f32 to vector<16x128xf32>
    %30 = arith.maximumf %28, %29 : vector<16x128xf32>
    %31 = arith.truncf %30 : vector<16x128xf32> to vector<16x128xbf16>
    %c0_13 = arith.constant 0 : index
    %c0_14 = arith.constant 0 : index
    %32 = vector.load %arg5[%c0_13, %c0_14] : memref<16x128xbf16, #tpu.memory_space<vmem>>, vector<16x128xbf16>
    tpu.vector_store %arg5[%c0_13, %c0_14], %31 {strides = array<i32>} : memref<16x128xbf16, #tpu.memory_space<vmem>>, vector<16x128xbf16>,
    return
  }
  func.func @transform_0(%arg0: i32) -> (i32, i32) {
    %c0_i32 = arith.constant 0 : i32
    %c0_i32_0 = arith.constant 0 : i32
    %c0_i32_1 = arith.constant 0 : i32
    return %c0_i32, %c0_i32_0 : i32, i32
  }
  func.func @transform_1(%arg0: i32) -> (i32, i32) {
    %c0_i32 = arith.constant 0 : i32
    %c0_i32_0 = arith.constant 0 : i32
    %c0_i32_1 = arith.constant 0 : i32
    return %c0_i32, %c0_i32_0 : i32, i32
  }
  func.func @transform_2(%arg0: i32) -> (i32, i32) {
    %c0_i32 = arith.constant 0 : i32
    %c0_i32_0 = arith.constant 0 : i32
    %c0_i32_1 = arith.constant 0 : i32
    return %c0_i32, %c0_i32_0 : i32, i32
  }
  func.func @transform_3(%arg0: i32) -> (i32, i32) {
    %c0_i32 = arith.constant 0 : i32
    %c0_i32_0 = arith.constant 0 : i32
    %c0_i32_1 = arith.constant 0 : i32
    return %c0_i32, %c0_i32_0 : i32, i32
  }
  func.func @transform_4(%arg0: i32) -> (i32, i32) {
    %c0_i32 = arith.constant 0 : i32
    %c0_i32_0 = arith.constant 0 : i32
    %c0_i32_1 = arith.constant 0 : i32
    return %c0_i32, %c0_i32_0 : i32, i32
  }
}

module attributes {stable_mosaic.version = 11 : i64} {
  func.func @_matmul_kernel(%arg0: i32, %arg1: memref<32x64xbf16, #tpu.memory_space<vmem>>, %arg2: memref<64x512xbf16, #tpu.memory_space<vmem>>, %arg3: memref<32x512xf32, #tpu.memory_space<vmem>>) attributes {dimension_semantics = [#tpu.dimension_semantics<parallel>], iteration_bounds = array<i64: 1>, scalar_prefetch = 0 : i64, scratch_operands = 0 : i64, tpu.core_type = #tpu.core_type<tc>, window_params = [{transform_indices = @transform_0, window_bounds = array<i64: 32, 64>}, {pipeline_mode = #tpu.pipeline_mode<synchronous>, transform_indices = @transform_1, window_bounds = array<i64: 64, 512>}, {transform_indices = @transform_2, window_bounds = array<i64: 32, 512>}]} {
    %c0 = arith.constant 0 : index
    %c0_0 = arith.constant 0 : index
    %0 = vector.load %arg1[%c0, %c0_0] : memref<32x64xbf16, #tpu.memory_space<vmem>>, vector<32x64xbf16>
    %c0_1 = arith.constant 0 : index
    %c0_2 = arith.constant 0 : index
    %1 = vector.load %arg2[%c0_1, %c0_2] : memref<64x512xbf16, #tpu.memory_space<vmem>>, vector<64x512xbf16>
    %cst = arith.constant dense<0.000000e+00> : vector<32x512xf32>
    %2 = tpu.matmul %0, %1, %cst {dimension_numbers = #tpu.dot_dimension_numbers<[1], [0], [0], [1], [0, 0, 1, 1], [], []>} : vector<32x64xbf16>, vector<64x512xbf16>, vector<32x512xf32> -> vector<32x512xf32>
    %c0_3 = arith.constant 0 : index
    %c0_4 = arith.constant 0 : index
    %3 = vector.load %arg3[%c0_3, %c0_4] : memref<32x512xf32, #tpu.memory_space<vmem>>, vector<32x512xf32>
    tpu.vector_store %arg3[%c0_3, %c0_4], %2 {strides = array<i32>} : memref<32x512xf32, #tpu.memory_space<vmem>>, vector<32x512xf32>,
    return
  }
  func.func @transform_0(%arg0: i32) -> (i32, i32) {
    %c0_i32 = arith.constant 0 : i32
    %c0_i32_0 = arith.constant 0 : i32
    return %arg0, %c0_i32 : i32, i32
  }
  func.func @transform_1(%arg0: i32) -> (i32, i32) {
    %c0_i32 = arith.constant 0 : i32
    %c0_i32_0 = arith.constant 0 : i32
    %c0_i32_1 = arith.constant 0 : i32
    return %c0_i32, %c0_i32_0 : i32, i32
  }
  func.func @transform_2(%arg0: i32) -> (i32, i32) {
    %c0_i32 = arith.constant 0 : i32
    %c0_i32_0 = arith.constant 0 : i32
    return %arg0, %c0_i32 : i32, i32
  }
}

module attributes {stable_mosaic.version = 11 : i64} {
  func.func @_bn_relu_kernel(%arg0: i32, %arg1: memref<32x128xf32, #tpu.memory_space<vmem>>, %arg2: memref<1x128xf32, #tpu.memory_space<vmem>>, %arg3: memref<1x128xf32, #tpu.memory_space<vmem>>, %arg4: memref<128x128xf32, #tpu.memory_space<vmem>>, %arg5: memref<32x128xbf16, #tpu.memory_space<vmem>>) attributes {dimension_semantics = [#tpu.dimension_semantics<arbitrary>], iteration_bounds = array<i64: 1>, scalar_prefetch = 0 : i64, scratch_operands = 0 : i64, tpu.core_type = #tpu.core_type<tc>, window_params = [{pipeline_mode = #tpu.pipeline_mode<synchronous>, transform_indices = @transform_0, window_bounds = array<i64: 32, 128>}, {pipeline_mode = #tpu.pipeline_mode<synchronous>, transform_indices = @transform_1, window_bounds = array<i64: 1, 128>}, {pipeline_mode = #tpu.pipeline_mode<synchronous>, transform_indices = @transform_2, window_bounds = array<i64: 1, 128>}, {pipeline_mode = #tpu.pipeline_mode<synchronous>, transform_indices = @transform_3, window_bounds = array<i64: 128, 128>}, {pipeline_mode = #tpu.pipeline_mode<synchronous>, transform_indices = @transform_4, window_bounds = array<i64: 32, 128>}]} {
    %c0 = arith.constant 0 : index
    %c0_0 = arith.constant 0 : index
    %0 = vector.load %arg1[%c0, %c0_0] : memref<32x128xf32, #tpu.memory_space<vmem>>, vector<32x128xf32>
    %cst = arith.constant dense<0.000000e+00> : vector<128xf32>
    %1 = vector.multi_reduction <add>, %0, %cst [0] : vector<32x128xf32> to vector<128xf32>
    %2 = vector.shape_cast %1 : vector<128xf32> to vector<1x128xf32>
    %3 = arith.mulf %0, %0 : vector<32x128xf32>
    %cst_1 = arith.constant dense<0.000000e+00> : vector<128xf32>
    %4 = vector.multi_reduction <add>, %3, %cst_1 [0] : vector<32x128xf32> to vector<128xf32>
    %5 = vector.shape_cast %4 : vector<128xf32> to vector<1x128xf32>
    %6 = tpu.concatenate %2, %5 in 0 : vector<1x128xf32>, vector<1x128xf32> -> vector<2x128xf32>
    %c0_2 = arith.constant 0 : index
    %c0_3 = arith.constant 0 : index
    %7 = vector.load %arg4[%c0_2, %c0_3] : memref<128x128xf32, #tpu.memory_space<vmem>>, vector<128x128xf32>
    %cst_4 = arith.constant dense<0.000000e+00> : vector<2x128xf32>
    %8 = tpu.matmul %6, %7, %cst_4 {dimension_numbers = #tpu.dot_dimension_numbers<[1], [0], [0], [1], [0, 0, 1, 1], [], []>} : vector<2x128xf32>, vector<128x128xf32>, vector<2x128xf32> -> vector<2x128xf32>
    %9 = vector.extract_strided_slice %8 {offsets = [0, 0], sizes = [1, 128], strides = [1, 1]} : vector<2x128xf32> to vector<1x128xf32>
    %cst_5 = arith.constant 7.812500e-03 : f32
    %10 = vector.broadcast %cst_5 : f32 to vector<1x128xf32>
    %11 = arith.mulf %9, %10 : vector<1x128xf32>
    %12 = vector.extract_strided_slice %8 {offsets = [1, 0], sizes = [1, 128], strides = [1, 1]} : vector<2x128xf32> to vector<1x128xf32>
    %cst_6 = arith.constant 7.812500e-03 : f32
    %13 = vector.broadcast %cst_6 : f32 to vector<1x128xf32>
    %14 = arith.mulf %12, %13 : vector<1x128xf32>
    %15 = arith.mulf %11, %11 : vector<1x128xf32>
    %16 = arith.subf %14, %15 : vector<1x128xf32>
    %c0_7 = arith.constant 0 : index
    %c0_8 = arith.constant 0 : index
    %17 = vector.load %arg2[%c0_7, %c0_8] : memref<1x128xf32, #tpu.memory_space<vmem>>, vector<1x128xf32>
    %cst_9 = arith.constant 9.99999974E-6 : f32
    %18 = vector.broadcast %cst_9 : f32 to vector<1x128xf32>
    %19 = arith.addf %16, %18 : vector<1x128xf32>
    %20 = math.rsqrt %19 : vector<1x128xf32>
    %21 = arith.mulf %17, %20 : vector<1x128xf32>
    %c0_10 = arith.constant 0 : index
    %c0_11 = arith.constant 0 : index
    %22 = vector.load %arg3[%c0_10, %c0_11] : memref<1x128xf32, #tpu.memory_space<vmem>>, vector<1x128xf32>
    %23 = arith.mulf %11, %21 : vector<1x128xf32>
    %24 = arith.subf %22, %23 : vector<1x128xf32>
    %25 = vector.broadcast %21 : vector<1x128xf32> to vector<32x128xf32>
    %26 = arith.mulf %0, %25 : vector<32x128xf32>
    %27 = vector.broadcast %24 : vector<1x128xf32> to vector<32x128xf32>
    %28 = arith.addf %26, %27 : vector<32x128xf32>
    %cst_12 = arith.constant 0.000000e+00 : f32
    %29 = vector.broadcast %cst_12 : f32 to vector<32x128xf32>
    %30 = arith.maximumf %28, %29 : vector<32x128xf32>
    %31 = arith.truncf %30 : vector<32x128xf32> to vector<32x128xbf16>
    %c0_13 = arith.constant 0 : index
    %c0_14 = arith.constant 0 : index
    %32 = vector.load %arg5[%c0_13, %c0_14] : memref<32x128xbf16, #tpu.memory_space<vmem>>, vector<32x128xbf16>
    tpu.vector_store %arg5[%c0_13, %c0_14], %31 {strides = array<i32>} : memref<32x128xbf16, #tpu.memory_space<vmem>>, vector<32x128xbf16>,
    return
  }
  func.func @transform_0(%arg0: i32) -> (i32, i32) {
    %c0_i32 = arith.constant 0 : i32
    %c0_i32_0 = arith.constant 0 : i32
    %c0_i32_1 = arith.constant 0 : i32
    return %c0_i32, %c0_i32_0 : i32, i32
  }
  func.func @transform_1(%arg0: i32) -> (i32, i32) {
    %c0_i32 = arith.constant 0 : i32
    %c0_i32_0 = arith.constant 0 : i32
    %c0_i32_1 = arith.constant 0 : i32
    return %c0_i32, %c0_i32_0 : i32, i32
  }
  func.func @transform_2(%arg0: i32) -> (i32, i32) {
    %c0_i32 = arith.constant 0 : i32
    %c0_i32_0 = arith.constant 0 : i32
    %c0_i32_1 = arith.constant 0 : i32
    return %c0_i32, %c0_i32_0 : i32, i32
  }
  func.func @transform_3(%arg0: i32) -> (i32, i32) {
    %c0_i32 = arith.constant 0 : i32
    %c0_i32_0 = arith.constant 0 : i32
    %c0_i32_1 = arith.constant 0 : i32
    return %c0_i32, %c0_i32_0 : i32, i32
  }
  func.func @transform_4(%arg0: i32) -> (i32, i32) {
    %c0_i32 = arith.constant 0 : i32
    %c0_i32_0 = arith.constant 0 : i32
    %c0_i32_1 = arith.constant 0 : i32
    return %c0_i32, %c0_i32_0 : i32, i32
  }
}

module attributes {stable_mosaic.version = 11 : i64} {
  func.func @_matmul_kernel(%arg0: i32, %arg1: memref<128x32xbf16, #tpu.memory_space<vmem>>, %arg2: memref<32x256xbf16, #tpu.memory_space<vmem>>, %arg3: memref<128x256xf32, #tpu.memory_space<vmem>>) attributes {dimension_semantics = [#tpu.dimension_semantics<parallel>], iteration_bounds = array<i64: 1>, scalar_prefetch = 0 : i64, scratch_operands = 0 : i64, tpu.core_type = #tpu.core_type<tc>, window_params = [{transform_indices = @transform_0, window_bounds = array<i64: 128, 32>}, {pipeline_mode = #tpu.pipeline_mode<synchronous>, transform_indices = @transform_1, window_bounds = array<i64: 32, 256>}, {transform_indices = @transform_2, window_bounds = array<i64: 128, 256>}]} {
    %c0 = arith.constant 0 : index
    %c0_0 = arith.constant 0 : index
    %0 = vector.load %arg1[%c0, %c0_0] : memref<128x32xbf16, #tpu.memory_space<vmem>>, vector<128x32xbf16>
    %c0_1 = arith.constant 0 : index
    %c0_2 = arith.constant 0 : index
    %1 = vector.load %arg2[%c0_1, %c0_2] : memref<32x256xbf16, #tpu.memory_space<vmem>>, vector<32x256xbf16>
    %cst = arith.constant dense<0.000000e+00> : vector<128x256xf32>
    %2 = tpu.matmul %0, %1, %cst {dimension_numbers = #tpu.dot_dimension_numbers<[1], [0], [0], [1], [0, 0, 1, 1], [], []>} : vector<128x32xbf16>, vector<32x256xbf16>, vector<128x256xf32> -> vector<128x256xf32>
    %c0_3 = arith.constant 0 : index
    %c0_4 = arith.constant 0 : index
    %3 = vector.load %arg3[%c0_3, %c0_4] : memref<128x256xf32, #tpu.memory_space<vmem>>, vector<128x256xf32>
    tpu.vector_store %arg3[%c0_3, %c0_4], %2 {strides = array<i32>} : memref<128x256xf32, #tpu.memory_space<vmem>>, vector<128x256xf32>,
    return
  }
  func.func @transform_0(%arg0: i32) -> (i32, i32) {
    %c0_i32 = arith.constant 0 : i32
    %c0_i32_0 = arith.constant 0 : i32
    return %arg0, %c0_i32 : i32, i32
  }
  func.func @transform_1(%arg0: i32) -> (i32, i32) {
    %c0_i32 = arith.constant 0 : i32
    %c0_i32_0 = arith.constant 0 : i32
    %c0_i32_1 = arith.constant 0 : i32
    return %c0_i32, %c0_i32_0 : i32, i32
  }
  func.func @transform_2(%arg0: i32) -> (i32, i32) {
    %c0_i32 = arith.constant 0 : i32
    %c0_i32_0 = arith.constant 0 : i32
    return %arg0, %c0_i32 : i32, i32
  }
}

module attributes {stable_mosaic.version = 11 : i64} {
  func.func @_bn_relu_kernel(%arg0: i32, %arg1: memref<64x128xf32, #tpu.memory_space<vmem>>, %arg2: memref<1x128xf32, #tpu.memory_space<vmem>>, %arg3: memref<1x128xf32, #tpu.memory_space<vmem>>, %arg4: memref<128x128xf32, #tpu.memory_space<vmem>>, %arg5: memref<64x128xbf16, #tpu.memory_space<vmem>>) attributes {dimension_semantics = [#tpu.dimension_semantics<arbitrary>], iteration_bounds = array<i64: 1>, scalar_prefetch = 0 : i64, scratch_operands = 0 : i64, tpu.core_type = #tpu.core_type<tc>, window_params = [{pipeline_mode = #tpu.pipeline_mode<synchronous>, transform_indices = @transform_0, window_bounds = array<i64: 64, 128>}, {pipeline_mode = #tpu.pipeline_mode<synchronous>, transform_indices = @transform_1, window_bounds = array<i64: 1, 128>}, {pipeline_mode = #tpu.pipeline_mode<synchronous>, transform_indices = @transform_2, window_bounds = array<i64: 1, 128>}, {pipeline_mode = #tpu.pipeline_mode<synchronous>, transform_indices = @transform_3, window_bounds = array<i64: 128, 128>}, {pipeline_mode = #tpu.pipeline_mode<synchronous>, transform_indices = @transform_4, window_bounds = array<i64: 64, 128>}]} {
    %c0 = arith.constant 0 : index
    %c0_0 = arith.constant 0 : index
    %0 = vector.load %arg1[%c0, %c0_0] : memref<64x128xf32, #tpu.memory_space<vmem>>, vector<64x128xf32>
    %cst = arith.constant dense<0.000000e+00> : vector<128xf32>
    %1 = vector.multi_reduction <add>, %0, %cst [0] : vector<64x128xf32> to vector<128xf32>
    %2 = vector.shape_cast %1 : vector<128xf32> to vector<1x128xf32>
    %3 = arith.mulf %0, %0 : vector<64x128xf32>
    %cst_1 = arith.constant dense<0.000000e+00> : vector<128xf32>
    %4 = vector.multi_reduction <add>, %3, %cst_1 [0] : vector<64x128xf32> to vector<128xf32>
    %5 = vector.shape_cast %4 : vector<128xf32> to vector<1x128xf32>
    %6 = tpu.concatenate %2, %5 in 0 : vector<1x128xf32>, vector<1x128xf32> -> vector<2x128xf32>
    %c0_2 = arith.constant 0 : index
    %c0_3 = arith.constant 0 : index
    %7 = vector.load %arg4[%c0_2, %c0_3] : memref<128x128xf32, #tpu.memory_space<vmem>>, vector<128x128xf32>
    %cst_4 = arith.constant dense<0.000000e+00> : vector<2x128xf32>
    %8 = tpu.matmul %6, %7, %cst_4 {dimension_numbers = #tpu.dot_dimension_numbers<[1], [0], [0], [1], [0, 0, 1, 1], [], []>} : vector<2x128xf32>, vector<128x128xf32>, vector<2x128xf32> -> vector<2x128xf32>
    %9 = vector.extract_strided_slice %8 {offsets = [0, 0], sizes = [1, 128], strides = [1, 1]} : vector<2x128xf32> to vector<1x128xf32>
    %cst_5 = arith.constant 0.001953125 : f32
    %10 = vector.broadcast %cst_5 : f32 to vector<1x128xf32>
    %11 = arith.mulf %9, %10 : vector<1x128xf32>
    %12 = vector.extract_strided_slice %8 {offsets = [1, 0], sizes = [1, 128], strides = [1, 1]} : vector<2x128xf32> to vector<1x128xf32>
    %cst_6 = arith.constant 0.001953125 : f32
    %13 = vector.broadcast %cst_6 : f32 to vector<1x128xf32>
    %14 = arith.mulf %12, %13 : vector<1x128xf32>
    %15 = arith.mulf %11, %11 : vector<1x128xf32>
    %16 = arith.subf %14, %15 : vector<1x128xf32>
    %c0_7 = arith.constant 0 : index
    %c0_8 = arith.constant 0 : index
    %17 = vector.load %arg2[%c0_7, %c0_8] : memref<1x128xf32, #tpu.memory_space<vmem>>, vector<1x128xf32>
    %cst_9 = arith.constant 9.99999974E-6 : f32
    %18 = vector.broadcast %cst_9 : f32 to vector<1x128xf32>
    %19 = arith.addf %16, %18 : vector<1x128xf32>
    %20 = math.rsqrt %19 : vector<1x128xf32>
    %21 = arith.mulf %17, %20 : vector<1x128xf32>
    %c0_10 = arith.constant 0 : index
    %c0_11 = arith.constant 0 : index
    %22 = vector.load %arg3[%c0_10, %c0_11] : memref<1x128xf32, #tpu.memory_space<vmem>>, vector<1x128xf32>
    %23 = arith.mulf %11, %21 : vector<1x128xf32>
    %24 = arith.subf %22, %23 : vector<1x128xf32>
    %25 = vector.broadcast %21 : vector<1x128xf32> to vector<64x128xf32>
    %26 = arith.mulf %0, %25 : vector<64x128xf32>
    %27 = vector.broadcast %24 : vector<1x128xf32> to vector<64x128xf32>
    %28 = arith.addf %26, %27 : vector<64x128xf32>
    %cst_12 = arith.constant 0.000000e+00 : f32
    %29 = vector.broadcast %cst_12 : f32 to vector<64x128xf32>
    %30 = arith.maximumf %28, %29 : vector<64x128xf32>
    %31 = arith.truncf %30 : vector<64x128xf32> to vector<64x128xbf16>
    %c0_13 = arith.constant 0 : index
    %c0_14 = arith.constant 0 : index
    %32 = vector.load %arg5[%c0_13, %c0_14] : memref<64x128xbf16, #tpu.memory_space<vmem>>, vector<64x128xbf16>
    tpu.vector_store %arg5[%c0_13, %c0_14], %31 {strides = array<i32>} : memref<64x128xbf16, #tpu.memory_space<vmem>>, vector<64x128xbf16>,
    return
  }
  func.func @transform_0(%arg0: i32) -> (i32, i32) {
    %c0_i32 = arith.constant 0 : i32
    %c0_i32_0 = arith.constant 0 : i32
    %c0_i32_1 = arith.constant 0 : i32
    return %c0_i32, %c0_i32_0 : i32, i32
  }
  func.func @transform_1(%arg0: i32) -> (i32, i32) {
    %c0_i32 = arith.constant 0 : i32
    %c0_i32_0 = arith.constant 0 : i32
    %c0_i32_1 = arith.constant 0 : i32
    return %c0_i32, %c0_i32_0 : i32, i32
  }
  func.func @transform_2(%arg0: i32) -> (i32, i32) {
    %c0_i32 = arith.constant 0 : i32
    %c0_i32_0 = arith.constant 0 : i32
    %c0_i32_1 = arith.constant 0 : i32
    return %c0_i32, %c0_i32_0 : i32, i32
  }
  func.func @transform_3(%arg0: i32) -> (i32, i32) {
    %c0_i32 = arith.constant 0 : i32
    %c0_i32_0 = arith.constant 0 : i32
    %c0_i32_1 = arith.constant 0 : i32
    return %c0_i32, %c0_i32_0 : i32, i32
  }
  func.func @transform_4(%arg0: i32) -> (i32, i32) {
    %c0_i32 = arith.constant 0 : i32
    %c0_i32_0 = arith.constant 0 : i32
    %c0_i32_1 = arith.constant 0 : i32
    return %c0_i32, %c0_i32_0 : i32, i32
  }
}

module attributes {stable_mosaic.version = 11 : i64} {
  func.func @_matmul_kernel(%arg0: i32, %arg1: memref<512x16xbf16, #tpu.memory_space<vmem>>, %arg2: memref<16x128xbf16, #tpu.memory_space<vmem>>, %arg3: memref<512x128xf32, #tpu.memory_space<vmem>>) attributes {dimension_semantics = [#tpu.dimension_semantics<parallel>], iteration_bounds = array<i64: 1>, scalar_prefetch = 0 : i64, scratch_operands = 0 : i64, tpu.core_type = #tpu.core_type<tc>, window_params = [{transform_indices = @transform_0, window_bounds = array<i64: 512, 16>}, {pipeline_mode = #tpu.pipeline_mode<synchronous>, transform_indices = @transform_1, window_bounds = array<i64: 16, 128>}, {transform_indices = @transform_2, window_bounds = array<i64: 512, 128>}]} {
    %c0 = arith.constant 0 : index
    %c0_0 = arith.constant 0 : index
    %0 = vector.load %arg1[%c0, %c0_0] : memref<512x16xbf16, #tpu.memory_space<vmem>>, vector<512x16xbf16>
    %c0_1 = arith.constant 0 : index
    %c0_2 = arith.constant 0 : index
    %1 = vector.load %arg2[%c0_1, %c0_2] : memref<16x128xbf16, #tpu.memory_space<vmem>>, vector<16x128xbf16>
    %cst = arith.constant dense<0.000000e+00> : vector<512x128xf32>
    %2 = tpu.matmul %0, %1, %cst {dimension_numbers = #tpu.dot_dimension_numbers<[1], [0], [0], [1], [0, 0, 1, 1], [], []>} : vector<512x16xbf16>, vector<16x128xbf16>, vector<512x128xf32> -> vector<512x128xf32>
    %c0_3 = arith.constant 0 : index
    %c0_4 = arith.constant 0 : index
    %3 = vector.load %arg3[%c0_3, %c0_4] : memref<512x128xf32, #tpu.memory_space<vmem>>, vector<512x128xf32>
    tpu.vector_store %arg3[%c0_3, %c0_4], %2 {strides = array<i32>} : memref<512x128xf32, #tpu.memory_space<vmem>>, vector<512x128xf32>,
    return
  }
  func.func @transform_0(%arg0: i32) -> (i32, i32) {
    %c0_i32 = arith.constant 0 : i32
    %c0_i32_0 = arith.constant 0 : i32
    return %arg0, %c0_i32 : i32, i32
  }
  func.func @transform_1(%arg0: i32) -> (i32, i32) {
    %c0_i32 = arith.constant 0 : i32
    %c0_i32_0 = arith.constant 0 : i32
    %c0_i32_1 = arith.constant 0 : i32
    return %c0_i32, %c0_i32_0 : i32, i32
  }
  func.func @transform_2(%arg0: i32) -> (i32, i32) {
    %c0_i32 = arith.constant 0 : i32
    %c0_i32_0 = arith.constant 0 : i32
    return %arg0, %c0_i32 : i32, i32
  }
}

module attributes {stable_mosaic.version = 11 : i64} {
  func.func @_bn_relu_kernel(%arg0: i32, %arg1: memref<128x128xf32, #tpu.memory_space<vmem>>, %arg2: memref<1x128xf32, #tpu.memory_space<vmem>>, %arg3: memref<1x128xf32, #tpu.memory_space<vmem>>, %arg4: memref<128x128xf32, #tpu.memory_space<vmem>>, %arg5: memref<128x128xbf16, #tpu.memory_space<vmem>>) attributes {dimension_semantics = [#tpu.dimension_semantics<arbitrary>], iteration_bounds = array<i64: 1>, scalar_prefetch = 0 : i64, scratch_operands = 0 : i64, tpu.core_type = #tpu.core_type<tc>, window_params = [{pipeline_mode = #tpu.pipeline_mode<synchronous>, transform_indices = @transform_0, window_bounds = array<i64: 128, 128>}, {pipeline_mode = #tpu.pipeline_mode<synchronous>, transform_indices = @transform_1, window_bounds = array<i64: 1, 128>}, {pipeline_mode = #tpu.pipeline_mode<synchronous>, transform_indices = @transform_2, window_bounds = array<i64: 1, 128>}, {pipeline_mode = #tpu.pipeline_mode<synchronous>, transform_indices = @transform_3, window_bounds = array<i64: 128, 128>}, {pipeline_mode = #tpu.pipeline_mode<synchronous>, transform_indices = @transform_4, window_bounds = array<i64: 128, 128>}]} {
    %c0 = arith.constant 0 : index
    %c0_0 = arith.constant 0 : index
    %0 = vector.load %arg1[%c0, %c0_0] : memref<128x128xf32, #tpu.memory_space<vmem>>, vector<128x128xf32>
    %cst = arith.constant dense<0.000000e+00> : vector<128xf32>
    %1 = vector.multi_reduction <add>, %0, %cst [0] : vector<128x128xf32> to vector<128xf32>
    %2 = vector.shape_cast %1 : vector<128xf32> to vector<1x128xf32>
    %3 = arith.mulf %0, %0 : vector<128x128xf32>
    %cst_1 = arith.constant dense<0.000000e+00> : vector<128xf32>
    %4 = vector.multi_reduction <add>, %3, %cst_1 [0] : vector<128x128xf32> to vector<128xf32>
    %5 = vector.shape_cast %4 : vector<128xf32> to vector<1x128xf32>
    %6 = tpu.concatenate %2, %5 in 0 : vector<1x128xf32>, vector<1x128xf32> -> vector<2x128xf32>
    %c0_2 = arith.constant 0 : index
    %c0_3 = arith.constant 0 : index
    %7 = vector.load %arg4[%c0_2, %c0_3] : memref<128x128xf32, #tpu.memory_space<vmem>>, vector<128x128xf32>
    %cst_4 = arith.constant dense<0.000000e+00> : vector<2x128xf32>
    %8 = tpu.matmul %6, %7, %cst_4 {dimension_numbers = #tpu.dot_dimension_numbers<[1], [0], [0], [1], [0, 0, 1, 1], [], []>} : vector<2x128xf32>, vector<128x128xf32>, vector<2x128xf32> -> vector<2x128xf32>
    %9 = vector.extract_strided_slice %8 {offsets = [0, 0], sizes = [1, 128], strides = [1, 1]} : vector<2x128xf32> to vector<1x128xf32>
    %cst_5 = arith.constant 4.8828125E-4 : f32
    %10 = vector.broadcast %cst_5 : f32 to vector<1x128xf32>
    %11 = arith.mulf %9, %10 : vector<1x128xf32>
    %12 = vector.extract_strided_slice %8 {offsets = [1, 0], sizes = [1, 128], strides = [1, 1]} : vector<2x128xf32> to vector<1x128xf32>
    %cst_6 = arith.constant 4.8828125E-4 : f32
    %13 = vector.broadcast %cst_6 : f32 to vector<1x128xf32>
    %14 = arith.mulf %12, %13 : vector<1x128xf32>
    %15 = arith.mulf %11, %11 : vector<1x128xf32>
    %16 = arith.subf %14, %15 : vector<1x128xf32>
    %c0_7 = arith.constant 0 : index
    %c0_8 = arith.constant 0 : index
    %17 = vector.load %arg2[%c0_7, %c0_8] : memref<1x128xf32, #tpu.memory_space<vmem>>, vector<1x128xf32>
    %cst_9 = arith.constant 9.99999974E-6 : f32
    %18 = vector.broadcast %cst_9 : f32 to vector<1x128xf32>
    %19 = arith.addf %16, %18 : vector<1x128xf32>
    %20 = math.rsqrt %19 : vector<1x128xf32>
    %21 = arith.mulf %17, %20 : vector<1x128xf32>
    %c0_10 = arith.constant 0 : index
    %c0_11 = arith.constant 0 : index
    %22 = vector.load %arg3[%c0_10, %c0_11] : memref<1x128xf32, #tpu.memory_space<vmem>>, vector<1x128xf32>
    %23 = arith.mulf %11, %21 : vector<1x128xf32>
    %24 = arith.subf %22, %23 : vector<1x128xf32>
    %25 = vector.broadcast %21 : vector<1x128xf32> to vector<128x128xf32>
    %26 = arith.mulf %0, %25 : vector<128x128xf32>
    %27 = vector.broadcast %24 : vector<1x128xf32> to vector<128x128xf32>
    %28 = arith.addf %26, %27 : vector<128x128xf32>
    %cst_12 = arith.constant 0.000000e+00 : f32
    %29 = vector.broadcast %cst_12 : f32 to vector<128x128xf32>
    %30 = arith.maximumf %28, %29 : vector<128x128xf32>
    %31 = arith.truncf %30 : vector<128x128xf32> to vector<128x128xbf16>
    %c0_13 = arith.constant 0 : index
    %c0_14 = arith.constant 0 : index
    %32 = vector.load %arg5[%c0_13, %c0_14] : memref<128x128xbf16, #tpu.memory_space<vmem>>, vector<128x128xbf16>
    tpu.vector_store %arg5[%c0_13, %c0_14], %31 {strides = array<i32>} : memref<128x128xbf16, #tpu.memory_space<vmem>>, vector<128x128xbf16>,
    return
  }
  func.func @transform_0(%arg0: i32) -> (i32, i32) {
    %c0_i32 = arith.constant 0 : i32
    %c0_i32_0 = arith.constant 0 : i32
    %c0_i32_1 = arith.constant 0 : i32
    return %c0_i32, %c0_i32_0 : i32, i32
  }
  func.func @transform_1(%arg0: i32) -> (i32, i32) {
    %c0_i32 = arith.constant 0 : i32
    %c0_i32_0 = arith.constant 0 : i32
    %c0_i32_1 = arith.constant 0 : i32
    return %c0_i32, %c0_i32_0 : i32, i32
  }
  func.func @transform_2(%arg0: i32) -> (i32, i32) {
    %c0_i32 = arith.constant 0 : i32
    %c0_i32_0 = arith.constant 0 : i32
    %c0_i32_1 = arith.constant 0 : i32
    return %c0_i32, %c0_i32_0 : i32, i32
  }
  func.func @transform_3(%arg0: i32) -> (i32, i32) {
    %c0_i32 = arith.constant 0 : i32
    %c0_i32_0 = arith.constant 0 : i32
    %c0_i32_1 = arith.constant 0 : i32
    return %c0_i32, %c0_i32_0 : i32, i32
  }
  func.func @transform_4(%arg0: i32) -> (i32, i32) {
    %c0_i32 = arith.constant 0 : i32
    %c0_i32_0 = arith.constant 0 : i32
    %c0_i32_1 = arith.constant 0 : i32
    return %c0_i32, %c0_i32_0 : i32, i32
  }
}

module attributes {stable_mosaic.version = 11 : i64} {
  func.func @_matmul_kernel(%arg0: i32, %arg1: memref<1024x8xbf16, #tpu.memory_space<vmem>>, %arg2: memref<8x16xbf16, #tpu.memory_space<vmem>>, %arg3: memref<1024x16xf32, #tpu.memory_space<vmem>>) attributes {dimension_semantics = [#tpu.dimension_semantics<parallel>], iteration_bounds = array<i64: 2>, scalar_prefetch = 0 : i64, scratch_operands = 0 : i64, tpu.core_type = #tpu.core_type<tc>, window_params = [{transform_indices = @transform_0, window_bounds = array<i64: 1024, 8>}, {pipeline_mode = #tpu.pipeline_mode<synchronous>, transform_indices = @transform_1, window_bounds = array<i64: 8, 16>}, {transform_indices = @transform_2, window_bounds = array<i64: 1024, 16>}]} {
    %c0 = arith.constant 0 : index
    %c0_0 = arith.constant 0 : index
    %0 = vector.load %arg1[%c0, %c0_0] : memref<1024x8xbf16, #tpu.memory_space<vmem>>, vector<1024x8xbf16>
    %c0_1 = arith.constant 0 : index
    %c0_2 = arith.constant 0 : index
    %1 = vector.load %arg2[%c0_1, %c0_2] : memref<8x16xbf16, #tpu.memory_space<vmem>>, vector<8x16xbf16>
    %cst = arith.constant dense<0.000000e+00> : vector<1024x16xf32>
    %2 = tpu.matmul %0, %1, %cst {dimension_numbers = #tpu.dot_dimension_numbers<[1], [0], [0], [1], [0, 0, 1, 1], [], []>} : vector<1024x8xbf16>, vector<8x16xbf16>, vector<1024x16xf32> -> vector<1024x16xf32>
    %c0_3 = arith.constant 0 : index
    %c0_4 = arith.constant 0 : index
    %3 = vector.load %arg3[%c0_3, %c0_4] : memref<1024x16xf32, #tpu.memory_space<vmem>>, vector<1024x16xf32>
    tpu.vector_store %arg3[%c0_3, %c0_4], %2 {strides = array<i32>} : memref<1024x16xf32, #tpu.memory_space<vmem>>, vector<1024x16xf32>,
    return
  }
  func.func @transform_0(%arg0: i32) -> (i32, i32) {
    %c0_i32 = arith.constant 0 : i32
    %c0_i32_0 = arith.constant 0 : i32
    return %arg0, %c0_i32 : i32, i32
  }
  func.func @transform_1(%arg0: i32) -> (i32, i32) {
    %c0_i32 = arith.constant 0 : i32
    %c0_i32_0 = arith.constant 0 : i32
    %c0_i32_1 = arith.constant 0 : i32
    return %c0_i32, %c0_i32_0 : i32, i32
  }
  func.func @transform_2(%arg0: i32) -> (i32, i32) {
    %c0_i32 = arith.constant 0 : i32
    %c0_i32_0 = arith.constant 0 : i32
    return %arg0, %c0_i32 : i32, i32
  }
}

module attributes {stable_mosaic.version = 11 : i64} {
  func.func @_tanh_kernel(%arg0: i32, %arg1: memref<64x128xf32, #tpu.memory_space<vmem>>, %arg2: memref<64x128xf32, #tpu.memory_space<vmem>>) attributes {dimension_semantics = [#tpu.dimension_semantics<arbitrary>], iteration_bounds = array<i64: 1>, scalar_prefetch = 0 : i64, scratch_operands = 0 : i64, tpu.core_type = #tpu.core_type<tc>, window_params = [{pipeline_mode = #tpu.pipeline_mode<synchronous>, transform_indices = @transform_0, window_bounds = array<i64: 64, 128>}, {pipeline_mode = #tpu.pipeline_mode<synchronous>, transform_indices = @transform_1, window_bounds = array<i64: 64, 128>}]} {
    %c0 = arith.constant 0 : index
    %c0_0 = arith.constant 0 : index
    %0 = vector.load %arg1[%c0, %c0_0] : memref<64x128xf32, #tpu.memory_space<vmem>>, vector<64x128xf32>
    %1 = math.tanh %0 : vector<64x128xf32>
    %c0_1 = arith.constant 0 : index
    %c0_2 = arith.constant 0 : index
    %2 = vector.load %arg2[%c0_1, %c0_2] : memref<64x128xf32, #tpu.memory_space<vmem>>, vector<64x128xf32>
    tpu.vector_store %arg2[%c0_1, %c0_2], %1 {strides = array<i32>} : memref<64x128xf32, #tpu.memory_space<vmem>>, vector<64x128xf32>,
    return
  }
  func.func @transform_0(%arg0: i32) -> (i32, i32) {
    %c0_i32 = arith.constant 0 : i32
    %c0_i32_0 = arith.constant 0 : i32
    %c0_i32_1 = arith.constant 0 : i32
    return %c0_i32, %c0_i32_0 : i32, i32
  }
  func.func @transform_1(%arg0: i32) -> (i32, i32) {
    %c0_i32 = arith.constant 0 : i32
    %c0_i32_0 = arith.constant 0 : i32
    %c0_i32_1 = arith.constant 0 : i32
    return %c0_i32, %c0_i32_0 : i32, i32
  }
}

</mosaic_0001>

<bundles_post_ra>
// kernel: _lambda_.12
= control target key start
LH: loop header
LB: loop body
LE: loop exit
PB: predicated region body
PF: predicated region fallthrough
CT: control target
= control target key end

     0   :  { %v304_v1 = vmov 0   ;;  %vm122_vm0 = vcmask 523264   ;;  %s422_s1 = inlined_call_operand.vmem [shape: bf16[64,512], index: 1, kind: input, shape index: {}]   ;;  %s423_s0 = inlined_call_operand.vmem [shape: bf16[32,64], index: 0, kind: input, shape index: {}]   ;;  %s424_s2 = inlined_call_operand.vmem [shape: f32[32,512], index: 2, kind: output, shape index: {}]  }
   0x1   :  { %v278_v0 = vld [vmem:[%s422_s1 + $0x4] ss:$16 sps:$4 sm:$0xff]   ;;  %161 = vmatprep.mubr.bf16.mxu0 %v304_v1  ;;  %214 = vmatprep.mubr.bf16.mxu1 %v304_v1  ;;  %v280_v2 = vld [vmem:[%s422_s1 + $0xc] ss:$16 sps:$4 sm:$0xff]   ;;  %v282_v3 = vld [vmem:[%s422_s1] ss:$16 sps:$4 sm:$0xff]  }
   0x2   :  { %129 = vmatprep.subr.bf16.mxu0 %v278_v0  ;;  %v283_v4 = vld [vmem:[%s422_s1 + $0x8] ss:$16 sps:$4 sm:$0xff]   ;;  %182 = vmatprep.subr.bf16.mxu1 %v280_v2  ;;  %v284_v5 = vld [vmem:[%s422_s1 + $0x24] ss:$16 sps:$4 sm:$0xff]   ;;  %v286_v6 = vld [vmem:[%s422_s1 + $0x2c] ss:$16 sps:$4 sm:$0xff]  }
   0x3   :  { %130 = vmatpush1.bf16.msra.mxu0 %v282_v3  ;;  %183 = vmatpush1.bf16.msra.mxu1 %v283_v4  ;;  %v288_v7 = vld [vmem:[%s422_s1 + $0x20] ss:$16 sps:$4 sm:$0xff]   ;;  %v289_v8 = vld [vmem:[%s422_s1 + $0x28] ss:$16 sps:$4 sm:$0xff]   ;;  %v290_v9 = vld [vmem:[%s422_s1 + $0x44] ss:$16 sps:$4 sm:$0xff]  }
   0x4   :  { %131 = vmatprep.subr.bf16.mxu0 %v284_v5  ;;  %184 = vmatprep.subr.bf16.mxu1 %v286_v6  ;;  %v292_v10 = vld [vmem:[%s422_s1 + $0x4c] ss:$16 sps:$4 sm:$0xff]   ;;  %v294_v11 = vld [vmem:[%s422_s1 + $0x40] ss:$16 sps:$4 sm:$0xff]   ;;  %v295_v12 = vld [vmem:[%s422_s1 + $0x48] ss:$16 sps:$4 sm:$0xff]  }
   0x5   :  { %v296_v13 = vld [vmem:[%s422_s1 + $0x64] ss:$16 sps:$4 sm:$0xff]   ;;  %v298_v14 = vld [vmem:[%s422_s1 + $0x6c] ss:$16 sps:$4 sm:$0xff]   ;;  %v300_v15 = vld [vmem:[%s422_s1 + $0x60] ss:$16 sps:$4 sm:$0xff]  }
   0x6   :  { %v301_v16 = vld [vmem:[%s422_s1 + $0x68] ss:$16 sps:$4 sm:$0xff]   ;;  %v302_v17 = vld [vmem:[%s423_s0] sm:$0xff]  }
   0x7   :  { %132 = vmatpush1.bf16.msra.mxu0 %v288_v7  ;;  %185 = vmatpush1.bf16.msra.mxu1 %v289_v8  ;;  %v303_v18 = vld [vmem:[%s423_s0 + $0x8] sm:$0xff]  }
   0x8   :  { %133 = vmatprep.subr.bf16.mxu0 %v290_v9  ;;  %186 = vmatprep.subr.bf16.mxu1 %v292_v10 }
   0xb   :  { %134 = vmatpush1.bf16.msra.mxu0 %v294_v11  ;;  %187 = vmatpush1.bf16.msra.mxu1 %v295_v12 }
   0xc   :  { %135 = vmatprep.subr.bf16.mxu0 %v296_v13  ;;  %188 = vmatprep.subr.bf16.mxu1 %v298_v14 }
   0xf   :  { %136 = vmatpush1.bf16.msra.mxu0 %v300_v15  ;;  %189 = vmatpush1.bf16.msra.mxu1 %v301_v16 }
  0x12   :  { %273 = vmatmul.mubr.msk.bf16.vlgmr.msra.gmra.mrb[0].mxu0 %vm122_vm0, %v302_v17  ;;  %275 = vmatmul.mubr.msk.bf16.vlgmr.msra.gmra.mrb[0].mxu1 %vm122_vm0, %v302_v17 }
  0x13   :  { %171 = vmatprep.mubr.bf16.mxu0 %v304_v1  ;;  %224 = vmatprep.mubr.bf16.mxu1 %v304_v1 }
  0x1a   :  { %274 = vmatmul.mubr.msk.bf16.gmra.mrb[4].mxu0 %vm122_vm0, %v303_v18  ;;  %276 = vmatmul.mubr.msk.bf16.gmra.mrb[4].mxu1 %vm122_vm0, %v303_v18 }
  0xe5   :  { %v163_v19 = vpop.f32.mrb[0].mxu0  ;;  %v216_v20 = vpop.f32.mrb[0].mxu1 }
  0xe6   :  { %235 = vst [vmem:[%s424_s2] sm:$0xff] %v163_v19  ;;  %237 = vst [vmem:[%s424_s2 + $0x10] sm:$0xff] %v216_v20  ;;  %v165_v21 = vpop.f32.mrb[1].mxu0  ;;  %v218_v22 = vpop.f32.mrb[1].mxu1 }
  0xe7   :  { %236 = vst [vmem:[%s424_s2 + $0x8] sm:$0xff] %v165_v21  ;;  %238 = vst [vmem:[%s424_s2 + $0x18] sm:$0xff] %v218_v22  ;;  %v167_v23 = vpop.f32.mrb[2].mxu0  ;;  %v220_v24 = vpop.f32.mrb[2].mxu1 }
  0xe8   :  { %239 = vst [vmem:[%s424_s2 + $0x20] sm:$0xff] %v167_v23  ;;  %241 = vst [vmem:[%s424_s2 + $0x30] sm:$0xff] %v220_v24  ;;  %v169_v25 = vpop.f32.mrb[3].mxu0  ;;  %v222_v26 = vpop.f32.mrb[3].mxu1 }
  0xe9   :  { %240 = vst [vmem:[%s424_s2 + $0x28] sm:$0xff] %v169_v25  ;;  %242 = vst [vmem:[%s424_s2 + $0x38] sm:$0xff] %v222_v26 }
  0xed   :  { %v173_v27 = vpop.f32.mrb[4].mxu0  ;;  %v226_v28 = vpop.f32.mrb[4].mxu1 }
  0xee   :  { %243 = vst [vmem:[%s424_s2 + $0x40] sm:$0xff] %v173_v27  ;;  %245 = vst [vmem:[%s424_s2 + $0x50] sm:$0xff] %v226_v28  ;;  %v175_v29 = vpop.f32.mrb[5].mxu0  ;;  %v228_v30 = vpop.f32.mrb[5].mxu1 }
  0xef   :  { %244 = vst [vmem:[%s424_s2 + $0x48] sm:$0xff] %v175_v29  ;;  %246 = vst [vmem:[%s424_s2 + $0x58] sm:$0xff] %v228_v30  ;;  %v177_v31 = vpop.f32.mrb[6].mxu0  ;;  %v230_v32 = vpop.f32.mrb[6].mxu1 }
  0xf0   :  { %247 = vst [vmem:[%s424_s2 + $0x60] sm:$0xff] %v177_v31  ;;  %249 = vst [vmem:[%s424_s2 + $0x70] sm:$0xff] %v230_v32  ;;  %v179_v33 = vpop.f32.mrb[7].mxu0  ;;  %v232_v34 = vpop.f32.mrb[7].mxu1 }
  0xf1   :  { %248 = vst [vmem:[%s424_s2 + $0x68] sm:$0xff] %v179_v33  ;;  %250 = vst [vmem:[%s424_s2 + $0x78] sm:$0xff] %v232_v34 }

// kernel: _lambda_.11
= control target key start
LH: loop header
LB: loop body
LE: loop exit
PB: predicated region body
PF: predicated region fallthrough
CT: control target
= control target key end

     0   :  { %9 = vsyncpa [#allocation3], 0  ;;  %s481_s0 = inlined_call_operand.vmem [shape: f32[16,128], index: 0, kind: input, shape index: {}]   ;;  %s482_s1 = inlined_call_operand.hbm [shape: f32[1,128], index: 1, kind: input, shape index: {}]   ;;  %s483_s2 = inlined_call_operand.hbm [shape: f32[1,128], index: 2, kind: input, shape index: {}]   ;;  %s484_s3 = inlined_call_operand.hbm [shape: f32[128,128], index: 3, kind: input, shape index: {}]   ;;  %s485_s4 = inlined_call_operand.vmem [shape: bf16[16,128], index: 4, kind: output, shape index: {}]  }
   0x1   :  { %10 = vsyncpa [#allocation5], 0  ;;  %s390_s15 = smov [#allocation4]   ;;  %s391_s17 = smov [#allocation2]  }
   0x2   :  { %s29_s16 = sshll.u32 %s390_s15, 4  ;;  %s19_s18 = sshll.u32 %s391_s17, 4  ;;  %s30_s16 = int_to_ptr.vmem [resolvable:$true] %s29_s16  ;;  %s20_s18 = int_to_ptr.vmem [resolvable:$true] %s19_s18 }
   0x3   :  { %s320_s21 = scalar_lea.hbm %s483_s2, 16 }
   0x4   :  { %p321_p0 = scmp.ne.s32.totalorder %s483_s2, %s320_s21  ;;  %p324_p1 = scmp.lt.u32.totalorder %s320_s21, %s483_s2 }
   0x6   :  { %p326_p2 = pnand %p324_p1, %p321_p0 }
   0x8   :  { %329 = shalt.err (!%p326_p2)
}
   0x9   :  { %s330_s26 = scalar_lea.vmem %s30_s16, 16  ;;  %s334_s27 = scalar_lea.vmem %s30_s16, 32 }
   0xa   :  { %p331_p3 = scmp.ne.s32.totalorder %s30_s16, %s330_s26  ;;  %p335_p4 = scmp.lt.s32.totalorder %s30_s16, %s30_s16 }
   0xb   :  { %p336_p5 = scmp.lt.s32.totalorder %s334_s27, %s330_s26 }
   0xd   :  { %p337_p6 = por %p336_p5, %p335_p4 }
   0xf   :  { %p338_p7 = pnand %p337_p6, %p331_p3 }
  0x11   :  { %341 = shalt.err (!%p338_p7)
}
  0x12   :  { %32 = dma.hbm_to_vmem [thread:$0]  %s483_s2, 16, %s30_s16, [#allocation5]  }
  0x13   :  { %s342_s6 = scalar_lea.hbm %s482_s1, 16 }
  0x14   :  { %p343_p8 = scmp.ne.s32.totalorder %s482_s1, %s342_s6  ;;  %p346_p9 = scmp.lt.u32.totalorder %s342_s6, %s482_s1 }
  0x16   :  { %p348_p10 = pnand %p346_p9, %p343_p8 }
  0x18   :  { %351 = shalt.err (!%p348_p10)
}
  0x19   :  { %s352_s11 = scalar_lea.vmem %s20_s18, 16  ;;  %s356_s12 = scalar_lea.vmem %s20_s18, 32 }
  0x1a   :  { %p353_p11 = scmp.ne.s32.totalorder %s20_s18, %s352_s11  ;;  %p357_p12 = scmp.lt.s32.totalorder %s20_s18, %s20_s18 }
  0x1b   :  { %p358_p13 = scmp.lt.s32.totalorder %s356_s12, %s352_s11 }
  0x1d   :  { %p359_p0 = por %p358_p13, %p357_p12 }
  0x1f   :  { %p360_p1 = pnand %p359_p0, %p353_p11 }
  0x21   :  { %363 = shalt.err (!%p360_p1)
}
  0x22   :  { %22 = dma.hbm_to_vmem [thread:$0]  %s482_s1, 16, %s20_s18, [#allocation3]  }
  0x23   :  { %s392_s14 = smov [#allocation6]   ;;  %s364_s19 = scalar_lea.hbm %s484_s3, 2048 }
  0x24   :  { %s38_s15 = sshll.u32 %s392_s14, 4  ;;  %p365_p2 = scmp.ne.s32.totalorder %s484_s3, %s364_s19  ;;  %s39_s15 = int_to_ptr.vmem [resolvable:$true] %s38_s15 }
  0x25   :  { %p368_p3 = scmp.lt.u32.totalorder %s364_s19, %s484_s3 }
  0x27   :  { %p370_p4 = pnand %p368_p3, %p365_p2 }
  0x29   :  { %373 = shalt.err (!%p370_p4)
}
  0x2a   :  { %s374_s24 = scalar_lea.vmem %s39_s15, 2048  ;;  %p379_p6 = scmp.lt.s32.totalorder %s39_s15, %s39_s15 }
  0x2b   :  { %p375_p5 = scmp.ne.s32.totalorder %s39_s15, %s374_s24  ;;  %p380_p7 = scmp.lt.s32.totalorder %s374_s24, %s374_s24 }
  0x2d   :  { %p381_p8 = por %p380_p7, %p379_p6 }
  0x2f   :  { %p382_p9 = pnand %p381_p8, %p375_p5 }
  0x31   :  { %385 = shalt.err (!%p382_p9)
}
  0x32   :  { %s393_s1 = smov 128   ;;  %s394_s18 = smov 8  }
  0x33   :  { %44 = dma.hbm_to_vmem [thread:$0]  %s484_s3, 2048, %s39_s15, [#allocation5], %s393_s1, %s393_s1, %s394_s18  }
  0x34   :  { %386 = dma.done.wait [#allocation3], 16  }
  0x35   :  { %387 = vsyncadd [#allocation3], 4294967280 }
  0x36   :  { %388 = dma.done.wait [#allocation5], 2064  }
  0x37   :  { %389 = vsyncadd [#allocation5], 4294965232  ;;  %v395_v0 = vmov 0.0|0.0   ;;  %vm396_vm0 = vmmov 0   ;;  %v397_v1 = vmov 0.0   ;;  %v74_v2 = vld [vmem:[#allocation6] sm:$0xff]  ;;  %v173_v54 = vlaneseq }
  0x38   :  { %285 = vmatprep.subr.bf16.mxu0 %v395_v0  ;;  %282 = vmatprep.mubr.msk.f32.mxu0 %vm396_vm0, %v397_v1  ;;  %v75_v3 = vld [vmem:[#allocation6 + $0x8] sm:$0xff]  ;;  %v76_v4 = vld [vmem:[#allocation6 + $0x10] sm:$0xff]  ;;  %v77_v6 = vld [vmem:[#allocation6 + $0x18] sm:$0xff]  ;;  %vm72_vm1 = vcmask 1040384   ;;  %v398_v52 = vmov 1966171168  }
  0x39   :  { %v286_v5 = vpack.c.bf16 %v75_v3, %v74_v2  ;;  %v289_v7 = vpack.c.bf16 %v77_v6, %v76_v4  ;;  %v78_v8 = vld [vmem:[#allocation6 + $0x20] sm:$0xff]  ;;  %v79_v9 = vld [vmem:[#allocation6 + $0x28] sm:$0xff]  ;;  %v80_v16 = vld [vmem:[#allocation6 + $0x30] sm:$0xff]  ;;  %v171_v53 = vunpack.c.l.s4 %v398_v52  ;;  %v174_v56 = vshrl.u32 %v173_v54, 7 }
  0x3a   :  { %v463_v10 = vld [vmem:[%s481_s0] sm:$0xff]  ;;  %v468_v11 = vld [vmem:[%s481_s0 + $0x8] sm:$0xff]  ;;  %v292_v15 = vpack.c.bf16 %v79_v9, %v78_v8  ;;  %v84_v29 = vld [vmem:[#allocation6 + $0x50] sm:$0xff] }
  0x3b   :  { %287 = vmatpush3.bf16.msra.mxu0 %v286_v5  ;;  %v56_v12 = vadd.f32 %v468_v11, %v463_v10  ;;  %v63_v13 = vmul.f32 %v463_v10, %v463_v10  ;;  %v64_v14 = vmul.f32 %v468_v11, %v468_v11  ;;  %v81_v17 = vld [vmem:[#allocation6 + $0x38] sm:$0xff]  ;;  %v82_v23 = vld [vmem:[#allocation6 + $0x40] sm:$0xff]  ;;  %v83_v24 = vld [vmem:[#allocation6 + $0x48] sm:$0xff]  ;;  %v172_v55 = vunpack.c.0.s8 %v171_v53 }
  0x3c   :  { %288 = vmatprep.subr.bf16.mxu0 %v395_v0  ;;  %v295_v21 = vpack.c.bf16 %v81_v17, %v80_v16  ;;  %v298_v26 = vpack.c.bf16 %v83_v24, %v82_v23  ;;  %v85_v30 = vld [vmem:[#allocation6 + $0x58] sm:$0xff]  ;;  %v86_v34 = vld [vmem:[#allocation6 + $0x60] sm:$0xff]  ;;  %v87_v35 = vld [vmem:[#allocation6 + $0x68] sm:$0xff]  ;;  %v193_v63 = vsub.s32 0, %v174_v56 }
  0x3d   :  { %v57_v18 = vrot.slane %v56_v12, 4  ;;  %v65_v19 = vadd.f32 %v64_v14, %v63_v13  ;;  %v301_v31 = vpack.c.bf16 %v85_v30, %v84_v29  ;;  %v304_v36 = vpack.c.bf16 %v87_v35, %v86_v34  ;;  %v88_v39 = vld [vmem:[#allocation6 + $0x70] sm:$0xff]  ;;  %v89_v40 = vld [vmem:[#allocation6 + $0x78] sm:$0xff] }
  0x3e   :  { %v307_v41 = vpack.c.bf16 %v89_v40, %v88_v39  ;;  %v175_v57 = vsub.s32 %v172_v55, %v174_v56  ;;  %v166_v61 = vld [vmem:[#allocation2] sm:$0x1]  ;;  %v187_v1 = vld [vmem:[#allocation4] sm:$0x1] }
  0x3f   :  { %290 = vmatpush3.bf16.msra.mxu0 %v289_v7  ;;  %v66_v20 = vrot.slane %v65_v19, 4  ;;  %v58_v22 = vadd.f32 %v57_v18, %v56_v12 }
  0x40   :  { %291 = vmatprep.subr.bf16.mxu0 %v395_v0 }
  0x41   :  { %v67_v25 = vadd.f32 %v66_v20, %v65_v19  ;;  %v59_v27 = vrot.slane %v58_v22, 2 }
  0x43   :  { %293 = vmatpush3.bf16.msra.mxu0 %v292_v15  ;;  %v68_v28 = vrot.slane %v67_v25, 2  ;;  %v60_v32 = vadd.f32 %v59_v27, %v58_v22 }
  0x44   :  { %294 = vmatprep.subr.bf16.mxu0 %v395_v0 }
  0x45   :  { %v69_v33 = vadd.f32 %v68_v28, %v67_v25  ;;  %v61_v37 = vrot.slane %v60_v32, 1 }
  0x47   :  { %296 = vmatpush3.bf16.msra.mxu0 %v295_v21  ;;  %v70_v38 = vrot.slane %v69_v33, 1  ;;  %v62_v42 = vadd.f32 %v61_v37, %v60_v32 }
  0x48   :  { %297 = vmatprep.subr.bf16.mxu0 %v395_v0 }
  0x49   :  { %v71_v43 = vadd.f32 %v70_v38, %v69_v33 }
  0x4b   :  { %299 = vmatpush3.bf16.msra.mxu0 %v298_v26  ;;  %v73_v44 = vsel %vm72_vm1, %v62_v42, %v71_v43 }
  0x4c   :  { %300 = vmatprep.subr.bf16.mxu0 %v395_v0 }
  0x4f   :  { %302 = vmatpush3.bf16.msra.mxu0 %v301_v31 }
  0x50   :  { %303 = vmatprep.subr.bf16.mxu0 %v395_v0 }
  0x53   :  { %305 = vmatpush3.bf16.msra.mxu0 %v304_v36 }
  0x54   :  { %306 = vmatprep.subr.bf16.mxu0 %v395_v0 }
  0x57   :  { %308 = vmatpush3.bf16.msra.mxu0 %v307_v41 }
  0x5a   :  { %283 = vmatmul.mubr.f32.vlgmr.msra.gmra.mrb[0].mxu0 %v73_v44 }
 0x12d   :  { %v156_v45 = vpop.f32.mrb[0].mxu0 }
 0x12e   :  { %v160_v46 = vmul.f32 0.03125, %v156_v45  ;;  %v284_v47 = vpop.f32.mrb[1].mxu0 }
 0x130   :  { %v161_v48 = vmul.f32 %v160_v46, %v160_v46 }
 0x132   :  { %v163_v49 = vrot.slane %v161_v48, 7 }
 0x134   :  { %v165_v50 = vsub.f32 %v160_v46, %v163_v49 }
 0x136   :  { %v167_v51 = vadd.f32 1e-05, %v165_v50 }
 0x138   :  { %318 = vrsqrt.f32 %v167_v51 }
 0x142   :  { %v319_v58 = vpop.eup %318 }
 0x143   :  { %v176_v59 = vrot.slane %v319_v58, %v175_v57 }
 0x145   :  { %v177_v60 = vcombine.high %v176_v59, %v176_v59 }
 0x147   :  { %v184_v62 = vrot.slane %v177_v60, %v175_v57 }
 0x149   :  { %v186_v0 = vmul.f32 %v184_v62, %v166_v61 }
 0x14b   :  { %v188_v2 = vmul.f32 %v186_v0, %v160_v46  ;;  %v194_v3 = vrot.slane %v186_v0, %v193_v63 }
 0x14d   :  { %v189_v4 = vsub.f32 %v187_v1, %v188_v2  ;;  %v196_v5 = vmul.f32 %v194_v3, %v463_v10  ;;  %v197_v6 = vmul.f32 %v194_v3, %v468_v11 }
 0x14f   :  { %v202_v7 = vrot.slane %v189_v4, %v193_v63 }
 0x151   :  { %v204_v8 = vadd.f32 %v202_v7, %v196_v5  ;;  %v205_v9 = vadd.f32 %v202_v7, %v197_v6 }
 0x153   :  { %v206_v12 = vmax.f32 %v204_v8, 0.0  ;;  %v207_v13 = vmax.f32 %v205_v9, 0.0 }
 0x155   :  { %v231_v14 = vpack.c.bf16 %v207_v13, %v206_v12 }
 0x157   :  { %232 = vst [vmem:[%s485_s4] sm:$0xff] %v231_v14  }
 0x158   :  { %222 = vsyncpa [#allocation3], 1 }
 0x159   :  { %223 = vsyncpa [#allocation5], 1 }

// kernel: _lambda_.10
= control target key start
LH: loop header
LB: loop body
LE: loop exit
PB: predicated region body
PF: predicated region fallthrough
CT: control target
= control target key end

     0   :  { %v293_v3 = vmov 0   ;;  %vm61_vm0 = vcmask 130048   ;;  %v294_v18 = vmov 1983009808   ;;  %v242_v20 = vlaneseq  ;;  %s343_s1 = inlined_call_operand.vmem [shape: bf16[16,1024], index: 1, kind: input, shape index: {}]   ;;  %s344_s0 = inlined_call_operand.vmem [shape: bf16[2,16], index: 0, kind: input, shape index: {}]   ;;  %s345_s2 = inlined_call_operand.vmem [shape: f32[2,1024], index: 2, kind: output, shape index: {}]  }
   0x1   :  { %v13_v0 = vld [vmem:[%s343_s1] sm:$0xff]  ;;  %v14_v2 = vld [vmem:[%s343_s1 + $0x8] sm:$0xff]  ;;  %97 = vmatprep.mubr.bf16.mxu0 %v293_v3  ;;  %138 = vmatprep.mubr.bf16.mxu1 %v293_v3  ;;  %v15_v7 = vld [vmem:[%s343_s1 + $0x10] sm:$0xff]  ;;  %v240_v19 = vunpack.c.l.s4 %v294_v18 }
   0x2   :  { %v17_v1 = vld [vmem:[%s343_s1 + $0x20] sm:$0xff]  ;;  %v18_v5 = vld [vmem:[%s343_s1 + $0x28] sm:$0xff]  ;;  %v19_v10 = vld [vmem:[%s343_s1 + $0x30] sm:$0xff]  ;;  %v243_v22 = vshrl.u32 %v242_v20, 7 }
   0x3   :  { %v280_v4 = vcombine.high %v13_v0, %v17_v1  ;;  %v279_v6 = vcombine.low %v13_v0, %v17_v1  ;;  %v282_v8 = vcombine.high %v14_v2, %v18_v5  ;;  %v281_v9 = vcombine.low %v14_v2, %v18_v5  ;;  %v16_v11 = vld [vmem:[%s343_s1 + $0x18] sm:$0xff]  ;;  %v12_v15 = vld [vmem:[%s344_s0] sm:$0x1] }
   0x4   :  { %v20_v12 = vld [vmem:[%s343_s1 + $0x38] sm:$0xff]  ;;  %v284_v13 = vcombine.high %v15_v7, %v19_v10  ;;  %v283_v16 = vcombine.low %v15_v7, %v19_v10  ;;  %v241_v21 = vunpack.c.0.s8 %v240_v19 }
   0x5   :  { %65 = vmatprep.subr.bf16.mxu0 %v280_v4  ;;  %v286_v14 = vcombine.high %v16_v11, %v20_v12  ;;  %106 = vmatprep.subr.bf16.mxu1 %v282_v8  ;;  %v285_v17 = vcombine.low %v16_v11, %v20_v12 }
   0x6   :  { %66 = vmatpush1.bf16.msra.mxu0 %v279_v6  ;;  %107 = vmatpush1.bf16.msra.mxu1 %v281_v9  ;;  %v244_v24 = vsub.s32 %v241_v21, %v243_v22 }
   0x7   :  { %147 = vmatprep.subr.bf16.mxu0 %v284_v13  ;;  %188 = vmatprep.subr.bf16.mxu1 %v286_v14 }
   0x9   :  { %287 = vmatmul.mubr.msk.bf16.vlgmr.msra.gmra.mrb[0].mxu0 %vm61_vm0, %v12_v15  ;;  %288 = vmatmul.mubr.msk.bf16.vlgmr.msra.gmra.mrb[0].mxu1 %vm61_vm0, %v12_v15 }
   0xa   :  { %148 = vmatpush1.bf16.msra.mxu0 %v283_v16  ;;  %189 = vmatpush1.bf16.msra.mxu1 %v285_v17 }
   0xb   :  { %179 = vmatprep.mubr.bf16.mxu0 %v293_v3  ;;  %220 = vmatprep.mubr.bf16.mxu1 %v293_v3 }
  0x11   :  { %289 = vmatmul.mubr.msk.bf16.vlgmr.msra.gmra.mrb[4].mxu0 %vm61_vm0, %v12_v15  ;;  %290 = vmatmul.mubr.msk.bf16.vlgmr.msra.gmra.mrb[4].mxu1 %vm61_vm0, %v12_v15 }
  0xdc   :  { %v99_v23 = vpop.f32.mrb[0].mxu0  ;;  %v140_v25 = vpop.f32.mrb[0].mxu1 }
  0xdd   :  { %v101_v26 = vpop.f32.mrb[1].mxu0  ;;  %v142_v28 = vpop.f32.mrb[1].mxu1 }
  0xde   :  { %v237_v27 = vcombine.low %v99_v23, %v101_v26  ;;  %v103_v29 = vpop.f32.mrb[2].mxu0  ;;  %v238_v30 = vcombine.low %v140_v25, %v142_v28  ;;  %v144_v31 = vpop.f32.mrb[2].mxu1 }
  0xdf   :  { %v104_v32 = vpop.f32.mrb[3].mxu0  ;;  %v145_v34 = vpop.f32.mrb[3].mxu1 }
  0xe0   :  { %v245_v33 = vrot.slane %v237_v27, %v244_v24  ;;  %v252_v35 = vrot.slane %v238_v30, %v244_v24 }
  0xe2   :  { %v253_v36 = vcombine.low %v245_v33, %v252_v35 }
  0xe4   :  { %v181_v37 = vpop.f32.mrb[4].mxu0  ;;  %273 = vst [vmem:[%s345_s2] sm:$0xff] %v253_v36  ;;  %v222_v38 = vpop.f32.mrb[4].mxu1 }
  0xe5   :  { %v183_v39 = vpop.f32.mrb[5].mxu0  ;;  %v224_v41 = vpop.f32.mrb[5].mxu1 }
  0xe6   :  { %v254_v40 = vcombine.low %v181_v37, %v183_v39  ;;  %v185_v42 = vpop.f32.mrb[6].mxu0  ;;  %v255_v43 = vcombine.low %v222_v38, %v224_v41  ;;  %v226_v44 = vpop.f32.mrb[6].mxu1 }
  0xe7   :  { %v186_v45 = vpop.f32.mrb[7].mxu0  ;;  %v227_v47 = vpop.f32.mrb[7].mxu1 }
  0xe8   :  { %v262_v46 = vrot.slane %v254_v40, %v244_v24  ;;  %v269_v48 = vrot.slane %v255_v43, %v244_v24 }
  0xea   :  { %v270_v49 = vcombine.low %v262_v46, %v269_v48 }
  0xec   :  { %274 = vst [vmem:[%s345_s2 + $0x8] sm:$0xff] %v270_v49 }

// kernel: _lambda_.13
= control target key start
LH: loop header
LB: loop body
LE: loop exit
PB: predicated region body
PF: predicated region fallthrough
CT: control target
= control target key end

     0   :  { %v310_v0 = vmov 0.0|0.0   ;;  %vm311_vm0 = vmmov 0   ;;  %v312_v4 = vmov 0.0   ;;  %vm43_vm1 = vcmask 1040384   ;;  %s443_s3 = inlined_call_operand.vmem [shape: f32[128,128], index: 3, kind: input, shape index: {}]   ;;  %s444_s0 = inlined_call_operand.vmem [shape: f32[32,128], index: 0, kind: input, shape index: {}]   ;;  %s445_s1 = inlined_call_operand.vmem [shape: f32[1,128], index: 1, kind: input, shape index: {}]   ;;  %s446_s2 = inlined_call_operand.vmem [shape: f32[1,128], index: 2, kind: input, shape index: {}]   ;;  %s447_s4 = inlined_call_operand.vmem [shape: bf16[32,128], index: 4, kind: output, shape index: {}]  }
   0x1   :  { %280 = vmatprep.subr.bf16.mxu0 %v310_v0  ;;  %v45_v1 = vld [vmem:[%s443_s3] sm:$0xff]  ;;  %v46_v2 = vld [vmem:[%s443_s3 + $0x8] sm:$0xff]  ;;  %v47_v3 = vld [vmem:[%s443_s3 + $0x10] sm:$0xff]  ;;  %277 = vmatprep.mubr.msk.f32.mxu0 %vm311_vm0, %v312_v4  ;;  %v313_v60 = vmov 1966171168   ;;  %v144_v62 = vlaneseq }
   0x2   :  { %v281_v5 = vpack.c.bf16 %v46_v2, %v45_v1  ;;  %v48_v6 = vld [vmem:[%s443_s3 + $0x18] sm:$0xff]  ;;  %v49_v8 = vld [vmem:[%s443_s3 + $0x20] sm:$0xff]  ;;  %v50_v9 = vld [vmem:[%s443_s3 + $0x28] sm:$0xff]  ;;  %v142_v61 = vunpack.c.l.s4 %v313_v60 }
   0x3   :  { %v284_v7 = vpack.c.bf16 %v48_v6, %v47_v3  ;;  %v362_v10 = vld [vmem:[%s444_s0] sm:$0xff]  ;;  %v367_v11 = vld [vmem:[%s444_s0 + $0x8] sm:$0xff]  ;;  %v372_v12 = vld [vmem:[%s444_s0 + $0x10] sm:$0xff]  ;;  %v287_v17 = vpack.c.bf16 %v50_v9, %v49_v8  ;;  %v145_v1 = vshrl.u32 %v144_v62, 7 }
   0x4   :  { %282 = vmatpush3.bf16.msra.mxu0 %v281_v5  ;;  %v377_v13 = vld [vmem:[%s444_s0 + $0x18] sm:$0xff]  ;;  %v21_v14 = vadd.f32 %v367_v11, %v362_v10  ;;  %v30_v15 = vmul.f32 %v362_v10, %v362_v10  ;;  %v31_v16 = vmul.f32 %v367_v11, %v367_v11  ;;  %v32_v18 = vmul.f32 %v372_v12, %v372_v12  ;;  %v51_v19 = vld [vmem:[%s443_s3 + $0x30] sm:$0xff]  ;;  %v53_v27 = vld [vmem:[%s443_s3 + $0x40] sm:$0xff] }
   0x5   :  { %283 = vmatprep.subr.bf16.mxu0 %v310_v0  ;;  %v52_v20 = vld [vmem:[%s443_s3 + $0x38] sm:$0xff]  ;;  %v33_v22 = vmul.f32 %v377_v13, %v377_v13  ;;  %v54_v28 = vld [vmem:[%s443_s3 + $0x48] sm:$0xff]  ;;  %v55_v34 = vld [vmem:[%s443_s3 + $0x50] sm:$0xff]  ;;  %v143_v63 = vunpack.c.0.s8 %v142_v61 }
   0x6   :  { %v22_v21 = vadd.f32 %v21_v14, %v372_v12  ;;  %v34_v23 = vadd.f32 %v31_v16, %v30_v15  ;;  %v290_v26 = vpack.c.bf16 %v52_v20, %v51_v19  ;;  %v293_v33 = vpack.c.bf16 %v54_v28, %v53_v27  ;;  %v56_v35 = vld [vmem:[%s443_s3 + $0x58] sm:$0xff]  ;;  %v57_v41 = vld [vmem:[%s443_s3 + $0x60] sm:$0xff]  ;;  %v58_v42 = vld [vmem:[%s443_s3 + $0x68] sm:$0xff] }
   0x7   :  { %v296_v39 = vpack.c.bf16 %v56_v35, %v55_v34  ;;  %v299_v44 = vpack.c.bf16 %v58_v42, %v57_v41  ;;  %v59_v47 = vld [vmem:[%s443_s3 + $0x70] sm:$0xff]  ;;  %v60_v48 = vld [vmem:[%s443_s3 + $0x78] sm:$0xff]  ;;  %v146_v2 = vsub.s32 %v143_v63, %v145_v1  ;;  %v137_v5 = vld [vmem:[%s445_s1] sm:$0x1] }
   0x8   :  { %285 = vmatpush3.bf16.msra.mxu0 %v284_v7  ;;  %v23_v24 = vadd.f32 %v22_v21, %v377_v13  ;;  %v35_v25 = vadd.f32 %v34_v23, %v32_v18  ;;  %v302_v49 = vpack.c.bf16 %v60_v48, %v59_v47  ;;  %v164_v7 = vsub.s32 0, %v145_v1  ;;  %v158_v9 = vld [vmem:[%s446_s2] sm:$0x1] }
   0x9   :  { %286 = vmatprep.subr.bf16.mxu0 %v310_v0 }
   0xa   :  { %v24_v29 = vrot.slane %v23_v24, 4  ;;  %v36_v30 = vadd.f32 %v35_v25, %v33_v22 }
   0xc   :  { %288 = vmatpush3.bf16.msra.mxu0 %v287_v17  ;;  %v25_v31 = vadd.f32 %v24_v29, %v23_v24  ;;  %v37_v32 = vrot.slane %v36_v30, 4 }
   0xd   :  { %289 = vmatprep.subr.bf16.mxu0 %v310_v0 }
   0xe   :  { %v26_v36 = vrot.slane %v25_v31, 2  ;;  %v38_v37 = vadd.f32 %v37_v32, %v36_v30 }
  0x10   :  { %291 = vmatpush3.bf16.msra.mxu0 %v290_v26  ;;  %v39_v38 = vrot.slane %v38_v37, 2  ;;  %v27_v40 = vadd.f32 %v26_v36, %v25_v31 }
  0x11   :  { %292 = vmatprep.subr.bf16.mxu0 %v310_v0 }
  0x12   :  { %v40_v43 = vadd.f32 %v39_v38, %v38_v37  ;;  %v28_v45 = vrot.slane %v27_v40, 1 }
  0x14   :  { %294 = vmatpush3.bf16.msra.mxu0 %v293_v33  ;;  %v41_v46 = vrot.slane %v40_v43, 1  ;;  %v29_v50 = vadd.f32 %v28_v45, %v27_v40 }
  0x15   :  { %295 = vmatprep.subr.bf16.mxu0 %v310_v0 }
  0x16   :  { %v42_v51 = vadd.f32 %v41_v46, %v40_v43 }
  0x18   :  { %297 = vmatpush3.bf16.msra.mxu0 %v296_v39  ;;  %v44_v52 = vsel %vm43_vm1, %v29_v50, %v42_v51 }
  0x19   :  { %298 = vmatprep.subr.bf16.mxu0 %v310_v0 }
  0x1c   :  { %300 = vmatpush3.bf16.msra.mxu0 %v299_v44 }
  0x1d   :  { %301 = vmatprep.subr.bf16.mxu0 %v310_v0 }
  0x20   :  { %303 = vmatpush3.bf16.msra.mxu0 %v302_v49 }
  0x23   :  { %278 = vmatmul.mubr.f32.vlgmr.msra.gmra.mrb[0].mxu0 %v44_v52 }
  0xf6   :  { %v127_v53 = vpop.f32.mrb[0].mxu0 }
  0xf7   :  { %v131_v54 = vmul.f32 0.0078125, %v127_v53  ;;  %v279_v55 = vpop.f32.mrb[1].mxu0 }
  0xf9   :  { %v132_v56 = vmul.f32 %v131_v54, %v131_v54 }
  0xfb   :  { %v134_v57 = vrot.slane %v132_v56, 7 }
  0xfd   :  { %v136_v58 = vsub.f32 %v131_v54, %v134_v57 }
  0xff   :  { %v138_v59 = vadd.f32 1e-05, %v136_v58 }
 0x101   :  { %308 = vrsqrt.f32 %v138_v59 }
 0x10b   :  { %v309_v3 = vpop.eup %308 }
 0x10c   :  { %v147_v0 = vrot.slane %v309_v3, %v146_v2 }
 0x10e   :  { %v148_v4 = vcombine.high %v147_v0, %v147_v0 }
 0x110   :  { %v155_v6 = vrot.slane %v148_v4, %v146_v2 }
 0x112   :  { %v157_v8 = vmul.f32 %v155_v6, %v137_v5 }
 0x114   :  { %v159_v14 = vmul.f32 %v157_v8, %v131_v54  ;;  %v165_v15 = vrot.slane %v157_v8, %v164_v7 }
 0x116   :  { %v160_v16 = vsub.f32 %v158_v9, %v159_v14  ;;  %v167_v17 = vmul.f32 %v165_v15, %v362_v10  ;;  %v168_v18 = vmul.f32 %v165_v15, %v367_v11  ;;  %v169_v19 = vmul.f32 %v165_v15, %v372_v12 }
 0x117   :  { %v170_v20 = vmul.f32 %v165_v15, %v377_v13 }
 0x118   :  { %v175_v21 = vrot.slane %v160_v16, %v164_v7 }
 0x11a   :  { %v177_v22 = vadd.f32 %v175_v21, %v167_v17  ;;  %v178_v23 = vadd.f32 %v175_v21, %v168_v18  ;;  %v179_v24 = vadd.f32 %v175_v21, %v169_v19  ;;  %v180_v25 = vadd.f32 %v175_v21, %v170_v20 }
 0x11c   :  { %v181_v26 = vmax.f32 %v177_v22, 0.0  ;;  %v182_v27 = vmax.f32 %v178_v23, 0.0  ;;  %v183_v28 = vmax.f32 %v179_v24, 0.0  ;;  %v184_v29 = vmax.f32 %v180_v25, 0.0 }
 0x11e   :  { %v220_v30 = vpack.c.bf16 %v182_v27, %v181_v26  ;;  %v225_v31 = vpack.c.bf16 %v184_v29, %v183_v28 }
 0x120   :  { %221 = vst [vmem:[%s447_s4] sm:$0xff] %v220_v30   ;;  %227 = vst [vmem:[%s447_s4 + $0x8] sm:$0xff] %v225_v31  }

// kernel: _lambda_.14
= control target key start
LH: loop header
LB: loop body
LE: loop exit
PB: predicated region body
PF: predicated region fallthrough
CT: control target
= control target key end

     0   :  { %v305_v1 = vmov 0   ;;  %vm92_vm0 = vcmask 261120   ;;  %s461_s1 = inlined_call_operand.vmem [shape: bf16[32,256], index: 1, kind: input, shape index: {}]   ;;  %s462_s0 = inlined_call_operand.vmem [shape: bf16[128,32], index: 0, kind: input, shape index: {}]   ;;  %s463_s2 = inlined_call_operand.vmem [shape: f32[128,256], index: 2, kind: output, shape index: {}]  }
   0x1   :  { %v291_v0 = vld [vmem:[%s461_s1 + $0x4] ss:$8 sps:$4 sm:$0xff]   ;;  %149 = vmatprep.mubr.bf16.mxu0 %v305_v1  ;;  %189 = vmatprep.mubr.bf16.mxu1 %v305_v1  ;;  %v293_v2 = vld [vmem:[%s461_s1] ss:$8 sps:$4 sm:$0xff]   ;;  %v294_v3 = vld [vmem:[%s461_s1 + $0x14] ss:$8 sps:$4 sm:$0xff]  }
   0x2   :  { %117 = vmatprep.subr.bf16.mxu0 %v291_v0  ;;  %286 = vmatprep.subr.bf16.mxu1 %v291_v0  ;;  %v296_v4 = vld [vmem:[%s461_s1 + $0x10] ss:$8 sps:$4 sm:$0xff]   ;;  %v297_v5 = vld [vmem:[%s462_s0] sm:$0xff]   ;;  %v299_v7 = vld [vmem:[%s462_s0 + $0x8] sm:$0xff]  }
   0x3   :  { %118 = vmatpush1.bf16.msra.mxu0 %v293_v2  ;;  %288 = vmatpush1.bf16.msra.mxu1 %v293_v2  ;;  %v298_v6 = vld [vmem:[%s462_s0 + $0x20] sm:$0xff]   ;;  %v300_v8 = vld [vmem:[%s462_s0 + $0x28] sm:$0xff]   ;;  %v301_v9 = vld [vmem:[%s462_s0 + $0x10] sm:$0xff]  }
   0x4   :  { %119 = vmatprep.subr.bf16.mxu0 %v294_v3  ;;  %287 = vmatprep.subr.bf16.mxu1 %v294_v3  ;;  %v302_v10 = vld [vmem:[%s462_s0 + $0x30] sm:$0xff]   ;;  %v303_v11 = vld [vmem:[%s462_s0 + $0x18] sm:$0xff]  }
   0x5   :  { %v304_v12 = vld [vmem:[%s462_s0 + $0x38] sm:$0xff]  }
   0x7   :  { %120 = vmatpush1.bf16.msra.mxu0 %v296_v4  ;;  %289 = vmatpush1.bf16.msra.mxu1 %v296_v4 }
   0xa   :  { %278 = vmatmul.mubr.msk.bf16.vlgmr.msra.gmra.mrb[0].mxu0 %vm92_vm0, %v297_v5  ;;  %282 = vmatmul.mubr.msk.bf16.vlgmr.msra.gmra.mrb[0].mxu1 %vm92_vm0, %v298_v6 }
   0xb   :  { %159 = vmatprep.mubr.bf16.mxu0 %v305_v1  ;;  %199 = vmatprep.mubr.bf16.mxu1 %v305_v1 }
  0x12   :  { %279 = vmatmul.mubr.msk.bf16.gmra.mrb[4].mxu0 %vm92_vm0, %v299_v7  ;;  %283 = vmatmul.mubr.msk.bf16.gmra.mrb[4].mxu1 %vm92_vm0, %v300_v8 }
  0x13   :  { %169 = vmatprep.mubr.bf16.mxu0 %v305_v1  ;;  %209 = vmatprep.mubr.bf16.mxu1 %v305_v1 }
  0x1a   :  { %280 = vmatmul.mubr.msk.bf16.gmra.mrb[8].mxu0 %vm92_vm0, %v301_v9  ;;  %284 = vmatmul.mubr.msk.bf16.gmra.mrb[8].mxu1 %vm92_vm0, %v302_v10 }
  0x1b   :  { %179 = vmatprep.mubr.bf16.mxu0 %v305_v1  ;;  %219 = vmatprep.mubr.bf16.mxu1 %v305_v1 }
  0x22   :  { %281 = vmatmul.mubr.msk.bf16.gmra.mrb[12].mxu0 %vm92_vm0, %v303_v11  ;;  %285 = vmatmul.mubr.msk.bf16.gmra.mrb[12].mxu1 %vm92_vm0, %v304_v12 }
  0xdd   :  { %v151_v13 = vpop.f32.mrb[0].mxu0  ;;  %v191_v14 = vpop.f32.mrb[0].mxu1 }
  0xde   :  { %230 = vst [vmem:[%s463_s2] sm:$0xff] %v151_v13  ;;  %246 = vst [vmem:[%s463_s2 + $0x80] sm:$0xff] %v191_v14  ;;  %v153_v15 = vpop.f32.mrb[1].mxu0  ;;  %v193_v16 = vpop.f32.mrb[1].mxu1 }
  0xdf   :  { %231 = vst [vmem:[%s463_s2 + $0x8] sm:$0xff] %v153_v15  ;;  %247 = vst [vmem:[%s463_s2 + $0x88] sm:$0xff] %v193_v16  ;;  %v155_v17 = vpop.f32.mrb[2].mxu0  ;;  %v195_v18 = vpop.f32.mrb[2].mxu1 }
  0xe0   :  { %232 = vst [vmem:[%s463_s2 + $0x10] sm:$0xff] %v155_v17  ;;  %248 = vst [vmem:[%s463_s2 + $0x90] sm:$0xff] %v195_v18  ;;  %v157_v19 = vpop.f32.mrb[3].mxu0  ;;  %v197_v20 = vpop.f32.mrb[3].mxu1 }
  0xe1   :  { %233 = vst [vmem:[%s463_s2 + $0x18] sm:$0xff] %v157_v19  ;;  %249 = vst [vmem:[%s463_s2 + $0x98] sm:$0xff] %v197_v20 }
  0xe5   :  { %v161_v21 = vpop.f32.mrb[4].mxu0  ;;  %v201_v22 = vpop.f32.mrb[4].mxu1 }
  0xe6   :  { %234 = vst [vmem:[%s463_s2 + $0x20] sm:$0xff] %v161_v21  ;;  %250 = vst [vmem:[%s463_s2 + $0xa0] sm:$0xff] %v201_v22  ;;  %v163_v23 = vpop.f32.mrb[5].mxu0  ;;  %v203_v24 = vpop.f32.mrb[5].mxu1 }
  0xe7   :  { %235 = vst [vmem:[%s463_s2 + $0x28] sm:$0xff] %v163_v23  ;;  %251 = vst [vmem:[%s463_s2 + $0xa8] sm:$0xff] %v203_v24  ;;  %v165_v25 = vpop.f32.mrb[6].mxu0  ;;  %v205_v26 = vpop.f32.mrb[6].mxu1 }
  0xe8   :  { %236 = vst [vmem:[%s463_s2 + $0x30] sm:$0xff] %v165_v25  ;;  %252 = vst [vmem:[%s463_s2 + $0xb0] sm:$0xff] %v205_v26  ;;  %v167_v27 = vpop.f32.mrb[7].mxu0  ;;  %v207_v28 = vpop.f32.mrb[7].mxu1 }
  0xe9   :  { %237 = vst [vmem:[%s463_s2 + $0x38] sm:$0xff] %v167_v27  ;;  %253 = vst [vmem:[%s463_s2 + $0xb8] sm:$0xff] %v207_v28 }
  0xed   :  { %v171_v29 = vpop.f32.mrb[8].mxu0  ;;  %v211_v30 = vpop.f32.mrb[8].mxu1 }
  0xee   :  { %238 = vst [vmem:[%s463_s2 + $0x40] sm:$0xff] %v171_v29  ;;  %254 = vst [vmem:[%s463_s2 + $0xc0] sm:$0xff] %v211_v30  ;;  %v173_v31 = vpop.f32.mrb[9].mxu0  ;;  %v213_v32 = vpop.f32.mrb[9].mxu1 }
  0xef   :  { %239 = vst [vmem:[%s463_s2 + $0x48] sm:$0xff] %v173_v31  ;;  %255 = vst [vmem:[%s463_s2 + $0xc8] sm:$0xff] %v213_v32  ;;  %v175_v33 = vpop.f32.mrb[10].mxu0  ;;  %v215_v34 = vpop.f32.mrb[10].mxu1 }
  0xf0   :  { %240 = vst [vmem:[%s463_s2 + $0x50] sm:$0xff] %v175_v33  ;;  %256 = vst [vmem:[%s463_s2 + $0xd0] sm:$0xff] %v215_v34  ;;  %v177_v35 = vpop.f32.mrb[11].mxu0  ;;  %v217_v36 = vpop.f32.mrb[11].mxu1 }
  0xf1   :  { %241 = vst [vmem:[%s463_s2 + $0x58] sm:$0xff] %v177_v35  ;;  %257 = vst [vmem:[%s463_s2 + $0xd8] sm:$0xff] %v217_v36 }
  0xf5   :  { %v181_v37 = vpop.f32.mrb[12].mxu0  ;;  %v221_v38 = vpop.f32.mrb[12].mxu1 }
  0xf6   :  { %242 = vst [vmem:[%s463_s2 + $0x60] sm:$0xff] %v181_v37  ;;  %258 = vst [vmem:[%s463_s2 + $0xe0] sm:$0xff] %v221_v38  ;;  %v183_v39 = vpop.f32.mrb[13].mxu0  ;;  %v223_v40 = vpop.f32.mrb[13].mxu1 }
  0xf7   :  { %243 = vst [vmem:[%s463_s2 + $0x68] sm:$0xff] %v183_v39  ;;  %259 = vst [vmem:[%s463_s2 + $0xe8] sm:$0xff] %v223_v40  ;;  %v185_v41 = vpop.f32.mrb[14].mxu0  ;;  %v225_v42 = vpop.f32.mrb[14].mxu1 }
  0xf8   :  { %244 = vst [vmem:[%s463_s2 + $0x70] sm:$0xff] %v185_v41  ;;  %260 = vst [vmem:[%s463_s2 + $0xf0] sm:$0xff] %v225_v42  ;;  %v187_v43 = vpop.f32.mrb[15].mxu0  ;;  %v227_v44 = vpop.f32.mrb[15].mxu1 }
  0xf9   :  { %245 = vst [vmem:[%s463_s2 + $0x78] sm:$0xff] %v187_v43  ;;  %261 = vst [vmem:[%s463_s2 + $0xf8] sm:$0xff] %v227_v44 }

// kernel: _lambda_.15
= control target key start
LH: loop header
LB: loop body
LE: loop exit
PB: predicated region body
PF: predicated region fallthrough
CT: control target
= control target key end

     0   :  { %v378_v0 = vmov 0.0|0.0   ;;  %vm379_vm0 = vmmov 0   ;;  %v380_v4 = vmov 0.0   ;;  %vm59_vm1 = vcmask 1040384   ;;  %s553_s3 = inlined_call_operand.vmem [shape: f32[128,128], index: 3, kind: input, shape index: {}]   ;;  %s554_s0 = inlined_call_operand.vmem [shape: f32[64,128], index: 0, kind: input, shape index: {}]   ;;  %s555_s1 = inlined_call_operand.vmem [shape: f32[1,128], index: 1, kind: input, shape index: {}]   ;;  %s556_s2 = inlined_call_operand.vmem [shape: f32[1,128], index: 2, kind: input, shape index: {}]   ;;  %s557_s4 = inlined_call_operand.vmem [shape: bf16[64,128], index: 4, kind: output, shape index: {}]  }
   0x1   :  { %348 = vmatprep.subr.bf16.mxu0 %v378_v0  ;;  %v61_v1 = vld [vmem:[%s553_s3] sm:$0xff]  ;;  %v62_v2 = vld [vmem:[%s553_s3 + $0x8] sm:$0xff]  ;;  %v63_v3 = vld [vmem:[%s553_s3 + $0x10] sm:$0xff]  ;;  %345 = vmatprep.mubr.msk.f32.mxu0 %vm379_vm0, %v380_v4 }
   0x2   :  { %v349_v5 = vpack.c.bf16 %v62_v2, %v61_v1  ;;  %v64_v6 = vld [vmem:[%s553_s3 + $0x18] sm:$0xff]  ;;  %v65_v8 = vld [vmem:[%s553_s3 + $0x20] sm:$0xff]  ;;  %v66_v9 = vld [vmem:[%s553_s3 + $0x28] sm:$0xff] }
   0x3   :  { %v352_v7 = vpack.c.bf16 %v64_v6, %v63_v3  ;;  %v430_v10 = vld [vmem:[%s554_s0] sm:$0xff]  ;;  %v435_v11 = vld [vmem:[%s554_s0 + $0x8] sm:$0xff]  ;;  %v440_v12 = vld [vmem:[%s554_s0 + $0x10] sm:$0xff]  ;;  %v355_v17 = vpack.c.bf16 %v66_v9, %v65_v8 }
   0x4   :  { %350 = vmatpush3.bf16.msra.mxu0 %v349_v5  ;;  %v445_v13 = vld [vmem:[%s554_s0 + $0x18] sm:$0xff]  ;;  %v25_v14 = vadd.f32 %v435_v11, %v430_v10  ;;  %v38_v15 = vmul.f32 %v430_v10, %v430_v10  ;;  %v39_v16 = vmul.f32 %v435_v11, %v435_v11  ;;  %v40_v18 = vmul.f32 %v440_v12, %v440_v12  ;;  %v67_v19 = vld [vmem:[%s553_s3 + $0x30] sm:$0xff]  ;;  %v465_v21 = vld [vmem:[%s554_s0 + $0x20] sm:$0xff] }
   0x5   :  { %351 = vmatprep.subr.bf16.mxu0 %v378_v0  ;;  %v68_v20 = vld [vmem:[%s553_s3 + $0x38] sm:$0xff]  ;;  %v41_v23 = vmul.f32 %v445_v13, %v445_v13  ;;  %v473_v25 = vld [vmem:[%s554_s0 + $0x28] sm:$0xff]  ;;  %v42_v28 = vmul.f32 %v465_v21, %v465_v21  ;;  %v69_v30 = vld [vmem:[%s553_s3 + $0x40] sm:$0xff] }
   0x6   :  { %v26_v22 = vadd.f32 %v25_v14, %v440_v12  ;;  %v46_v24 = vadd.f32 %v39_v16, %v38_v15  ;;  %v358_v27 = vpack.c.bf16 %v68_v20, %v67_v19  ;;  %v70_v31 = vld [vmem:[%s553_s3 + $0x48] sm:$0xff]  ;;  %v488_v32 = vld [vmem:[%s554_s0 + $0x30] sm:$0xff]  ;;  %v43_v34 = vmul.f32 %v473_v25, %v473_v25  ;;  %v496_v36 = vld [vmem:[%s554_s0 + $0x38] sm:$0xff] }
   0x7   :  { %v361_v38 = vpack.c.bf16 %v70_v31, %v69_v30  ;;  %v44_v39 = vmul.f32 %v488_v32, %v488_v32  ;;  %v71_v41 = vld [vmem:[%s553_s3 + $0x50] sm:$0xff]  ;;  %v72_v42 = vld [vmem:[%s553_s3 + $0x58] sm:$0xff]  ;;  %v45_v44 = vmul.f32 %v496_v36, %v496_v36  ;;  %v73_v49 = vld [vmem:[%s553_s3 + $0x60] sm:$0xff]  ;;  %v160_v19 = vlaneseq }
   0x8   :  { %353 = vmatpush3.bf16.msra.mxu0 %v352_v7  ;;  %v27_v26 = vadd.f32 %v26_v22, %v445_v13  ;;  %v47_v29 = vadd.f32 %v46_v24, %v40_v18  ;;  %v364_v47 = vpack.c.bf16 %v72_v42, %v71_v41  ;;  %v74_v50 = vld [vmem:[%s553_s3 + $0x68] sm:$0xff]  ;;  %v75_v56 = vld [vmem:[%s553_s3 + $0x70] sm:$0xff]  ;;  %v76_v57 = vld [vmem:[%s553_s3 + $0x78] sm:$0xff] }
   0x9   :  { %354 = vmatprep.subr.bf16.mxu0 %v378_v0  ;;  %v367_v54 = vpack.c.bf16 %v74_v50, %v73_v49  ;;  %v370_v61 = vpack.c.bf16 %v76_v57, %v75_v56  ;;  %v161_v20 = vshrl.u32 %v160_v19, 7  ;;  %v174_v31 = vld [vmem:[%s556_s2] sm:$0x1] }
   0xa   :  { %v28_v33 = vadd.f32 %v27_v26, %v465_v21  ;;  %v48_v35 = vadd.f32 %v47_v29, %v41_v23 }
   0xb   :  { %v180_v29 = vsub.s32 0, %v161_v20 }
   0xc   :  { %356 = vmatpush3.bf16.msra.mxu0 %v355_v17  ;;  %v29_v37 = vadd.f32 %v28_v33, %v473_v25  ;;  %v49_v40 = vadd.f32 %v48_v35, %v42_v28  ;;  %v381_v17 = vmov 1966171168  }
   0xd   :  { %357 = vmatprep.subr.bf16.mxu0 %v378_v0  ;;  %v158_v18 = vunpack.c.l.s4 %v381_v17 }
   0xe   :  { %v30_v43 = vadd.f32 %v29_v37, %v488_v32  ;;  %v50_v45 = vadd.f32 %v49_v40, %v43_v34 }
  0x10   :  { %359 = vmatpush3.bf16.msra.mxu0 %v358_v27  ;;  %v31_v46 = vadd.f32 %v30_v43, %v496_v36  ;;  %v51_v48 = vadd.f32 %v50_v45, %v44_v39  ;;  %v153_v27 = vld [vmem:[%s555_s1] sm:$0x1] }
  0x11   :  { %360 = vmatprep.subr.bf16.mxu0 %v378_v0 }
  0x12   :  { %v32_v51 = vrot.slane %v31_v46, 4  ;;  %v52_v52 = vadd.f32 %v51_v48, %v45_v44 }
  0x14   :  { %362 = vmatpush3.bf16.msra.mxu0 %v361_v38  ;;  %v33_v53 = vadd.f32 %v32_v51, %v31_v46  ;;  %v53_v55 = vrot.slane %v52_v52, 4 }
  0x15   :  { %363 = vmatprep.subr.bf16.mxu0 %v378_v0 }
  0x16   :  { %v34_v58 = vrot.slane %v33_v53, 2  ;;  %v54_v59 = vadd.f32 %v53_v55, %v52_v52 }
  0x18   :  { %365 = vmatpush3.bf16.msra.mxu0 %v364_v47  ;;  %v35_v60 = vadd.f32 %v34_v58, %v33_v53  ;;  %v55_v62 = vrot.slane %v54_v59, 2 }
  0x19   :  { %366 = vmatprep.subr.bf16.mxu0 %v378_v0 }
  0x1a   :  { %v36_v63 = vrot.slane %v35_v60, 1  ;;  %v56_v1 = vadd.f32 %v55_v62, %v54_v59 }
  0x1c   :  { %368 = vmatpush3.bf16.msra.mxu0 %v367_v54  ;;  %v37_v2 = vadd.f32 %v36_v63, %v35_v60  ;;  %v57_v3 = vrot.slane %v56_v1, 1 }
  0x1d   :  { %369 = vmatprep.subr.bf16.mxu0 %v378_v0  ;;  %v159_v0 = vunpack.c.0.s8 %v158_v18 }
  0x1e   :  { %v58_v4 = vadd.f32 %v57_v3, %v56_v1 }
  0x1f   :  { %v162_v22 = vsub.s32 %v159_v0, %v161_v20 }
  0x20   :  { %371 = vmatpush3.bf16.msra.mxu0 %v370_v61  ;;  %v60_v5 = vsel %vm59_vm1, %v37_v2, %v58_v4 }
  0x23   :  { %346 = vmatmul.mubr.f32.vlgmr.msra.gmra.mrb[0].mxu0 %v60_v5 }
  0xf6   :  { %v143_v6 = vpop.f32.mrb[0].mxu0 }
  0xf7   :  { %v147_v7 = vmul.f32 0.001953125, %v143_v6  ;;  %v347_v8 = vpop.f32.mrb[1].mxu0 }
  0xf9   :  { %v148_v9 = vmul.f32 %v147_v7, %v147_v7 }
  0xfb   :  { %v150_v14 = vrot.slane %v148_v9, 7 }
  0xfd   :  { %v152_v15 = vsub.f32 %v147_v7, %v150_v14 }
  0xff   :  { %v154_v16 = vadd.f32 1e-05, %v152_v15 }
 0x101   :  { %376 = vrsqrt.f32 %v154_v16 }
 0x10b   :  { %v377_v23 = vpop.eup %376 }
 0x10c   :  { %v163_v24 = vrot.slane %v377_v23, %v162_v22 }
 0x10e   :  { %v164_v26 = vcombine.high %v163_v24, %v163_v24 }
 0x110   :  { %v171_v28 = vrot.slane %v164_v26, %v162_v22 }
 0x112   :  { %v173_v30 = vmul.f32 %v171_v28, %v153_v27 }
 0x114   :  { %v175_v33 = vmul.f32 %v173_v30, %v147_v7  ;;  %v181_v34 = vrot.slane %v173_v30, %v180_v29 }
 0x116   :  { %v176_v35 = vsub.f32 %v174_v31, %v175_v33  ;;  %v183_v37 = vmul.f32 %v181_v34, %v430_v10  ;;  %v184_v38 = vmul.f32 %v181_v34, %v435_v11  ;;  %v185_v39 = vmul.f32 %v181_v34, %v440_v12 }
 0x117   :  { %v186_v40 = vmul.f32 %v181_v34, %v445_v13  ;;  %v187_v42 = vmul.f32 %v181_v34, %v465_v21  ;;  %v188_v43 = vmul.f32 %v181_v34, %v473_v25  ;;  %v189_v44 = vmul.f32 %v181_v34, %v488_v32 }
 0x118   :  { %v195_v41 = vrot.slane %v176_v35, %v180_v29  ;;  %v190_v45 = vmul.f32 %v181_v34, %v496_v36 }
 0x11a   :  { %v197_v46 = vadd.f32 %v195_v41, %v183_v37  ;;  %v198_v47 = vadd.f32 %v195_v41, %v184_v38  ;;  %v199_v48 = vadd.f32 %v195_v41, %v185_v39  ;;  %v200_v49 = vadd.f32 %v195_v41, %v186_v40 }
 0x11b   :  { %v201_v10 = vadd.f32 %v195_v41, %v187_v42  ;;  %v202_v50 = vadd.f32 %v195_v41, %v188_v43  ;;  %v203_v11 = vadd.f32 %v195_v41, %v189_v44  ;;  %v204_v51 = vadd.f32 %v195_v41, %v190_v45 }
 0x11c   :  { %v205_v12 = vmax.f32 %v197_v46, 0.0  ;;  %v206_v52 = vmax.f32 %v198_v47, 0.0  ;;  %v207_v13 = vmax.f32 %v199_v48, 0.0  ;;  %v208_v53 = vmax.f32 %v200_v49, 0.0 }
 0x11d   :  { %v209_v54 = vmax.f32 %v201_v10, 0.0  ;;  %v210_v21 = vmax.f32 %v202_v50, 0.0  ;;  %v211_v55 = vmax.f32 %v203_v11, 0.0  ;;  %v212_v25 = vmax.f32 %v204_v51, 0.0 }
 0x11e   :  { %v276_v56 = vpack.c.bf16 %v206_v52, %v205_v12  ;;  %v281_v32 = vpack.c.bf16 %v208_v53, %v207_v13 }
 0x11f   :  { %v286_v57 = vpack.c.bf16 %v210_v21, %v209_v54  ;;  %v291_v36 = vpack.c.bf16 %v212_v25, %v211_v55 }
 0x120   :  { %277 = vst [vmem:[%s557_s4] sm:$0xff] %v276_v56   ;;  %293 = vst [vmem:[%s557_s4 + $0x8] sm:$0xff] %v281_v32  }
 0x121   :  { %294 = vst [vmem:[%s557_s4 + $0x10] sm:$0xff] %v286_v57   ;;  %295 = vst [vmem:[%s557_s4 + $0x18] sm:$0xff] %v291_v36  }

// kernel: _lambda_.16
= control target key start
LH: loop header
LB: loop body
LE: loop exit
PB: predicated region body
PF: predicated region fallthrough
CT: control target
= control target key end

     0   :  { %vm244_vm0 = vcmask 130048   ;;  %s1235_s1 = inlined_call_operand.vmem [shape: bf16[16,128], index: 1, kind: input, shape index: {}]   ;;  %s1236_s0 = inlined_call_operand.vmem [shape: bf16[512,16], index: 0, kind: input, shape index: {}]   ;;  %s1237_s2 = inlined_call_operand.vmem [shape: f32[512,128], index: 2, kind: output, shape index: {}]  }
   0x1   :  { %v864_v0 = vld [vmem:[%s1235_s1] sm:$0xff]   ;;  %v867_v3 = vld [vmem:[%s1236_s0 + $0x8] sm:$0xff]   ;;  %v869_v5 = vld [vmem:[%s1236_s0 + $0x10] sm:$0xff]  }
   0x2   :  { %v865_v1 = vld [vmem:[%s1236_s0] sm:$0xff]   ;;  %796 = vmatprep.subr.bf16.mxu0 %v864_v0  ;;  %862 = vmatprep.subr.bf16.mxu1 %v864_v0  ;;  %v868_v4 = vld [vmem:[%s1236_s0 + $0x88] sm:$0xff]   ;;  %v870_v6 = vld [vmem:[%s1236_s0 + $0x90] sm:$0xff]  }
   0x3   :  { %v866_v2 = vld [vmem:[%s1236_s0 + $0x80] sm:$0xff]   ;;  %797 = vmatpush3.bf16.msra.mxu0 %v864_v0  ;;  %863 = vmatpush3.bf16.msra.mxu1 %v864_v0  ;;  %v871_v7 = vld [vmem:[%s1236_s0 + $0x18] sm:$0xff]   ;;  %v875_v11 = vld [vmem:[%s1236_s0 + $0x28] sm:$0xff]  }
   0x4   :  { %798 = vmatprep.mubr.msk.bf16.mxu0 %vm244_vm0, %v865_v1  ;;  %830 = vmatprep.mubr.msk.bf16.mxu1 %vm244_vm0, %v866_v2  ;;  %v872_v8 = vld [vmem:[%s1236_s0 + $0x98] sm:$0xff]   ;;  %v873_v9 = vld [vmem:[%s1236_s0 + $0x20] sm:$0xff]   ;;  %v876_v12 = vld [vmem:[%s1236_s0 + $0xa8] sm:$0xff]  }
   0x5   :  { %v874_v10 = vld [vmem:[%s1236_s0 + $0xa0] sm:$0xff]   ;;  %v877_v13 = vld [vmem:[%s1236_s0 + $0x30] sm:$0xff]   ;;  %v879_v15 = vld [vmem:[%s1236_s0 + $0x38] sm:$0xff]  }
   0x6   :  { %799 = vmatmul.mubr.msk.bf16.vlgmr.msra.gmra.mrb[0].mxu0 %vm244_vm0, %v867_v3  ;;  %831 = vmatmul.mubr.msk.bf16.vlgmr.msra.gmra.mrb[0].mxu1 %vm244_vm0, %v868_v4  ;;  %v878_v14 = vld [vmem:[%s1236_s0 + $0xb0] sm:$0xff]   ;;  %v880_v16 = vld [vmem:[%s1236_s0 + $0xb8] sm:$0xff]   ;;  %v881_v17 = vld [vmem:[%s1236_s0 + $0x40] sm:$0xff]  }
   0x7   :  { %802 = vmatprep.mubr.msk.bf16.mxu0 %vm244_vm0, %v869_v5  ;;  %834 = vmatprep.mubr.msk.bf16.mxu1 %vm244_vm0, %v870_v6  ;;  %v882_v18 = vld [vmem:[%s1236_s0 + $0xc0] sm:$0xff]   ;;  %v883_v19 = vld [vmem:[%s1236_s0 + $0x48] sm:$0xff]   ;;  %v885_v21 = vld [vmem:[%s1236_s0 + $0x50] sm:$0xff]  }
   0x8   :  { %v884_v20 = vld [vmem:[%s1236_s0 + $0xc8] sm:$0xff]   ;;  %v886_v22 = vld [vmem:[%s1236_s0 + $0xd0] sm:$0xff]   ;;  %v887_v23 = vld [vmem:[%s1236_s0 + $0x58] sm:$0xff]  }
   0x9   :  { %v888_v24 = vld [vmem:[%s1236_s0 + $0xd8] sm:$0xff]   ;;  %v889_v25 = vld [vmem:[%s1236_s0 + $0x60] sm:$0xff]   ;;  %v891_v27 = vld [vmem:[%s1236_s0 + $0x68] sm:$0xff]  }
   0xa   :  { %v890_v26 = vld [vmem:[%s1236_s0 + $0xe0] sm:$0xff]   ;;  %v892_v28 = vld [vmem:[%s1236_s0 + $0xe8] sm:$0xff]   ;;  %v893_v29 = vld [vmem:[%s1236_s0 + $0x70] sm:$0xff]  }
   0xb   :  { %v894_v30 = vld [vmem:[%s1236_s0 + $0xf0] sm:$0xff]   ;;  %v895_v31 = vld [vmem:[%s1236_s0 + $0x78] sm:$0xff]  }
   0xc   :  { %v896_v32 = vld [vmem:[%s1236_s0 + $0xf8] sm:$0xff]  }
   0xe   :  { %803 = vmatmul.mubr.msk.bf16.gmra.mrb[4].mxu0 %vm244_vm0, %v871_v7  ;;  %835 = vmatmul.mubr.msk.bf16.gmra.mrb[4].mxu1 %vm244_vm0, %v872_v8 }
   0xf   :  { %806 = vmatprep.mubr.msk.bf16.mxu0 %vm244_vm0, %v873_v9  ;;  %838 = vmatprep.mubr.msk.bf16.mxu1 %vm244_vm0, %v874_v10 }
  0x16   :  { %807 = vmatmul.mubr.msk.bf16.gmra.mrb[8].mxu0 %vm244_vm0, %v875_v11  ;;  %839 = vmatmul.mubr.msk.bf16.gmra.mrb[8].mxu1 %vm244_vm0, %v876_v12 }
  0x17   :  { %810 = vmatprep.mubr.msk.bf16.mxu0 %vm244_vm0, %v877_v13  ;;  %842 = vmatprep.mubr.msk.bf16.mxu1 %vm244_vm0, %v878_v14 }
  0x1e   :  { %811 = vmatmul.mubr.msk.bf16.gmra.mrb[12].mxu0 %vm244_vm0, %v879_v15  ;;  %843 = vmatmul.mubr.msk.bf16.gmra.mrb[12].mxu1 %vm244_vm0, %v880_v16 }
  0x1f   :  { %814 = vmatprep.mubr.msk.bf16.mxu0 %vm244_vm0, %v881_v17  ;;  %846 = vmatprep.mubr.msk.bf16.mxu1 %vm244_vm0, %v882_v18 }
  0x26   :  { %815 = vmatmul.mubr.msk.bf16.gmra.mrb[16].mxu0 %vm244_vm0, %v883_v19  ;;  %847 = vmatmul.mubr.msk.bf16.gmra.mrb[16].mxu1 %vm244_vm0, %v884_v20 }
  0x27   :  { %818 = vmatprep.mubr.msk.bf16.mxu0 %vm244_vm0, %v885_v21  ;;  %850 = vmatprep.mubr.msk.bf16.mxu1 %vm244_vm0, %v886_v22 }
  0x2e   :  { %819 = vmatmul.mubr.msk.bf16.gmra.mrb[20].mxu0 %vm244_vm0, %v887_v23  ;;  %851 = vmatmul.mubr.msk.bf16.gmra.mrb[20].mxu1 %vm244_vm0, %v888_v24 }
  0x2f   :  { %822 = vmatprep.mubr.msk.bf16.mxu0 %vm244_vm0, %v889_v25  ;;  %854 = vmatprep.mubr.msk.bf16.mxu1 %vm244_vm0, %v890_v26 }
  0x36   :  { %823 = vmatmul.mubr.msk.bf16.gmra.mrb[24].mxu0 %vm244_vm0, %v891_v27  ;;  %855 = vmatmul.mubr.msk.bf16.gmra.mrb[24].mxu1 %vm244_vm0, %v892_v28 }
  0x37   :  { %826 = vmatprep.mubr.msk.bf16.mxu0 %vm244_vm0, %v893_v29  ;;  %858 = vmatprep.mubr.msk.bf16.mxu1 %vm244_vm0, %v894_v30 }
  0x3e   :  { %827 = vmatmul.mubr.msk.bf16.gmra.mrb[28].mxu0 %vm244_vm0, %v895_v31  ;;  %859 = vmatmul.mubr.msk.bf16.gmra.mrb[28].mxu1 %vm244_vm0, %v896_v32 }
  0xd9   :  { %v800_v33 = vpop.f32.mrb[0].mxu0  ;;  %v832_v34 = vpop.f32.mrb[0].mxu1 }
  0xda   :  { %632 = vst [vmem:[%s1237_s2 + $0x10] sm:$0xff] %v800_v33  ;;  %664 = vst [vmem:[%s1237_s2 + $0x110] sm:$0xff] %v832_v34  ;;  %v375_v35 = vpop.f32.mrb[1].mxu0  ;;  %v503_v36 = vpop.f32.mrb[1].mxu1 }
  0xdb   :  { %630 = vst [vmem:[%s1237_s2] sm:$0xff] %v375_v35  ;;  %662 = vst [vmem:[%s1237_s2 + $0x100] sm:$0xff] %v503_v36  ;;  %v801_v37 = vpop.f32.mrb[2].mxu0  ;;  %v833_v38 = vpop.f32.mrb[2].mxu1 }
  0xdc   :  { %633 = vst [vmem:[%s1237_s2 + $0x18] sm:$0xff] %v801_v37  ;;  %665 = vst [vmem:[%s1237_s2 + $0x118] sm:$0xff] %v833_v38  ;;  %v378_v39 = vpop.f32.mrb[3].mxu0  ;;  %v506_v40 = vpop.f32.mrb[3].mxu1 }
  0xdd   :  { %631 = vst [vmem:[%s1237_s2 + $0x8] sm:$0xff] %v378_v39  ;;  %663 = vst [vmem:[%s1237_s2 + $0x108] sm:$0xff] %v506_v40 }
  0xe1   :  { %v804_v41 = vpop.f32.mrb[4].mxu0  ;;  %v836_v42 = vpop.f32.mrb[4].mxu1 }
  0xe2   :  { %636 = vst [vmem:[%s1237_s2 + $0x30] sm:$0xff] %v804_v41  ;;  %668 = vst [vmem:[%s1237_s2 + $0x130] sm:$0xff] %v836_v42  ;;  %v391_v43 = vpop.f32.mrb[5].mxu0  ;;  %v519_v44 = vpop.f32.mrb[5].mxu1 }
  0xe3   :  { %634 = vst [vmem:[%s1237_s2 + $0x20] sm:$0xff] %v391_v43  ;;  %666 = vst [vmem:[%s1237_s2 + $0x120] sm:$0xff] %v519_v44  ;;  %v805_v45 = vpop.f32.mrb[6].mxu0  ;;  %v837_v46 = vpop.f32.mrb[6].mxu1 }
  0xe4   :  { %637 = vst [vmem:[%s1237_s2 + $0x38] sm:$0xff] %v805_v45  ;;  %669 = vst [vmem:[%s1237_s2 + $0x138] sm:$0xff] %v837_v46  ;;  %v394_v47 = vpop.f32.mrb[7].mxu0  ;;  %v522_v48 = vpop.f32.mrb[7].mxu1 }
  0xe5   :  { %635 = vst [vmem:[%s1237_s2 + $0x28] sm:$0xff] %v394_v47  ;;  %667 = vst [vmem:[%s1237_s2 + $0x128] sm:$0xff] %v522_v48 }
  0xe9   :  { %v808_v49 = vpop.f32.mrb[8].mxu0  ;;  %v840_v50 = vpop.f32.mrb[8].mxu1 }
  0xea   :  { %640 = vst [vmem:[%s1237_s2 + $0x50] sm:$0xff] %v808_v49  ;;  %672 = vst [vmem:[%s1237_s2 + $0x150] sm:$0xff] %v840_v50  ;;  %v407_v51 = vpop.f32.mrb[9].mxu0  ;;  %v535_v52 = vpop.f32.mrb[9].mxu1 }
  0xeb   :  { %638 = vst [vmem:[%s1237_s2 + $0x40] sm:$0xff] %v407_v51  ;;  %670 = vst [vmem:[%s1237_s2 + $0x140] sm:$0xff] %v535_v52  ;;  %v809_v53 = vpop.f32.mrb[10].mxu0  ;;  %v841_v54 = vpop.f32.mrb[10].mxu1 }
  0xec   :  { %641 = vst [vmem:[%s1237_s2 + $0x58] sm:$0xff] %v809_v53  ;;  %673 = vst [vmem:[%s1237_s2 + $0x158] sm:$0xff] %v841_v54  ;;  %v410_v55 = vpop.f32.mrb[11].mxu0  ;;  %v538_v56 = vpop.f32.mrb[11].mxu1 }
  0xed   :  { %639 = vst [vmem:[%s1237_s2 + $0x48] sm:$0xff] %v410_v55  ;;  %671 = vst [vmem:[%s1237_s2 + $0x148] sm:$0xff] %v538_v56 }
  0xf1   :  { %v812_v57 = vpop.f32.mrb[12].mxu0  ;;  %v844_v58 = vpop.f32.mrb[12].mxu1 }
  0xf2   :  { %644 = vst [vmem:[%s1237_s2 + $0x70] sm:$0xff] %v812_v57  ;;  %676 = vst [vmem:[%s1237_s2 + $0x170] sm:$0xff] %v844_v58  ;;  %v423_v59 = vpop.f32.mrb[13].mxu0  ;;  %v551_v60 = vpop.f32.mrb[13].mxu1 }
  0xf3   :  { %642 = vst [vmem:[%s1237_s2 + $0x60] sm:$0xff] %v423_v59  ;;  %674 = vst [vmem:[%s1237_s2 + $0x160] sm:$0xff] %v551_v60  ;;  %v813_v61 = vpop.f32.mrb[14].mxu0  ;;  %v845_v62 = vpop.f32.mrb[14].mxu1 }
  0xf4   :  { %645 = vst [vmem:[%s1237_s2 + $0x78] sm:$0xff] %v813_v61  ;;  %677 = vst [vmem:[%s1237_s2 + $0x178] sm:$0xff] %v845_v62  ;;  %v426_v63 = vpop.f32.mrb[15].mxu0  ;;  %v554_v0 = vpop.f32.mrb[15].mxu1 }
  0xf5   :  { %643 = vst [vmem:[%s1237_s2 + $0x68] sm:$0xff] %v426_v63  ;;  %675 = vst [vmem:[%s1237_s2 + $0x168] sm:$0xff] %v554_v0 }
  0xf9   :  { %v816_v1 = vpop.f32.mrb[16].mxu0  ;;  %v848_v2 = vpop.f32.mrb[16].mxu1 }
  0xfa   :  { %648 = vst [vmem:[%s1237_s2 + $0x90] sm:$0xff] %v816_v1  ;;  %680 = vst [vmem:[%s1237_s2 + $0x190] sm:$0xff] %v848_v2  ;;  %v439_v3 = vpop.f32.mrb[17].mxu0  ;;  %v567_v4 = vpop.f32.mrb[17].mxu1 }
  0xfb   :  { %646 = vst [vmem:[%s1237_s2 + $0x80] sm:$0xff] %v439_v3  ;;  %678 = vst [vmem:[%s1237_s2 + $0x180] sm:$0xff] %v567_v4  ;;  %v817_v5 = vpop.f32.mrb[18].mxu0  ;;  %v849_v6 = vpop.f32.mrb[18].mxu1 }
  0xfc   :  { %649 = vst [vmem:[%s1237_s2 + $0x98] sm:$0xff] %v817_v5  ;;  %681 = vst [vmem:[%s1237_s2 + $0x198] sm:$0xff] %v849_v6  ;;  %v442_v7 = vpop.f32.mrb[19].mxu0  ;;  %v570_v8 = vpop.f32.mrb[19].mxu1 }
  0xfd   :  { %647 = vst [vmem:[%s1237_s2 + $0x88] sm:$0xff] %v442_v7  ;;  %679 = vst [vmem:[%s1237_s2 + $0x188] sm:$0xff] %v570_v8 }
 0x101   :  { %v820_v9 = vpop.f32.mrb[20].mxu0  ;;  %v852_v10 = vpop.f32.mrb[20].mxu1 }
 0x102   :  { %652 = vst [vmem:[%s1237_s2 + $0xb0] sm:$0xff] %v820_v9  ;;  %684 = vst [vmem:[%s1237_s2 + $0x1b0] sm:$0xff] %v852_v10  ;;  %v455_v11 = vpop.f32.mrb[21].mxu0  ;;  %v583_v12 = vpop.f32.mrb[21].mxu1 }
 0x103   :  { %650 = vst [vmem:[%s1237_s2 + $0xa0] sm:$0xff] %v455_v11  ;;  %682 = vst [vmem:[%s1237_s2 + $0x1a0] sm:$0xff] %v583_v12  ;;  %v821_v13 = vpop.f32.mrb[22].mxu0  ;;  %v853_v14 = vpop.f32.mrb[22].mxu1 }
 0x104   :  { %653 = vst [vmem:[%s1237_s2 + $0xb8] sm:$0xff] %v821_v13  ;;  %685 = vst [vmem:[%s1237_s2 + $0x1b8] sm:$0xff] %v853_v14  ;;  %v458_v15 = vpop.f32.mrb[23].mxu0  ;;  %v586_v16 = vpop.f32.mrb[23].mxu1 }
 0x105   :  { %651 = vst [vmem:[%s1237_s2 + $0xa8] sm:$0xff] %v458_v15  ;;  %683 = vst [vmem:[%s1237_s2 + $0x1a8] sm:$0xff] %v586_v16 }
 0x109   :  { %v824_v17 = vpop.f32.mrb[24].mxu0  ;;  %v856_v18 = vpop.f32.mrb[24].mxu1 }
 0x10a   :  { %656 = vst [vmem:[%s1237_s2 + $0xd0] sm:$0xff] %v824_v17  ;;  %688 = vst [vmem:[%s1237_s2 + $0x1d0] sm:$0xff] %v856_v18  ;;  %v471_v19 = vpop.f32.mrb[25].mxu0  ;;  %v599_v20 = vpop.f32.mrb[25].mxu1 }
 0x10b   :  { %654 = vst [vmem:[%s1237_s2 + $0xc0] sm:$0xff] %v471_v19  ;;  %686 = vst [vmem:[%s1237_s2 + $0x1c0] sm:$0xff] %v599_v20  ;;  %v825_v21 = vpop.f32.mrb[26].mxu0  ;;  %v857_v22 = vpop.f32.mrb[26].mxu1 }
 0x10c   :  { %657 = vst [vmem:[%s1237_s2 + $0xd8] sm:$0xff] %v825_v21  ;;  %689 = vst [vmem:[%s1237_s2 + $0x1d8] sm:$0xff] %v857_v22  ;;  %v474_v23 = vpop.f32.mrb[27].mxu0  ;;  %v602_v24 = vpop.f32.mrb[27].mxu1 }
 0x10d   :  { %655 = vst [vmem:[%s1237_s2 + $0xc8] sm:$0xff] %v474_v23  ;;  %687 = vst [vmem:[%s1237_s2 + $0x1c8] sm:$0xff] %v602_v24 }
 0x111   :  { %v828_v25 = vpop.f32.mrb[28].mxu0  ;;  %v860_v26 = vpop.f32.mrb[28].mxu1 }
 0x112   :  { %660 = vst [vmem:[%s1237_s2 + $0xf0] sm:$0xff] %v828_v25  ;;  %692 = vst [vmem:[%s1237_s2 + $0x1f0] sm:$0xff] %v860_v26  ;;  %v487_v27 = vpop.f32.mrb[29].mxu0  ;;  %v615_v28 = vpop.f32.mrb[29].mxu1 }
 0x113   :  { %658 = vst [vmem:[%s1237_s2 + $0xe0] sm:$0xff] %v487_v27  ;;  %690 = vst [vmem:[%s1237_s2 + $0x1e0] sm:$0xff] %v615_v28  ;;  %v829_v29 = vpop.f32.mrb[30].mxu0  ;;  %v861_v30 = vpop.f32.mrb[30].mxu1 }
 0x114   :  { %661 = vst [vmem:[%s1237_s2 + $0xf8] sm:$0xff] %v829_v29  ;;  %693 = vst [vmem:[%s1237_s2 + $0x1f8] sm:$0xff] %v861_v30  ;;  %v490_v31 = vpop.f32.mrb[31].mxu0  ;;  %v618_v32 = vpop.f32.mrb[31].mxu1 }
 0x115   :  { %659 = vst [vmem:[%s1237_s2 + $0xe8] sm:$0xff] %v490_v31  ;;  %691 = vst [vmem:[%s1237_s2 + $0x1e8] sm:$0xff] %v618_v32 }

// kernel: _lambda_.17
= control target key start
LH: loop header
LB: loop body
LE: loop exit
PB: predicated region body
PF: predicated region fallthrough
CT: control target
= control target key end

     0   :  { %v514_v0 = vmov 0.0|0.0   ;;  %vm515_vm0 = vmmov 0   ;;  %v516_v4 = vmov 0.0   ;;  %vm91_vm1 = vcmask 1040384   ;;  %s773_s3 = inlined_call_operand.vmem [shape: f32[128,128], index: 3, kind: input, shape index: {}]   ;;  %s774_s0 = inlined_call_operand.vmem [shape: f32[128,128], index: 0, kind: input, shape index: {}]   ;;  %s775_s1 = inlined_call_operand.vmem [shape: f32[1,128], index: 1, kind: input, shape index: {}]   ;;  %s776_s2 = inlined_call_operand.vmem [shape: f32[1,128], index: 2, kind: input, shape index: {}]   ;;  %s777_s4 = inlined_call_operand.vmem [shape: bf16[128,128], index: 4, kind: output, shape index: {}]  }
   0x1   :  { %484 = vmatprep.subr.bf16.mxu0 %v514_v0  ;;  %v93_v1 = vld [vmem:[%s773_s3] sm:$0xff]  ;;  %v94_v2 = vld [vmem:[%s773_s3 + $0x8] sm:$0xff]  ;;  %v95_v3 = vld [vmem:[%s773_s3 + $0x10] sm:$0xff]  ;;  %481 = vmatprep.mubr.msk.f32.mxu0 %vm515_vm0, %v516_v4 }
   0x2   :  { %v485_v5 = vpack.c.bf16 %v94_v2, %v93_v1  ;;  %v96_v6 = vld [vmem:[%s773_s3 + $0x18] sm:$0xff]  ;;  %v97_v8 = vld [vmem:[%s773_s3 + $0x20] sm:$0xff]  ;;  %v98_v9 = vld [vmem:[%s773_s3 + $0x28] sm:$0xff] }
   0x3   :  { %v488_v7 = vpack.c.bf16 %v96_v6, %v95_v3  ;;  %v566_v10 = vld [vmem:[%s774_s0] sm:$0xff]  ;;  %v571_v11 = vld [vmem:[%s774_s0 + $0x8] sm:$0xff]  ;;  %v576_v12 = vld [vmem:[%s774_s0 + $0x10] sm:$0xff]  ;;  %v491_v17 = vpack.c.bf16 %v98_v9, %v97_v8 }
   0x4   :  { %486 = vmatpush3.bf16.msra.mxu0 %v485_v5  ;;  %v581_v13 = vld [vmem:[%s774_s0 + $0x18] sm:$0xff]  ;;  %v33_v14 = vadd.f32 %v571_v11, %v566_v10  ;;  %v54_v15 = vmul.f32 %v566_v10, %v566_v10  ;;  %v55_v16 = vmul.f32 %v571_v11, %v571_v11  ;;  %v56_v18 = vmul.f32 %v576_v12, %v576_v12  ;;  %v99_v19 = vld [vmem:[%s773_s3 + $0x30] sm:$0xff]  ;;  %v601_v21 = vld [vmem:[%s774_s0 + $0x20] sm:$0xff] }
   0x5   :  { %487 = vmatprep.subr.bf16.mxu0 %v514_v0  ;;  %v100_v20 = vld [vmem:[%s773_s3 + $0x38] sm:$0xff]  ;;  %v57_v23 = vmul.f32 %v581_v13, %v581_v13  ;;  %v609_v25 = vld [vmem:[%s774_s0 + $0x28] sm:$0xff]  ;;  %v58_v28 = vmul.f32 %v601_v21, %v601_v21  ;;  %v101_v30 = vld [vmem:[%s773_s3 + $0x40] sm:$0xff] }
   0x6   :  { %v34_v22 = vadd.f32 %v33_v14, %v576_v12  ;;  %v70_v24 = vadd.f32 %v55_v16, %v54_v15  ;;  %v494_v27 = vpack.c.bf16 %v100_v20, %v99_v19  ;;  %v102_v31 = vld [vmem:[%s773_s3 + $0x48] sm:$0xff]  ;;  %v624_v32 = vld [vmem:[%s774_s0 + $0x30] sm:$0xff]  ;;  %v59_v34 = vmul.f32 %v609_v25, %v609_v25  ;;  %v632_v36 = vld [vmem:[%s774_s0 + $0x38] sm:$0xff] }
   0x7   :  { %v497_v38 = vpack.c.bf16 %v102_v31, %v101_v30  ;;  %v60_v39 = vmul.f32 %v624_v32, %v624_v32  ;;  %v103_v41 = vld [vmem:[%s773_s3 + $0x50] sm:$0xff]  ;;  %v104_v42 = vld [vmem:[%s773_s3 + $0x58] sm:$0xff]  ;;  %v647_v43 = vld [vmem:[%s774_s0 + $0x40] sm:$0xff]  ;;  %v61_v45 = vmul.f32 %v632_v36, %v632_v36 }
   0x8   :  { %489 = vmatpush3.bf16.msra.mxu0 %v488_v7  ;;  %v35_v26 = vadd.f32 %v34_v22, %v581_v13  ;;  %v71_v29 = vadd.f32 %v70_v24, %v56_v18  ;;  %v655_v47 = vld [vmem:[%s774_s0 + $0x48] sm:$0xff]  ;;  %v500_v49 = vpack.c.bf16 %v104_v42, %v103_v41  ;;  %v62_v50 = vmul.f32 %v647_v43, %v647_v43  ;;  %v105_v52 = vld [vmem:[%s773_s3 + $0x60] sm:$0xff]  ;;  %v670_v54 = vld [vmem:[%s774_s0 + $0x50] sm:$0xff] }
   0x9   :  { %490 = vmatprep.subr.bf16.mxu0 %v514_v0  ;;  %v106_v53 = vld [vmem:[%s773_s3 + $0x68] sm:$0xff]  ;;  %v63_v56 = vmul.f32 %v655_v47, %v655_v47  ;;  %v678_v58 = vld [vmem:[%s774_s0 + $0x58] sm:$0xff]  ;;  %v64_v61 = vmul.f32 %v670_v54, %v670_v54  ;;  %v107_v63 = vld [vmem:[%s773_s3 + $0x70] sm:$0xff] }
   0xa   :  { %v36_v33 = vadd.f32 %v35_v26, %v601_v21  ;;  %v72_v35 = vadd.f32 %v71_v29, %v57_v23  ;;  %v503_v60 = vpack.c.bf16 %v106_v53, %v105_v52  ;;  %v108_v1 = vld [vmem:[%s773_s3 + $0x78] sm:$0xff]  ;;  %v693_v2 = vld [vmem:[%s774_s0 + $0x60] sm:$0xff]  ;;  %v65_v4 = vmul.f32 %v678_v58, %v678_v58  ;;  %v701_v6 = vld [vmem:[%s774_s0 + $0x68] sm:$0xff] }
   0xb   :  { %v506_v8 = vpack.c.bf16 %v108_v1, %v107_v63  ;;  %v66_v9 = vmul.f32 %v693_v2, %v693_v2  ;;  %v710_v15 = vld [vmem:[%s774_s0 + $0x70] sm:$0xff]  ;;  %v718_v19 = vld [vmem:[%s774_s0 + $0x78] sm:$0xff] }
   0xc   :  { %492 = vmatpush3.bf16.msra.mxu0 %v491_v17  ;;  %v37_v37 = vadd.f32 %v36_v33, %v609_v25  ;;  %v73_v40 = vadd.f32 %v72_v35, %v58_v28  ;;  %v67_v17 = vmul.f32 %v701_v6, %v701_v6  ;;  %v69_v24 = vmul.f32 %v718_v19, %v718_v19 }
   0xd   :  { %493 = vmatprep.subr.bf16.mxu0 %v514_v0 }
   0xe   :  { %v38_v44 = vadd.f32 %v37_v37, %v624_v32  ;;  %v74_v46 = vadd.f32 %v73_v40, %v59_v34 }
  0x10   :  { %495 = vmatpush3.bf16.msra.mxu0 %v494_v27  ;;  %v39_v48 = vadd.f32 %v38_v44, %v632_v36  ;;  %v75_v51 = vadd.f32 %v74_v46, %v60_v39 }
  0x11   :  { %496 = vmatprep.subr.bf16.mxu0 %v514_v0 }
  0x12   :  { %v40_v55 = vadd.f32 %v39_v48, %v647_v43  ;;  %v76_v57 = vadd.f32 %v75_v51, %v61_v45 }
  0x14   :  { %498 = vmatpush3.bf16.msra.mxu0 %v497_v38  ;;  %v41_v59 = vadd.f32 %v40_v55, %v655_v47  ;;  %v77_v62 = vadd.f32 %v76_v57, %v62_v50  ;;  %v517_v55 = vmov 1966171168   ;;  %v192_v57 = vlaneseq }
  0x15   :  { %499 = vmatprep.subr.bf16.mxu0 %v514_v0 }
  0x16   :  { %v42_v3 = vadd.f32 %v41_v59, %v670_v54  ;;  %v78_v5 = vadd.f32 %v77_v62, %v63_v56  ;;  %v190_v56 = vunpack.c.l.s4 %v517_v55 }
  0x18   :  { %501 = vmatpush3.bf16.msra.mxu0 %v500_v49  ;;  %v43_v7 = vadd.f32 %v42_v3, %v678_v58  ;;  %v79_v14 = vadd.f32 %v78_v5, %v64_v61  ;;  %v191_v59 = vunpack.c.0.s8 %v190_v56  ;;  %v185_v3 = vld [vmem:[%s775_s1] sm:$0x1] }
  0x19   :  { %502 = vmatprep.subr.bf16.mxu0 %v514_v0 }
  0x1a   :  { %v44_v16 = vadd.f32 %v43_v7, %v693_v2  ;;  %v80_v18 = vadd.f32 %v79_v14, %v65_v4 }
  0x1c   :  { %504 = vmatpush3.bf16.msra.mxu0 %v503_v60  ;;  %v45_v20 = vadd.f32 %v44_v16, %v701_v6  ;;  %v81_v22 = vadd.f32 %v80_v18, %v66_v9  ;;  %v193_v60 = vshrl.u32 %v192_v57, 7 }
  0x1d   :  { %505 = vmatprep.subr.bf16.mxu0 %v514_v0  ;;  %v68_v0 = vmul.f32 %v710_v15, %v710_v15 }
  0x1e   :  { %v46_v23 = vadd.f32 %v45_v20, %v710_v15  ;;  %v82_v26 = vadd.f32 %v81_v22, %v67_v17  ;;  %v194_v61 = vsub.s32 %v191_v59, %v193_v60  ;;  %v212_v5 = vsub.s32 0, %v193_v60 }
  0x20   :  { %507 = vmatpush3.bf16.msra.mxu0 %v506_v8  ;;  %v47_v27 = vadd.f32 %v46_v23, %v718_v19  ;;  %v83_v28 = vadd.f32 %v82_v26, %v68_v0  ;;  %v206_v8 = vld [vmem:[%s776_s2] sm:$0x1] }
  0x22   :  { %v48_v29 = vrot.slane %v47_v27, 4  ;;  %v84_v30 = vadd.f32 %v83_v28, %v69_v24 }
  0x24   :  { %v49_v31 = vadd.f32 %v48_v29, %v47_v27  ;;  %v85_v33 = vrot.slane %v84_v30, 4 }
  0x26   :  { %v50_v34 = vrot.slane %v49_v31, 2  ;;  %v86_v35 = vadd.f32 %v85_v33, %v84_v30 }
  0x28   :  { %v51_v37 = vadd.f32 %v50_v34, %v49_v31  ;;  %v87_v38 = vrot.slane %v86_v35, 2 }
  0x2a   :  { %v52_v39 = vrot.slane %v51_v37, 1  ;;  %v88_v40 = vadd.f32 %v87_v38, %v86_v35 }
  0x2c   :  { %v53_v41 = vadd.f32 %v52_v39, %v51_v37  ;;  %v89_v42 = vrot.slane %v88_v40, 1 }
  0x2e   :  { %v90_v44 = vadd.f32 %v89_v42, %v88_v40 }
  0x30   :  { %v92_v45 = vsel %vm91_vm1, %v53_v41, %v90_v44 }
  0x31   :  { %482 = vmatmul.mubr.f32.vlgmr.msra.gmra.mrb[0].mxu0 %v92_v45 }
 0x104   :  { %v175_v46 = vpop.f32.mrb[0].mxu0 }
 0x105   :  { %v179_v48 = vmul.f32 0.00048828125, %v175_v46  ;;  %v483_v49 = vpop.f32.mrb[1].mxu0 }
 0x107   :  { %v180_v50 = vmul.f32 %v179_v48, %v179_v48 }
 0x109   :  { %v182_v51 = vrot.slane %v180_v50, 7 }
 0x10b   :  { %v184_v52 = vsub.f32 %v179_v48, %v182_v51 }
 0x10d   :  { %v186_v53 = vadd.f32 1e-05, %v184_v52 }
 0x10f   :  { %512 = vrsqrt.f32 %v186_v53 }
 0x119   :  { %v513_v62 = vpop.eup %512 }
 0x11a   :  { %v195_v63 = vrot.slane %v513_v62, %v194_v61 }
 0x11c   :  { %v196_v1 = vcombine.high %v195_v63, %v195_v63 }
 0x11e   :  { %v203_v4 = vrot.slane %v196_v1, %v194_v61 }
 0x120   :  { %v205_v7 = vmul.f32 %v203_v4, %v185_v3 }
 0x122   :  { %v207_v9 = vmul.f32 %v205_v7, %v179_v48  ;;  %v213_v14 = vrot.slane %v205_v7, %v212_v5 }
 0x124   :  { %v208_v16 = vsub.f32 %v206_v8, %v207_v9  ;;  %v215_v17 = vmul.f32 %v213_v14, %v566_v10  ;;  %v216_v18 = vmul.f32 %v213_v14, %v571_v11  ;;  %v217_v20 = vmul.f32 %v213_v14, %v576_v12 }
 0x125   :  { %v218_v0 = vmul.f32 %v213_v14, %v581_v13  ;;  %v219_v22 = vmul.f32 %v213_v14, %v601_v21  ;;  %v220_v23 = vmul.f32 %v213_v14, %v609_v25  ;;  %v221_v24 = vmul.f32 %v213_v14, %v624_v32 }
 0x126   :  { %v222_v26 = vmul.f32 %v213_v14, %v632_v36  ;;  %v223_v27 = vmul.f32 %v213_v14, %v647_v43  ;;  %v224_v28 = vmul.f32 %v213_v14, %v655_v47  ;;  %v225_v10 = vmul.f32 %v213_v14, %v670_v54 }
 0x127   :  { %v226_v11 = vmul.f32 %v213_v14, %v678_v58  ;;  %v235_v29 = vrot.slane %v208_v16, %v212_v5  ;;  %v227_v12 = vmul.f32 %v213_v14, %v693_v2  ;;  %v228_v13 = vmul.f32 %v213_v14, %v701_v6 }
 0x128   :  { %v229_v21 = vmul.f32 %v213_v14, %v710_v15  ;;  %v230_v25 = vmul.f32 %v213_v14, %v718_v19 }
 0x129   :  { %v237_v32 = vadd.f32 %v235_v29, %v215_v17  ;;  %v238_v30 = vadd.f32 %v235_v29, %v216_v18  ;;  %v239_v36 = vadd.f32 %v235_v29, %v217_v20  ;;  %v240_v31 = vadd.f32 %v235_v29, %v218_v0 }
 0x12a   :  { %v241_v43 = vadd.f32 %v235_v29, %v219_v22  ;;  %v242_v33 = vadd.f32 %v235_v29, %v220_v23  ;;  %v243_v47 = vadd.f32 %v235_v29, %v221_v24  ;;  %v244_v34 = vadd.f32 %v235_v29, %v222_v26 }
 0x12b   :  { %v245_v54 = vadd.f32 %v235_v29, %v223_v27  ;;  %v246_v35 = vadd.f32 %v235_v29, %v224_v28  ;;  %v247_v58 = vadd.f32 %v235_v29, %v225_v10  ;;  %v248_v37 = vadd.f32 %v235_v29, %v226_v11 }
 0x12c   :  { %v249_v38 = vadd.f32 %v235_v29, %v227_v12  ;;  %v250_v2 = vadd.f32 %v235_v29, %v228_v13  ;;  %v251_v39 = vadd.f32 %v235_v29, %v229_v21  ;;  %v252_v6 = vadd.f32 %v235_v29, %v230_v25 }
 0x12d   :  { %v253_v40 = vmax.f32 %v237_v32, 0.0  ;;  %v254_v15 = vmax.f32 %v238_v30, 0.0  ;;  %v255_v41 = vmax.f32 %v239_v36, 0.0  ;;  %v256_v19 = vmax.f32 %v240_v31, 0.0 }
 0x12e   :  { %v257_v42 = vmax.f32 %v241_v43, 0.0  ;;  %v258_v44 = vmax.f32 %v242_v33, 0.0  ;;  %v259_v45 = vmax.f32 %v243_v47, 0.0  ;;  %v260_v46 = vmax.f32 %v244_v34, 0.0 }
 0x12f   :  { %v261_v48 = vmax.f32 %v245_v54, 0.0  ;;  %v262_v49 = vmax.f32 %v246_v35, 0.0  ;;  %v263_v50 = vmax.f32 %v247_v58, 0.0  ;;  %v264_v51 = vmax.f32 %v248_v37, 0.0 }
 0x130   :  { %v265_v52 = vmax.f32 %v249_v38, 0.0  ;;  %v266_v53 = vmax.f32 %v250_v2, 0.0  ;;  %v267_v55 = vmax.f32 %v251_v39, 0.0  ;;  %v268_v56 = vmax.f32 %v252_v6, 0.0 }
 0x131   :  { %v388_v57 = vpack.c.bf16 %v254_v15, %v253_v40  ;;  %v393_v59 = vpack.c.bf16 %v256_v19, %v255_v41  ;;  %v398_v60 = vpack.c.bf16 %v258_v44, %v257_v42  ;;  %v403_v61 = vpack.c.bf16 %v260_v46, %v259_v45 }
 0x132   :  { %v408_v62 = vpack.c.bf16 %v262_v49, %v261_v48  ;;  %v413_v63 = vpack.c.bf16 %v264_v51, %v263_v50  ;;  %v418_v1 = vpack.c.bf16 %v266_v53, %v265_v52  ;;  %v423_v3 = vpack.c.bf16 %v268_v56, %v267_v55 }
 0x133   :  { %389 = vst [vmem:[%s777_s4] sm:$0xff] %v388_v57   ;;  %425 = vst [vmem:[%s777_s4 + $0x8] sm:$0xff] %v393_v59  }
 0x134   :  { %426 = vst [vmem:[%s777_s4 + $0x10] sm:$0xff] %v398_v60   ;;  %427 = vst [vmem:[%s777_s4 + $0x18] sm:$0xff] %v403_v61  }
 0x135   :  { %428 = vst [vmem:[%s777_s4 + $0x20] sm:$0xff] %v408_v62   ;;  %429 = vst [vmem:[%s777_s4 + $0x28] sm:$0xff] %v413_v63  }
 0x136   :  { %430 = vst [vmem:[%s777_s4 + $0x30] sm:$0xff] %v418_v1   ;;  %431 = vst [vmem:[%s777_s4 + $0x38] sm:$0xff] %v423_v3  }

// kernel: _lambda_.18
= control target key start
LH: loop header
LB: loop body
LE: loop exit
PB: predicated region body
PF: predicated region fallthrough
CT: control target
= control target key end

     0   :  { %s1957_s9 = smov 0   ;;  %s2369_s0 = inlined_call_operand.vmem [shape: bf16[2048,8], index: 0, kind: input, shape index: {}]   ;;  %s2370_s1 = inlined_call_operand.vmem [shape: bf16[8,16], index: 1, kind: input, shape index: {}]   ;;  %s2371_s2 = inlined_call_operand.vmem [shape: f32[2048,16], index: 2, kind: output, shape index: {}]  }
   0x1 LB: > { %s1524_s10 = sadd.s32 4294967295, %s1940_s9   ;;  %p1528_p0 = scmp.ge.s32.totalorder %s1940_s9, 1  ;;  %s1940_s9 = sphi %s1957_s9, %s12_s9  }
   0x2   : > { %p113_p1 = scmp.lt.s32.totalorder %s1940_s9, 3 }
   0x4   : > { %p114_p2 = pnand %p1528_p0, %p113_p1 }
   0x5   : > { %v276_v0 = vld [vmem:[%s2370_s1] sm:$0xf] (!%p114_p2)  ;;  %vm790_vm0 = vcmask (!%p114_p2), 1043456   ;;  %s1529_s13 = sshll.u32 (!%p114_p2), %s1524_s10, 7  ;;  %vm597_vm1 = vcmask (!%p114_p2), 64512   ;;  %vm1339_vm2 = vcmask (!%p114_p2), 130048  }
   0x6   : > { %117 = sbr.rel (%p114_p2) target bundleno = 355 (0x163), region = 28  ;;  %1860 = vmatprep.subr.msk.bf16.mxu0 (!%p114_p2), %vm790_vm0, %v276_v0  ;;  %1861 = vmatprep.subr.msk.bf16.mxu1 (!%p114_p2), %vm790_vm0, %v276_v0  ;;  %v792_v1 = vsel (!%p114_p2), %vm790_vm0, %v276_v0, 0  ;;  %p136_p3 = scmp.lt.s32.totalorder (!%p114_p2), %s1529_s13, 255 }
   0x7   : > { %1729 = vmatpush3.bf16.msra.mxu0 (!%p114_p2), %v792_v1  ;;  %1859 = vmatpush3.bf16.msra.mxu1 (!%p114_p2), %v792_v1 }
   0xd   : > { %s2373_s13 = smov (!%p136_p3, %s1529_s13), 255 }
   0xe   : > { %s1530_s14 = sshll.u32 %s2373_s13, 2  ;;  %s1532_s18 = sshll.u32 %s2373_s13, 3 }
   0xf   : > { %s1974_s17 = scalar_lea.vmem %s2369_s0, %s1530_s14  ;;  %s2108_s21 = scalar_lea.vmem %s2371_s2, %s1532_s18 }
  0x10   : > { %v1870_v2 = vld [vmem:[%s1974_s17] sm:$0xff]   ;;  %v1872_v4 = vld [vmem:[%s1974_s17 + $0x8] sm:$0xff]   ;;  %v1874_v6 = vld [vmem:[%s1974_s17 + $0x10] sm:$0xff]  }
  0x11   : > { %v1871_v3 = vld [vmem:[%s1974_s17 + $0x100] sm:$0xff]   ;;  %1730 = vmatprep.mubr.msk.bf16.mxu0 %vm597_vm1, %v1870_v2  ;;  %v1873_v5 = vld [vmem:[%s1974_s17 + $0x108] sm:$0xff]   ;;  %v1875_v7 = vld [vmem:[%s1974_s17 + $0x110] sm:$0xff]  }
  0x12   : > { %1794 = vmatprep.mubr.msk.bf16.mxu1 %vm597_vm1, %v1871_v3  ;;  %1731 = vmatmul.mubr.msk.bf16.vlgmr.msra.gmra.mrb[0].mxu0 %vm597_vm1, %v1872_v4  ;;  %v1876_v8 = vld [vmem:[%s1974_s17 + $0x18] sm:$0xff]   ;;  %v1878_v10 = vld [vmem:[%s1974_s17 + $0x20] sm:$0xff]   ;;  %v1880_v12 = vld [vmem:[%s1974_s17 + $0x28] sm:$0xff]  }
  0x13   : > { %1795 = vmatmul.mubr.msk.bf16.vlgmr.msra.gmra.mrb[0].mxu1 %vm597_vm1, %v1873_v5  ;;  %1734 = vmatprep.mubr.msk.bf16.mxu0 %vm597_vm1, %v1874_v6  ;;  %v1877_v9 = vld [vmem:[%s1974_s17 + $0x118] sm:$0xff]   ;;  %v1879_v11 = vld [vmem:[%s1974_s17 + $0x120] sm:$0xff]   ;;  %v1881_v13 = vld [vmem:[%s1974_s17 + $0x128] sm:$0xff]  }
  0x14   : > { %1798 = vmatprep.mubr.msk.bf16.mxu1 %vm597_vm1, %v1875_v7  ;;  %v1882_v14 = vld [vmem:[%s1974_s17 + $0x30] sm:$0xff]   ;;  %v1884_v16 = vld [vmem:[%s1974_s17 + $0x38] sm:$0xff]   ;;  %v1886_v18 = vld [vmem:[%s1974_s17 + $0x40] sm:$0xff]  }
  0x15   : > { %v1883_v15 = vld [vmem:[%s1974_s17 + $0x130] sm:$0xff]   ;;  %v1885_v17 = vld [vmem:[%s1974_s17 + $0x138] sm:$0xff]   ;;  %v1887_v19 = vld [vmem:[%s1974_s17 + $0x140] sm:$0xff]  }
  0x16   : > { %v1888_v20 = vld [vmem:[%s1974_s17 + $0x48] sm:$0xff]   ;;  %v1890_v22 = vld [vmem:[%s1974_s17 + $0x50] sm:$0xff]   ;;  %v1892_v24 = vld [vmem:[%s1974_s17 + $0x58] sm:$0xff]  }
  0x17   : > { %v1889_v21 = vld [vmem:[%s1974_s17 + $0x148] sm:$0xff]   ;;  %v1891_v23 = vld [vmem:[%s1974_s17 + $0x150] sm:$0xff]   ;;  %v1893_v25 = vld [vmem:[%s1974_s17 + $0x158] sm:$0xff]  }
  0x18   : > { %v1894_v26 = vld [vmem:[%s1974_s17 + $0x60] sm:$0xff]   ;;  %v1896_v28 = vld [vmem:[%s1974_s17 + $0x68] sm:$0xff]   ;;  %v1898_v30 = vld [vmem:[%s1974_s17 + $0x70] sm:$0xff]  }
  0x19   : > { %v1895_v27 = vld [vmem:[%s1974_s17 + $0x160] sm:$0xff]   ;;  %v1897_v29 = vld [vmem:[%s1974_s17 + $0x168] sm:$0xff]   ;;  %v1899_v31 = vld [vmem:[%s1974_s17 + $0x170] sm:$0xff]  }
  0x1a   : > { %1735 = vmatmul.mubr.msk.bf16.gmra.mrb[4].mxu0 %vm597_vm1, %v1876_v8  ;;  %v1900_v32 = vld [vmem:[%s1974_s17 + $0x78] sm:$0xff]   ;;  %v1902_v34 = vld [vmem:[%s1974_s17 + $0x80] sm:$0xff]   ;;  %v1904_v36 = vld [vmem:[%s1974_s17 + $0x88] sm:$0xff]  }
  0x1b   : > { %1799 = vmatmul.mubr.msk.bf16.gmra.mrb[4].mxu1 %vm597_vm1, %v1877_v9  ;;  %1738 = vmatprep.mubr.msk.bf16.mxu0 %vm597_vm1, %v1878_v10  ;;  %v1901_v33 = vld [vmem:[%s1974_s17 + $0x178] sm:$0xff]   ;;  %v1903_v35 = vld [vmem:[%s1974_s17 + $0x180] sm:$0xff]   ;;  %v1905_v37 = vld [vmem:[%s1974_s17 + $0x188] sm:$0xff]  }
  0x1c   : > { %1802 = vmatprep.mubr.msk.bf16.mxu1 %vm597_vm1, %v1879_v11  ;;  %v1906_v38 = vld [vmem:[%s1974_s17 + $0x90] sm:$0xff]   ;;  %v1908_v40 = vld [vmem:[%s1974_s17 + $0x98] sm:$0xff]   ;;  %v1910_v42 = vld [vmem:[%s1974_s17 + $0xa0] sm:$0xff]  }
  0x1d   : > { %v1907_v39 = vld [vmem:[%s1974_s17 + $0x190] sm:$0xff]   ;;  %v1909_v41 = vld [vmem:[%s1974_s17 + $0x198] sm:$0xff]   ;;  %v1911_v43 = vld [vmem:[%s1974_s17 + $0x1a0] sm:$0xff]  }
  0x1e   : > { %v1912_v44 = vld [vmem:[%s1974_s17 + $0xa8] sm:$0xff]   ;;  %v1914_v46 = vld [vmem:[%s1974_s17 + $0xb0] sm:$0xff]   ;;  %v1916_v48 = vld [vmem:[%s1974_s17 + $0xb8] sm:$0xff]  }
  0x1f   : > { %v1913_v45 = vld [vmem:[%s1974_s17 + $0x1a8] sm:$0xff]   ;;  %v1915_v47 = vld [vmem:[%s1974_s17 + $0x1b0] sm:$0xff]   ;;  %v1917_v49 = vld [vmem:[%s1974_s17 + $0x1b8] sm:$0xff]  }
  0x20   : > { %v1918_v50 = vld [vmem:[%s1974_s17 + $0xc0] sm:$0xff]   ;;  %v1920_v52 = vld [vmem:[%s1974_s17 + $0xc8] sm:$0xff]   ;;  %v1922_v54 = vld [vmem:[%s1974_s17 + $0xd0] sm:$0xff]  }
  0x21   : > { %v1919_v51 = vld [vmem:[%s1974_s17 + $0x1c0] sm:$0xff]   ;;  %v1921_v53 = vld [vmem:[%s1974_s17 + $0x1c8] sm:$0xff]   ;;  %v1923_v55 = vld [vmem:[%s1974_s17 + $0x1d0] sm:$0xff]  }
  0x22   : > { %1739 = vmatmul.mubr.msk.bf16.gmra.mrb[8].mxu0 %vm597_vm1, %v1880_v12  ;;  %v1924_v56 = vld [vmem:[%s1974_s17 + $0xd8] sm:$0xff]   ;;  %v1926_v58 = vld [vmem:[%s1974_s17 + $0xe0] sm:$0xff]   ;;  %v1928_v60 = vld [vmem:[%s1974_s17 + $0xe8] sm:$0xff]  }
  0x23   : > { %1803 = vmatmul.mubr.msk.bf16.gmra.mrb[8].mxu1 %vm597_vm1, %v1881_v13  ;;  %1742 = vmatprep.mubr.msk.bf16.mxu0 %vm597_vm1, %v1882_v14  ;;  %v1925_v57 = vld [vmem:[%s1974_s17 + $0x1d8] sm:$0xff]   ;;  %v1927_v59 = vld [vmem:[%s1974_s17 + $0x1e0] sm:$0xff]   ;;  %v1929_v61 = vld [vmem:[%s1974_s17 + $0x1e8] sm:$0xff]  }
  0x24   : > { %1806 = vmatprep.mubr.msk.bf16.mxu1 %vm597_vm1, %v1883_v15  ;;  %v1930_v62 = vld [vmem:[%s1974_s17 + $0xf0] sm:$0xff]   ;;  %v1932_v0 = vld [vmem:[%s1974_s17 + $0xf8] sm:$0xff]  }
  0x25   : > { %v1931_v63 = vld [vmem:[%s1974_s17 + $0x1f0] sm:$0xff]   ;;  %v1933_v1 = vld [vmem:[%s1974_s17 + $0x1f8] sm:$0xff]  }
  0x2a   : > { %1743 = vmatmul.mubr.msk.bf16.gmra.mrb[12].mxu0 %vm597_vm1, %v1884_v16 }
  0x2b   : > { %1807 = vmatmul.mubr.msk.bf16.gmra.mrb[12].mxu1 %vm597_vm1, %v1885_v17  ;;  %1746 = vmatprep.mubr.msk.bf16.mxu0 %vm597_vm1, %v1886_v18 }
  0x2c   : > { %1810 = vmatprep.mubr.msk.bf16.mxu1 %vm597_vm1, %v1887_v19 }
  0x32   : > { %1747 = vmatmul.mubr.msk.bf16.gmra.mrb[16].mxu0 %vm597_vm1, %v1888_v20 }
  0x33   : > { %1811 = vmatmul.mubr.msk.bf16.gmra.mrb[16].mxu1 %vm597_vm1, %v1889_v21  ;;  %1750 = vmatprep.mubr.msk.bf16.mxu0 %vm597_vm1, %v1890_v22 }
  0x34   : > { %1814 = vmatprep.mubr.msk.bf16.mxu1 %vm597_vm1, %v1891_v23 }
  0x3a   : > { %1751 = vmatmul.mubr.msk.bf16.gmra.mrb[20].mxu0 %vm597_vm1, %v1892_v24 }
  0x3b   : > { %1815 = vmatmul.mubr.msk.bf16.gmra.mrb[20].mxu1 %vm597_vm1, %v1893_v25  ;;  %1754 = vmatprep.mubr.msk.bf16.mxu0 %vm597_vm1, %v1894_v26 }
  0x3c   : > { %1818 = vmatprep.mubr.msk.bf16.mxu1 %vm597_vm1, %v1895_v27 }
  0x42   : > { %1755 = vmatmul.mubr.msk.bf16.gmra.mrb[24].mxu0 %vm597_vm1, %v1896_v28 }
  0x43   : > { %1819 = vmatmul.mubr.msk.bf16.gmra.mrb[24].mxu1 %vm597_vm1, %v1897_v29  ;;  %1758 = vmatprep.mubr.msk.bf16.mxu0 %vm597_vm1, %v1898_v30 }
  0x44   : > { %1822 = vmatprep.mubr.msk.bf16.mxu1 %vm597_vm1, %v1899_v31 }
  0x4a   : > { %1759 = vmatmul.mubr.msk.bf16.gmra.mrb[28].mxu0 %vm597_vm1, %v1900_v32 }
  0x4b   : > { %1823 = vmatmul.mubr.msk.bf16.gmra.mrb[28].mxu1 %vm597_vm1, %v1901_v33  ;;  %1762 = vmatprep.mubr.msk.bf16.mxu0 %vm597_vm1, %v1902_v34 }
  0x4c   : > { %1826 = vmatprep.mubr.msk.bf16.mxu1 %vm597_vm1, %v1903_v35 }
  0x52   : > { %1763 = vmatmul.mubr.msk.bf16.gmra.mrb[32].mxu0 %vm597_vm1, %v1904_v36 }
  0x53   : > { %1827 = vmatmul.mubr.msk.bf16.gmra.mrb[32].mxu1 %vm597_vm1, %v1905_v37  ;;  %1766 = vmatprep.mubr.msk.bf16.mxu0 %vm597_vm1, %v1906_v38 }
  0x54   : > { %1830 = vmatprep.mubr.msk.bf16.mxu1 %vm597_vm1, %v1907_v39 }
  0x5a   : > { %1767 = vmatmul.mubr.msk.bf16.gmra.mrb[36].mxu0 %vm597_vm1, %v1908_v40 }
  0x5b   : > { %1831 = vmatmul.mubr.msk.bf16.gmra.mrb[36].mxu1 %vm597_vm1, %v1909_v41  ;;  %1770 = vmatprep.mubr.msk.bf16.mxu0 %vm597_vm1, %v1910_v42 }
  0x5c   : > { %1834 = vmatprep.mubr.msk.bf16.mxu1 %vm597_vm1, %v1911_v43 }
  0x62   : > { %1771 = vmatmul.mubr.msk.bf16.gmra.mrb[40].mxu0 %vm597_vm1, %v1912_v44 }
  0x63   : > { %1835 = vmatmul.mubr.msk.bf16.gmra.mrb[40].mxu1 %vm597_vm1, %v1913_v45  ;;  %1774 = vmatprep.mubr.msk.bf16.mxu0 %vm597_vm1, %v1914_v46 }
  0x64   : > { %1838 = vmatprep.mubr.msk.bf16.mxu1 %vm597_vm1, %v1915_v47 }
  0x6a   : > { %1775 = vmatmul.mubr.msk.bf16.gmra.mrb[44].mxu0 %vm597_vm1, %v1916_v48 }
  0x6b   : > { %1839 = vmatmul.mubr.msk.bf16.gmra.mrb[44].mxu1 %vm597_vm1, %v1917_v49  ;;  %1778 = vmatprep.mubr.msk.bf16.mxu0 %vm597_vm1, %v1918_v50 }
  0x6c   : > { %1842 = vmatprep.mubr.msk.bf16.mxu1 %vm597_vm1, %v1919_v51 }
  0x72   : > { %1779 = vmatmul.mubr.msk.bf16.gmra.mrb[48].mxu0 %vm597_vm1, %v1920_v52 }
  0x73   : > { %1843 = vmatmul.mubr.msk.bf16.gmra.mrb[48].mxu1 %vm597_vm1, %v1921_v53  ;;  %1782 = vmatprep.mubr.msk.bf16.mxu0 %vm597_vm1, %v1922_v54 }
  0x74   : > { %1846 = vmatprep.mubr.msk.bf16.mxu1 %vm597_vm1, %v1923_v55 }
  0x7a   : > { %1783 = vmatmul.mubr.msk.bf16.gmra.mrb[52].mxu0 %vm597_vm1, %v1924_v56 }
  0x7b   : > { %1847 = vmatmul.mubr.msk.bf16.gmra.mrb[52].mxu1 %vm597_vm1, %v1925_v57  ;;  %1786 = vmatprep.mubr.msk.bf16.mxu0 %vm597_vm1, %v1926_v58 }
  0x7c   : > { %1850 = vmatprep.mubr.msk.bf16.mxu1 %vm597_vm1, %v1927_v59 }
  0x82   : > { %1787 = vmatmul.mubr.msk.bf16.gmra.mrb[56].mxu0 %vm597_vm1, %v1928_v60 }
  0x83   : > { %1851 = vmatmul.mubr.msk.bf16.gmra.mrb[56].mxu1 %vm597_vm1, %v1929_v61  ;;  %1790 = vmatprep.mubr.msk.bf16.mxu0 %vm597_vm1, %v1930_v62 }
  0x84   : > { %1854 = vmatprep.mubr.msk.bf16.mxu1 %vm597_vm1, %v1931_v63 }
  0x8a   : > { %1791 = vmatmul.mubr.msk.bf16.gmra.mrb[60].mxu0 %vm597_vm1, %v1932_v0 }
  0x8b   : > { %1855 = vmatmul.mubr.msk.bf16.gmra.mrb[60].mxu1 %vm597_vm1, %v1933_v1 }
  0xe5   : > { %v1732_v2 = vpop.f32.mrb[0].mxu0 }
  0xe6   : > { %1342 = vst.msk [vmem:[%s2108_s21 + $0x10] sm:$0xff] %vm1339_vm2, %v1732_v2  ;;  %v1796_v3 = vpop.f32.mrb[0].mxu1  ;;  %v828_v4 = vpop.f32.mrb[1].mxu0 }
  0xe7   : > { %1406 = vst.msk [vmem:[%s2108_s21 + $0x210] sm:$0xff] %vm1339_vm2, %v1796_v3  ;;  %1340 = vst.msk [vmem:[%s2108_s21] sm:$0xff] %vm1339_vm2, %v828_v4  ;;  %v1084_v5 = vpop.f32.mrb[1].mxu1  ;;  %v1733_v6 = vpop.f32.mrb[2].mxu0 }
  0xe8   : > { %1404 = vst.msk [vmem:[%s2108_s21 + $0x200] sm:$0xff] %vm1339_vm2, %v1084_v5  ;;  %1343 = vst.msk [vmem:[%s2108_s21 + $0x18] sm:$0xff] %vm1339_vm2, %v1733_v6  ;;  %v1797_v7 = vpop.f32.mrb[2].mxu1  ;;  %v831_v8 = vpop.f32.mrb[3].mxu0 }
  0xe9   : > { %1407 = vst.msk [vmem:[%s2108_s21 + $0x218] sm:$0xff] %vm1339_vm2, %v1797_v7  ;;  %1341 = vst.msk [vmem:[%s2108_s21 + $0x8] sm:$0xff] %vm1339_vm2, %v831_v8  ;;  %v1087_v9 = vpop.f32.mrb[3].mxu1 }
  0xea   : > { %1405 = vst.msk [vmem:[%s2108_s21 + $0x208] sm:$0xff] %vm1339_vm2, %v1087_v9 }
  0xed   : > { %v1736_v10 = vpop.f32.mrb[4].mxu0 }
  0xee   : > { %1346 = vst.msk [vmem:[%s2108_s21 + $0x30] sm:$0xff] %vm1339_vm2, %v1736_v10  ;;  %v1800_v11 = vpop.f32.mrb[4].mxu1  ;;  %v844_v12 = vpop.f32.mrb[5].mxu0 }
  0xef   : > { %1410 = vst.msk [vmem:[%s2108_s21 + $0x230] sm:$0xff] %vm1339_vm2, %v1800_v11  ;;  %1344 = vst.msk [vmem:[%s2108_s21 + $0x20] sm:$0xff] %vm1339_vm2, %v844_v12  ;;  %v1100_v13 = vpop.f32.mrb[5].mxu1  ;;  %v1737_v14 = vpop.f32.mrb[6].mxu0 }
  0xf0   : > { %1408 = vst.msk [vmem:[%s2108_s21 + $0x220] sm:$0xff] %vm1339_vm2, %v1100_v13  ;;  %1347 = vst.msk [vmem:[%s2108_s21 + $0x38] sm:$0xff] %vm1339_vm2, %v1737_v14  ;;  %v1801_v15 = vpop.f32.mrb[6].mxu1  ;;  %v847_v16 = vpop.f32.mrb[7].mxu0 }
  0xf1   : > { %1411 = vst.msk [vmem:[%s2108_s21 + $0x238] sm:$0xff] %vm1339_vm2, %v1801_v15  ;;  %1345 = vst.msk [vmem:[%s2108_s21 + $0x28] sm:$0xff] %vm1339_vm2, %v847_v16  ;;  %v1103_v17 = vpop.f32.mrb[7].mxu1 }
  0xf2   : > { %1409 = vst.msk [vmem:[%s2108_s21 + $0x228] sm:$0xff] %vm1339_vm2, %v1103_v17 }
  0xf5   : > { %v1740_v18 = vpop.f32.mrb[8].mxu0 }
  0xf6   : > { %1350 = vst.msk [vmem:[%s2108_s21 + $0x50] sm:$0xff] %vm1339_vm2, %v1740_v18  ;;  %v1804_v19 = vpop.f32.mrb[8].mxu1  ;;  %v860_v20 = vpop.f32.mrb[9].mxu0 }
  0xf7   : > { %1414 = vst.msk [vmem:[%s2108_s21 + $0x250] sm:$0xff] %vm1339_vm2, %v1804_v19  ;;  %1348 = vst.msk [vmem:[%s2108_s21 + $0x40] sm:$0xff] %vm1339_vm2, %v860_v20  ;;  %v1116_v21 = vpop.f32.mrb[9].mxu1  ;;  %v1741_v22 = vpop.f32.mrb[10].mxu0 }
  0xf8   : > { %1412 = vst.msk [vmem:[%s2108_s21 + $0x240] sm:$0xff] %vm1339_vm2, %v1116_v21  ;;  %1351 = vst.msk [vmem:[%s2108_s21 + $0x58] sm:$0xff] %vm1339_vm2, %v1741_v22  ;;  %v1805_v23 = vpop.f32.mrb[10].mxu1  ;;  %v863_v24 = vpop.f32.mrb[11].mxu0 }
  0xf9   : > { %1415 = vst.msk [vmem:[%s2108_s21 + $0x258] sm:$0xff] %vm1339_vm2, %v1805_v23  ;;  %1349 = vst.msk [vmem:[%s2108_s21 + $0x48] sm:$0xff] %vm1339_vm2, %v863_v24  ;;  %v1119_v25 = vpop.f32.mrb[11].mxu1 }
  0xfa   : > { %1413 = vst.msk [vmem:[%s2108_s21 + $0x248] sm:$0xff] %vm1339_vm2, %v1119_v25 }
  0xfd   : > { %v1744_v26 = vpop.f32.mrb[12].mxu0 }
  0xfe   : > { %1354 = vst.msk [vmem:[%s2108_s21 + $0x70] sm:$0xff] %vm1339_vm2, %v1744_v26  ;;  %v1808_v27 = vpop.f32.mrb[12].mxu1  ;;  %v876_v28 = vpop.f32.mrb[13].mxu0 }
  0xff   : > { %1418 = vst.msk [vmem:[%s2108_s21 + $0x270] sm:$0xff] %vm1339_vm2, %v1808_v27  ;;  %1352 = vst.msk [vmem:[%s2108_s21 + $0x60] sm:$0xff] %vm1339_vm2, %v876_v28  ;;  %v1132_v29 = vpop.f32.mrb[13].mxu1  ;;  %v1745_v30 = vpop.f32.mrb[14].mxu0 }
 0x100   : > { %1416 = vst.msk [vmem:[%s2108_s21 + $0x260] sm:$0xff] %vm1339_vm2, %v1132_v29  ;;  %1355 = vst.msk [vmem:[%s2108_s21 + $0x78] sm:$0xff] %vm1339_vm2, %v1745_v30  ;;  %v1809_v31 = vpop.f32.mrb[14].mxu1  ;;  %v879_v32 = vpop.f32.mrb[15].mxu0 }
 0x101   : > { %1419 = vst.msk [vmem:[%s2108_s21 + $0x278] sm:$0xff] %vm1339_vm2, %v1809_v31  ;;  %1353 = vst.msk [vmem:[%s2108_s21 + $0x68] sm:$0xff] %vm1339_vm2, %v879_v32  ;;  %v1135_v33 = vpop.f32.mrb[15].mxu1 }
 0x102   : > { %1417 = vst.msk [vmem:[%s2108_s21 + $0x268] sm:$0xff] %vm1339_vm2, %v1135_v33 }
 0x105   : > { %v1748_v34 = vpop.f32.mrb[16].mxu0 }
 0x106   : > { %1358 = vst.msk [vmem:[%s2108_s21 + $0x90] sm:$0xff] %vm1339_vm2, %v1748_v34  ;;  %v1812_v35 = vpop.f32.mrb[16].mxu1  ;;  %v892_v36 = vpop.f32.mrb[17].mxu0 }
 0x107   : > { %1422 = vst.msk [vmem:[%s2108_s21 + $0x290] sm:$0xff] %vm1339_vm2, %v1812_v35  ;;  %1356 = vst.msk [vmem:[%s2108_s21 + $0x80] sm:$0xff] %vm1339_vm2, %v892_v36  ;;  %v1148_v37 = vpop.f32.mrb[17].mxu1  ;;  %v1749_v38 = vpop.f32.mrb[18].mxu0 }
 0x108   : > { %1420 = vst.msk [vmem:[%s2108_s21 + $0x280] sm:$0xff] %vm1339_vm2, %v1148_v37  ;;  %1359 = vst.msk [vmem:[%s2108_s21 + $0x98] sm:$0xff] %vm1339_vm2, %v1749_v38  ;;  %v1813_v39 = vpop.f32.mrb[18].mxu1  ;;  %v895_v40 = vpop.f32.mrb[19].mxu0 }
 0x109   : > { %1423 = vst.msk [vmem:[%s2108_s21 + $0x298] sm:$0xff] %vm1339_vm2, %v1813_v39  ;;  %1357 = vst.msk [vmem:[%s2108_s21 + $0x88] sm:$0xff] %vm1339_vm2, %v895_v40  ;;  %v1151_v41 = vpop.f32.mrb[19].mxu1 }
 0x10a   : > { %1421 = vst.msk [vmem:[%s2108_s21 + $0x288] sm:$0xff] %vm1339_vm2, %v1151_v41 }
 0x10d   : > { %v1752_v42 = vpop.f32.mrb[20].mxu0 }
 0x10e   : > { %1362 = vst.msk [vmem:[%s2108_s21 + $0xb0] sm:$0xff] %vm1339_vm2, %v1752_v42  ;;  %v1816_v43 = vpop.f32.mrb[20].mxu1  ;;  %v908_v44 = vpop.f32.mrb[21].mxu0 }
 0x10f   : > { %1426 = vst.msk [vmem:[%s2108_s21 + $0x2b0] sm:$0xff] %vm1339_vm2, %v1816_v43  ;;  %1360 = vst.msk [vmem:[%s2108_s21 + $0xa0] sm:$0xff] %vm1339_vm2, %v908_v44  ;;  %v1164_v45 = vpop.f32.mrb[21].mxu1  ;;  %v1753_v46 = vpop.f32.mrb[22].mxu0 }
 0x110   : > { %1424 = vst.msk [vmem:[%s2108_s21 + $0x2a0] sm:$0xff] %vm1339_vm2, %v1164_v45  ;;  %1363 = vst.msk [vmem:[%s2108_s21 + $0xb8] sm:$0xff] %vm1339_vm2, %v1753_v46  ;;  %v1817_v47 = vpop.f32.mrb[22].mxu1  ;;  %v911_v48 = vpop.f32.mrb[23].mxu0 }
 0x111   : > { %1427 = vst.msk [vmem:[%s2108_s21 + $0x2b8] sm:$0xff] %vm1339_vm2, %v1817_v47  ;;  %1361 = vst.msk [vmem:[%s2108_s21 + $0xa8] sm:$0xff] %vm1339_vm2, %v911_v48  ;;  %v1167_v49 = vpop.f32.mrb[23].mxu1 }
 0x112   : > { %1425 = vst.msk [vmem:[%s2108_s21 + $0x2a8] sm:$0xff] %vm1339_vm2, %v1167_v49 }
 0x115   : > { %v1756_v50 = vpop.f32.mrb[24].mxu0 }
 0x116   : > { %1366 = vst.msk [vmem:[%s2108_s21 + $0xd0] sm:$0xff] %vm1339_vm2, %v1756_v50  ;;  %v1820_v51 = vpop.f32.mrb[24].mxu1  ;;  %v924_v52 = vpop.f32.mrb[25].mxu0 }
 0x117   : > { %1430 = vst.msk [vmem:[%s2108_s21 + $0x2d0] sm:$0xff] %vm1339_vm2, %v1820_v51  ;;  %1364 = vst.msk [vmem:[%s2108_s21 + $0xc0] sm:$0xff] %vm1339_vm2, %v924_v52  ;;  %v1180_v53 = vpop.f32.mrb[25].mxu1  ;;  %v1757_v54 = vpop.f32.mrb[26].mxu0 }
 0x118   : > { %1428 = vst.msk [vmem:[%s2108_s21 + $0x2c0] sm:$0xff] %vm1339_vm2, %v1180_v53  ;;  %1367 = vst.msk [vmem:[%s2108_s21 + $0xd8] sm:$0xff] %vm1339_vm2, %v1757_v54  ;;  %v1821_v55 = vpop.f32.mrb[26].mxu1  ;;  %v927_v56 = vpop.f32.mrb[27].mxu0 }
 0x119   : > { %1431 = vst.msk [vmem:[%s2108_s21 + $0x2d8] sm:$0xff] %vm1339_vm2, %v1821_v55  ;;  %1365 = vst.msk [vmem:[%s2108_s21 + $0xc8] sm:$0xff] %vm1339_vm2, %v927_v56  ;;  %v1183_v57 = vpop.f32.mrb[27].mxu1 }
 0x11a   : > { %1429 = vst.msk [vmem:[%s2108_s21 + $0x2c8] sm:$0xff] %vm1339_vm2, %v1183_v57 }
 0x11d   : > { %v1760_v58 = vpop.f32.mrb[28].mxu0 }
 0x11e   : > { %1370 = vst.msk [vmem:[%s2108_s21 + $0xf0] sm:$0xff] %vm1339_vm2, %v1760_v58  ;;  %v1824_v59 = vpop.f32.mrb[28].mxu1  ;;  %v940_v60 = vpop.f32.mrb[29].mxu0 }
 0x11f   : > { %1434 = vst.msk [vmem:[%s2108_s21 + $0x2f0] sm:$0xff] %vm1339_vm2, %v1824_v59  ;;  %1368 = vst.msk [vmem:[%s2108_s21 + $0xe0] sm:$0xff] %vm1339_vm2, %v940_v60  ;;  %v1196_v61 = vpop.f32.mrb[29].mxu1  ;;  %v1761_v62 = vpop.f32.mrb[30].mxu0 }
 0x120   : > { %1432 = vst.msk [vmem:[%s2108_s21 + $0x2e0] sm:$0xff] %vm1339_vm2, %v1196_v61  ;;  %1371 = vst.msk [vmem:[%s2108_s21 + $0xf8] sm:$0xff] %vm1339_vm2, %v1761_v62  ;;  %v1825_v63 = vpop.f32.mrb[30].mxu1  ;;  %v943_v0 = vpop.f32.mrb[31].mxu0 }
 0x121   : > { %1435 = vst.msk [vmem:[%s2108_s21 + $0x2f8] sm:$0xff] %vm1339_vm2, %v1825_v63  ;;  %1369 = vst.msk [vmem:[%s2108_s21 + $0xe8] sm:$0xff] %vm1339_vm2, %v943_v0  ;;  %v1199_v1 = vpop.f32.mrb[31].mxu1 }
 0x122   : > { %1433 = vst.msk [vmem:[%s2108_s21 + $0x2e8] sm:$0xff] %vm1339_vm2, %v1199_v1 }
 0x125   : > { %v1764_v2 = vpop.f32.mrb[32].mxu0 }
 0x126   : > { %1374 = vst.msk [vmem:[%s2108_s21 + $0x110] sm:$0xff] %vm1339_vm2, %v1764_v2  ;;  %v1828_v3 = vpop.f32.mrb[32].mxu1  ;;  %v956_v4 = vpop.f32.mrb[33].mxu0 }
 0x127   : > { %1438 = vst.msk [vmem:[%s2108_s21 + $0x310] sm:$0xff] %vm1339_vm2, %v1828_v3  ;;  %1372 = vst.msk [vmem:[%s2108_s21 + $0x100] sm:$0xff] %vm1339_vm2, %v956_v4  ;;  %v1212_v5 = vpop.f32.mrb[33].mxu1  ;;  %v1765_v6 = vpop.f32.mrb[34].mxu0 }
 0x128   : > { %1436 = vst.msk [vmem:[%s2108_s21 + $0x300] sm:$0xff] %vm1339_vm2, %v1212_v5  ;;  %1375 = vst.msk [vmem:[%s2108_s21 + $0x118] sm:$0xff] %vm1339_vm2, %v1765_v6  ;;  %v1829_v7 = vpop.f32.mrb[34].mxu1  ;;  %v959_v8 = vpop.f32.mrb[35].mxu0 }
 0x129   : > { %1439 = vst.msk [vmem:[%s2108_s21 + $0x318] sm:$0xff] %vm1339_vm2, %v1829_v7  ;;  %1373 = vst.msk [vmem:[%s2108_s21 + $0x108] sm:$0xff] %vm1339_vm2, %v959_v8  ;;  %v1215_v9 = vpop.f32.mrb[35].mxu1 }
 0x12a   : > { %1437 = vst.msk [vmem:[%s2108_s21 + $0x308] sm:$0xff] %vm1339_vm2, %v1215_v9 }
 0x12d   : > { %v1768_v10 = vpop.f32.mrb[36].mxu0 }
 0x12e   : > { %1378 = vst.msk [vmem:[%s2108_s21 + $0x130] sm:$0xff] %vm1339_vm2, %v1768_v10  ;;  %v1832_v11 = vpop.f32.mrb[36].mxu1  ;;  %v972_v12 = vpop.f32.mrb[37].mxu0 }
 0x12f   : > { %1442 = vst.msk [vmem:[%s2108_s21 + $0x330] sm:$0xff] %vm1339_vm2, %v1832_v11  ;;  %1376 = vst.msk [vmem:[%s2108_s21 + $0x120] sm:$0xff] %vm1339_vm2, %v972_v12  ;;  %v1228_v13 = vpop.f32.mrb[37].mxu1  ;;  %v1769_v14 = vpop.f32.mrb[38].mxu0 }
 0x130   : > { %1440 = vst.msk [vmem:[%s2108_s21 + $0x320] sm:$0xff] %vm1339_vm2, %v1228_v13  ;;  %1379 = vst.msk [vmem:[%s2108_s21 + $0x138] sm:$0xff] %vm1339_vm2, %v1769_v14  ;;  %v1833_v15 = vpop.f32.mrb[38].mxu1  ;;  %v975_v16 = vpop.f32.mrb[39].mxu0 }
 0x131   : > { %1443 = vst.msk [vmem:[%s2108_s21 + $0x338] sm:$0xff] %vm1339_vm2, %v1833_v15  ;;  %1377 = vst.msk [vmem:[%s2108_s21 + $0x128] sm:$0xff] %vm1339_vm2, %v975_v16  ;;  %v1231_v17 = vpop.f32.mrb[39].mxu1 }
 0x132   : > { %1441 = vst.msk [vmem:[%s2108_s21 + $0x328] sm:$0xff] %vm1339_vm2, %v1231_v17 }
 0x135   : > { %v1772_v18 = vpop.f32.mrb[40].mxu0 }
 0x136   : > { %1382 = vst.msk [vmem:[%s2108_s21 + $0x150] sm:$0xff] %vm1339_vm2, %v1772_v18  ;;  %v1836_v19 = vpop.f32.mrb[40].mxu1  ;;  %v988_v20 = vpop.f32.mrb[41].mxu0 }
 0x137   : > { %1446 = vst.msk [vmem:[%s2108_s21 + $0x350] sm:$0xff] %vm1339_vm2, %v1836_v19  ;;  %1380 = vst.msk [vmem:[%s2108_s21 + $0x140] sm:$0xff] %vm1339_vm2, %v988_v20  ;;  %v1244_v21 = vpop.f32.mrb[41].mxu1  ;;  %v1773_v22 = vpop.f32.mrb[42].mxu0 }
 0x138   : > { %1444 = vst.msk [vmem:[%s2108_s21 + $0x340] sm:$0xff] %vm1339_vm2, %v1244_v21  ;;  %1383 = vst.msk [vmem:[%s2108_s21 + $0x158] sm:$0xff] %vm1339_vm2, %v1773_v22  ;;  %v1837_v23 = vpop.f32.mrb[42].mxu1  ;;  %v991_v24 = vpop.f32.mrb[43].mxu0 }
 0x139   : > { %1447 = vst.msk [vmem:[%s2108_s21 + $0x358] sm:$0xff] %vm1339_vm2, %v1837_v23  ;;  %1381 = vst.msk [vmem:[%s2108_s21 + $0x148] sm:$0xff] %vm1339_vm2, %v991_v24  ;;  %v1247_v25 = vpop.f32.mrb[43].mxu1 }
 0x13a   : > { %1445 = vst.msk [vmem:[%s2108_s21 + $0x348] sm:$0xff] %vm1339_vm2, %v1247_v25 }
 0x13d   : > { %v1776_v26 = vpop.f32.mrb[44].mxu0 }
 0x13e   : > { %1386 = vst.msk [vmem:[%s2108_s21 + $0x170] sm:$0xff] %vm1339_vm2, %v1776_v26  ;;  %v1840_v27 = vpop.f32.mrb[44].mxu1  ;;  %v1004_v28 = vpop.f32.mrb[45].mxu0 }
 0x13f   : > { %1450 = vst.msk [vmem:[%s2108_s21 + $0x370] sm:$0xff] %vm1339_vm2, %v1840_v27  ;;  %1384 = vst.msk [vmem:[%s2108_s21 + $0x160] sm:$0xff] %vm1339_vm2, %v1004_v28  ;;  %v1260_v29 = vpop.f32.mrb[45].mxu1  ;;  %v1777_v30 = vpop.f32.mrb[46].mxu0 }
 0x140   : > { %1448 = vst.msk [vmem:[%s2108_s21 + $0x360] sm:$0xff] %vm1339_vm2, %v1260_v29  ;;  %1387 = vst.msk [vmem:[%s2108_s21 + $0x178] sm:$0xff] %vm1339_vm2, %v1777_v30  ;;  %v1841_v31 = vpop.f32.mrb[46].mxu1  ;;  %v1007_v32 = vpop.f32.mrb[47].mxu0 }
 0x141   : > { %1451 = vst.msk [vmem:[%s2108_s21 + $0x378] sm:$0xff] %vm1339_vm2, %v1841_v31  ;;  %1385 = vst.msk [vmem:[%s2108_s21 + $0x168] sm:$0xff] %vm1339_vm2, %v1007_v32  ;;  %v1263_v33 = vpop.f32.mrb[47].mxu1 }
 0x142   : > { %1449 = vst.msk [vmem:[%s2108_s21 + $0x368] sm:$0xff] %vm1339_vm2, %v1263_v33 }
 0x145   : > { %v1780_v34 = vpop.f32.mrb[48].mxu0 }
 0x146   : > { %1390 = vst.msk [vmem:[%s2108_s21 + $0x190] sm:$0xff] %vm1339_vm2, %v1780_v34  ;;  %v1844_v35 = vpop.f32.mrb[48].mxu1  ;;  %v1020_v36 = vpop.f32.mrb[49].mxu0 }
 0x147   : > { %1454 = vst.msk [vmem:[%s2108_s21 + $0x390] sm:$0xff] %vm1339_vm2, %v1844_v35  ;;  %1388 = vst.msk [vmem:[%s2108_s21 + $0x180] sm:$0xff] %vm1339_vm2, %v1020_v36  ;;  %v1276_v37 = vpop.f32.mrb[49].mxu1  ;;  %v1781_v38 = vpop.f32.mrb[50].mxu0 }
 0x148   : > { %1452 = vst.msk [vmem:[%s2108_s21 + $0x380] sm:$0xff] %vm1339_vm2, %v1276_v37  ;;  %1391 = vst.msk [vmem:[%s2108_s21 + $0x198] sm:$0xff] %vm1339_vm2, %v1781_v38  ;;  %v1845_v39 = vpop.f32.mrb[50].mxu1  ;;  %v1023_v40 = vpop.f32.mrb[51].mxu0 }
 0x149   : > { %1455 = vst.msk [vmem:[%s2108_s21 + $0x398] sm:$0xff] %vm1339_vm2, %v1845_v39  ;;  %1389 = vst.msk [vmem:[%s2108_s21 + $0x188] sm:$0xff] %vm1339_vm2, %v1023_v40  ;;  %v1279_v41 = vpop.f32.mrb[51].mxu1 }
 0x14a   : > { %1453 = vst.msk [vmem:[%s2108_s21 + $0x388] sm:$0xff] %vm1339_vm2, %v1279_v41 }
 0x14d   : > { %v1784_v42 = vpop.f32.mrb[52].mxu0 }
 0x14e   : > { %1394 = vst.msk [vmem:[%s2108_s21 + $0x1b0] sm:$0xff] %vm1339_vm2, %v1784_v42  ;;  %v1848_v43 = vpop.f32.mrb[52].mxu1  ;;  %v1036_v44 = vpop.f32.mrb[53].mxu0 }
 0x14f   : > { %1458 = vst.msk [vmem:[%s2108_s21 + $0x3b0] sm:$0xff] %vm1339_vm2, %v1848_v43  ;;  %1392 = vst.msk [vmem:[%s2108_s21 + $0x1a0] sm:$0xff] %vm1339_vm2, %v1036_v44  ;;  %v1292_v45 = vpop.f32.mrb[53].mxu1  ;;  %v1785_v46 = vpop.f32.mrb[54].mxu0 }
 0x150   : > { %1456 = vst.msk [vmem:[%s2108_s21 + $0x3a0] sm:$0xff] %vm1339_vm2, %v1292_v45  ;;  %1395 = vst.msk [vmem:[%s2108_s21 + $0x1b8] sm:$0xff] %vm1339_vm2, %v1785_v46  ;;  %v1849_v47 = vpop.f32.mrb[54].mxu1  ;;  %v1039_v48 = vpop.f32.mrb[55].mxu0 }
 0x151   : > { %1459 = vst.msk [vmem:[%s2108_s21 + $0x3b8] sm:$0xff] %vm1339_vm2, %v1849_v47  ;;  %1393 = vst.msk [vmem:[%s2108_s21 + $0x1a8] sm:$0xff] %vm1339_vm2, %v1039_v48  ;;  %v1295_v49 = vpop.f32.mrb[55].mxu1 }
 0x152   : > { %1457 = vst.msk [vmem:[%s2108_s21 + $0x3a8] sm:$0xff] %vm1339_vm2, %v1295_v49 }
 0x155   : > { %v1788_v50 = vpop.f32.mrb[56].mxu0 }
 0x156   : > { %1398 = vst.msk [vmem:[%s2108_s21 + $0x1d0] sm:$0xff] %vm1339_vm2, %v1788_v50  ;;  %v1852_v51 = vpop.f32.mrb[56].mxu1  ;;  %v1052_v52 = vpop.f32.mrb[57].mxu0 }
 0x157   : > { %1462 = vst.msk [vmem:[%s2108_s21 + $0x3d0] sm:$0xff] %vm1339_vm2, %v1852_v51  ;;  %1396 = vst.msk [vmem:[%s2108_s21 + $0x1c0] sm:$0xff] %vm1339_vm2, %v1052_v52  ;;  %v1308_v53 = vpop.f32.mrb[57].mxu1  ;;  %v1789_v54 = vpop.f32.mrb[58].mxu0 }
 0x158   : > { %1460 = vst.msk [vmem:[%s2108_s21 + $0x3c0] sm:$0xff] %vm1339_vm2, %v1308_v53  ;;  %1399 = vst.msk [vmem:[%s2108_s21 + $0x1d8] sm:$0xff] %vm1339_vm2, %v1789_v54  ;;  %v1853_v55 = vpop.f32.mrb[58].mxu1  ;;  %v1055_v56 = vpop.f32.mrb[59].mxu0 }
 0x159   : > { %1463 = vst.msk [vmem:[%s2108_s21 + $0x3d8] sm:$0xff] %vm1339_vm2, %v1853_v55  ;;  %1397 = vst.msk [vmem:[%s2108_s21 + $0x1c8] sm:$0xff] %vm1339_vm2, %v1055_v56  ;;  %v1311_v57 = vpop.f32.mrb[59].mxu1 }
 0x15a   : > { %1461 = vst.msk [vmem:[%s2108_s21 + $0x3c8] sm:$0xff] %vm1339_vm2, %v1311_v57 }
 0x15d   : > { %v1792_v58 = vpop.f32.mrb[60].mxu0 }
 0x15e   : > { %1402 = vst.msk [vmem:[%s2108_s21 + $0x1f0] sm:$0xff] %vm1339_vm2, %v1792_v58  ;;  %v1856_v59 = vpop.f32.mrb[60].mxu1  ;;  %v1068_v60 = vpop.f32.mrb[61].mxu0 }
 0x15f   : > { %1466 = vst.msk [vmem:[%s2108_s21 + $0x3f0] sm:$0xff] %vm1339_vm2, %v1856_v59  ;;  %1400 = vst.msk [vmem:[%s2108_s21 + $0x1e0] sm:$0xff] %vm1339_vm2, %v1068_v60  ;;  %v1324_v61 = vpop.f32.mrb[61].mxu1  ;;  %v1793_v62 = vpop.f32.mrb[62].mxu0 }
 0x160   : > { %1464 = vst.msk [vmem:[%s2108_s21 + $0x3e0] sm:$0xff] %vm1339_vm2, %v1324_v61  ;;  %1403 = vst.msk [vmem:[%s2108_s21 + $0x1f8] sm:$0xff] %vm1339_vm2, %v1793_v62  ;;  %v1857_v63 = vpop.f32.mrb[62].mxu1  ;;  %v1071_v0 = vpop.f32.mrb[63].mxu0 }
 0x161   : > { %1467 = vst.msk [vmem:[%s2108_s21 + $0x3f8] sm:$0xff] %vm1339_vm2, %v1857_v63  ;;  %1401 = vst.msk [vmem:[%s2108_s21 + $0x1e8] sm:$0xff] %vm1339_vm2, %v1071_v0  ;;  %v1327_v1 = vpop.f32.mrb[63].mxu1 }
 0x162   : > { %1465 = vst.msk [vmem:[%s2108_s21 + $0x3e8] sm:$0xff] %vm1339_vm2, %v1327_v1 }
 0x163 PF: > { %s12_s9 = sadd.s32 1, %s1940_s9  }
 0x164   : > { %p9_p4 = scmp.ge.s32.totalorder %s12_s9, 4  }
 0x166   :  { %11 = sbr.rel (!%p9_p4) target bundleno = 1 (0x1), region = 58 }

// kernel: _lambda_.19
= control target key start
LH: loop header
LB: loop body
LE: loop exit
PB: predicated region body
PF: predicated region fallthrough
CT: control target
= control target key end

     0   :  { %s110_s0 = inlined_call_operand.vmem [shape: f32[64,128], index: 0, kind: input, shape index: {}]   ;;  %s111_s1 = inlined_call_operand.vmem [shape: f32[64,128], index: 1, kind: output, shape index: {}]  }
   0x1   :  { %v8_v0 = vld [vmem:[%s110_s0] sm:$0xff]  ;;  %v9_v1 = vld [vmem:[%s110_s0 + $0x8] sm:$0xff]  ;;  %v10_v2 = vld [vmem:[%s110_s0 + $0x10] sm:$0xff] }
   0x2   :  { %36 = vtanh.f32 %v8_v0  ;;  %v11_v3 = vld [vmem:[%s110_s0 + $0x18] sm:$0xff]  ;;  %v12_v4 = vld [vmem:[%s110_s0 + $0x20] sm:$0xff]  ;;  %v13_v5 = vld [vmem:[%s110_s0 + $0x28] sm:$0xff] }
   0x3   :  { %38 = vtanh.f32 %v9_v1  ;;  %v14_v6 = vld [vmem:[%s110_s0 + $0x30] sm:$0xff]  ;;  %v15_v7 = vld [vmem:[%s110_s0 + $0x38] sm:$0xff] }
   0x4   :  { %40 = vtanh.f32 %v10_v2 }
   0x5   :  { %42 = vtanh.f32 %v11_v3 }
   0x6   :  { %44 = vtanh.f32 %v12_v4 }
   0x7   :  { %46 = vtanh.f32 %v13_v5 }
   0x8   :  { %48 = vtanh.f32 %v14_v6 }
   0x9   :  { %50 = vtanh.f32 %v15_v7 }
   0xc   :  { %v37_v8 = vpop.eup %36 }
   0xd   :  { %v39_v9 = vpop.eup %38  ;;  %24 = vst [vmem:[%s111_s1] sm:$0xff] %v37_v8 }
   0xe   :  { %v41_v10 = vpop.eup %40  ;;  %25 = vst [vmem:[%s111_s1 + $0x8] sm:$0xff] %v39_v9 }
   0xf   :  { %v43_v11 = vpop.eup %42  ;;  %26 = vst [vmem:[%s111_s1 + $0x10] sm:$0xff] %v41_v10 }
  0x10   :  { %v45_v12 = vpop.eup %44  ;;  %27 = vst [vmem:[%s111_s1 + $0x18] sm:$0xff] %v43_v11 }
  0x11   :  { %v47_v13 = vpop.eup %46  ;;  %28 = vst [vmem:[%s111_s1 + $0x20] sm:$0xff] %v45_v12 }
  0x12   :  { %v49_v14 = vpop.eup %48  ;;  %29 = vst [vmem:[%s111_s1 + $0x28] sm:$0xff] %v47_v13 }
  0x13   :  { %v51_v15 = vpop.eup %50  ;;  %30 = vst [vmem:[%s111_s1 + $0x30] sm:$0xff] %v49_v14 }
  0x14   :  { %31 = vst [vmem:[%s111_s1 + $0x38] sm:$0xff] %v51_v15 }

</bundles_post_ra>
